<compile_context>
chip_gen: v6e
topology: v6e:2x2x1
jax: 0.10.0
libtpu: 0.0.40
codegen_flags: <defaults>
</compile_context>

<pallas_src>
import functools
import math

import jax
import jax.numpy as jnp
from jax import lax
from jax.experimental import pallas as pl
from jax.experimental.pallas import tpu as pltpu

_NEG = -1e30


@functools.lru_cache(maxsize=None)
def _vmem_limit():
    """Generation-aware VMEM limit: 3/4 of physical, capped at 100 MiB."""
    cap = 64 * 1024 * 1024
    try:
        info = pltpu.get_tpu_info()
        cap = int(getattr(info, "vmem_capacity_bytes", cap))
    except Exception:
        pass
    return max(32 * 1024 * 1024, min((cap * 3) // 4, 100 * 1024 * 1024))


def _row_block(m):
    """Row tile for the M = B*S gridded kernels (HBM-bound: bigger is better)."""
    return m if m <= 512 else 512


def _kv_tile(s):
    """kv-chunk size for the flash-style mLSTM cell."""
    if s <= 256:
        return s
    for t in (256, 128, 64, 32, 16, 8):
        if s % t == 0:
            return t
    return s


# ---------------------------------------------------------------------------
# Kernel: initial Linear fused with the residual add   (x1 @ W + b + x2)
# ---------------------------------------------------------------------------
def _linear_add_kernel(x_ref, w_ref, b_ref, r_ref, o_ref):
    acc = jnp.dot(x_ref[...], w_ref[...], preferred_element_type=jnp.float32)
    o_ref[...] = (acc + b_ref[...] + r_ref[...]).astype(o_ref.dtype)


def pallas_linear_add(x, w, b, r):
    lead = x.shape[:-1]
    din = x.shape[-1]
    dout = w.shape[1]
    x2 = x.reshape(-1, din)
    r2 = r.reshape(-1, dout)
    m = x2.shape[0]
    bm = _row_block(m)
    out = pl.pallas_call(
        _linear_add_kernel,
        out_shape=jax.ShapeDtypeStruct((m, dout), x.dtype),
        grid=(pl.cdiv(m, bm),),
        in_specs=[
            pl.BlockSpec((bm, din), lambda i: (i, 0)),
            pl.BlockSpec((din, dout), lambda i: (0, 0)),
            pl.BlockSpec((1, dout), lambda i: (0, 0)),
            pl.BlockSpec((bm, dout), lambda i: (i, 0)),
        ],
        out_specs=pl.BlockSpec((bm, dout), lambda i: (i, 0)),
        compiler_params=pltpu.CompilerParams(
            dimension_semantics=("parallel",), vmem_limit_bytes=_vmem_limit()),
    )(x2, w, b.reshape(1, dout), r2)
    return out.reshape(*lead, dout)


# ---------------------------------------------------------------------------
# Kernel: plain LayerNorm (post-blocks norm)
# ---------------------------------------------------------------------------
def _layernorm_kernel(x_ref, w_ref, b_ref, o_ref):
    x = x_ref[...]
    mu = jnp.mean(x, axis=1, keepdims=True)
    var = jnp.mean((x - mu) ** 2, axis=1, keepdims=True)
    o_ref[...] = ((x - mu) * lax.rsqrt(var + 1e-5) * w_ref[...]
                  + b_ref[...]).astype(o_ref.dtype)


def pallas_layernorm(x, w, b):
    lead = x.shape[:-1]
    d = x.shape[-1]
    x2 = x.reshape(-1, d)
    m = x2.shape[0]
    bm = _row_block(m)
    out = pl.pallas_call(
        _layernorm_kernel,
        out_shape=jax.ShapeDtypeStruct((m, d), x.dtype),
        grid=(pl.cdiv(m, bm),),
        in_specs=[
            pl.BlockSpec((bm, d), lambda i: (i, 0)),
            pl.BlockSpec((1, d), lambda i: (0, 0)),
            pl.BlockSpec((1, d), lambda i: (0, 0)),
        ],
        out_specs=pl.BlockSpec((bm, d), lambda i: (i, 0)),
        compiler_params=pltpu.CompilerParams(
            dimension_semantics=("parallel",), vmem_limit_bytes=_vmem_limit()),
    )(x2, w.reshape(1, d), b.reshape(1, d))
    return out.reshape(*lead, d)


# ---------------------------------------------------------------------------
# Kernel A: fused  LayerNorm -> W_up -> [x_m | z]  and  x_m -> [v | i_m | f_m]
#   Outputs are split so downstream kernels only DMA what they consume.
# ---------------------------------------------------------------------------
def _ln_up_split_kernel(x_ref, lnw_ref, lnb_ref, wup_ref, bup_ref,
                        wm_ref, bm_ref, xm_o, z_o, v_o, ifm_o, *, inner):
    x = x_ref[...]
    mu = jnp.mean(x, axis=1, keepdims=True)
    var = jnp.mean((x - mu) ** 2, axis=1, keepdims=True)
    h = (x - mu) * lax.rsqrt(var + 1e-5) * lnw_ref[...] + lnb_ref[...]
    up = jnp.dot(h, wup_ref[...], preferred_element_type=jnp.float32) + bup_ref[...]
    x_m = up[:, :inner]
    xm_o[...] = x_m.astype(xm_o.dtype)
    z_o[...] = up[:, inner:].astype(z_o.dtype)
    vif = jnp.dot(x_m, wm_ref[...], preferred_element_type=jnp.float32) + bm_ref[...]
    v_o[...] = vif[:, :inner].astype(v_o.dtype)
    ifm_o[...] = vif[:, inner:].astype(ifm_o.dtype)


def pallas_ln_up_split(x, ln_w, ln_b, w_up, b_up, w_m, b_m, inner, nh):
    b_sz, s, d = x.shape
    x2 = x.reshape(-1, d)
    m = x2.shape[0]
    bm = _row_block(m)
    two_inner = w_up.shape[1]
    v_w = w_m.shape[1]                 # inner + 2*nh
    outs = pl.pallas_call(
        functools.partial(_ln_up_split_kernel, inner=inner),
        out_shape=(jax.ShapeDtypeStruct((m, inner), x.dtype),
                   jax.ShapeDtypeStruct((m, inner), x.dtype),
                   jax.ShapeDtypeStruct((m, inner), x.dtype),
                   jax.ShapeDtypeStruct((m, 2 * nh), x.dtype)),
        grid=(pl.cdiv(m, bm),),
        in_specs=[
            pl.BlockSpec((bm, d), lambda i: (i, 0)),
            pl.BlockSpec((1, d), lambda i: (0, 0)),
            pl.BlockSpec((1, d), lambda i: (0, 0)),
            pl.BlockSpec((d, two_inner), lambda i: (0, 0)),
            pl.BlockSpec((1, two_inner), lambda i: (0, 0)),
            pl.BlockSpec((inner, v_w), lambda i: (0, 0)),
            pl.BlockSpec((1, v_w), lambda i: (0, 0)),
        ],
        out_specs=(pl.BlockSpec((bm, inner), lambda i: (i, 0)),
                   pl.BlockSpec((bm, inner), lambda i: (i, 0)),
                   pl.BlockSpec((bm, inner), lambda i: (i, 0)),
                   pl.BlockSpec((bm, 2 * nh), lambda i: (i, 0))),
        compiler_params=pltpu.CompilerParams(
            dimension_semantics=("parallel",), vmem_limit_bytes=_vmem_limit()),
    )(x2, ln_w.reshape(1, d), ln_b.reshape(1, d),
      w_up, b_up.reshape(1, two_inner), w_m, b_m.reshape(1, v_w))
    rs = lambda a: a.reshape(b_sz, s, a.shape[-1])
    x_m, z, v, if_m = outs
    return rs(x_m), rs(z), rs(v), rs(if_m)


# ---------------------------------------------------------------------------
# Kernel B: per-batch fused  conv+SiLU -> [q|k|i_c|f_c] -> gate prep ->
#           flash-chunked stabilized mLSTM + head-LN -> glue -> W_down -> +x
# ---------------------------------------------------------------------------
def _mlstm_block_core_kernel(xm_ref, z_ref, v_ref, ifm_ref, res_ref,
                             cw_ref, cb_ref, wc_ref, bc_ref,
                             outw_ref, skip_ref, wdown_ref, bdown_ref,
                             o_ref,
                             xconv_s, qkif_s, growt_s, ht_s,
                             *, inner, nh, dh, k_conv, tk):
    s = xm_ref.shape[1]
    nk = s // tk
    inv_sqrt_dh = 1.0 / math.sqrt(dh)
    row_col = lax.broadcasted_iota(jnp.int32, (s, 1), 0)       # reused (S,1) row index

    # ---- causal depthwise conv + SiLU --------------------------------------
    x_m = xm_ref[0]                                            # (S, inner)
    cw = cw_ref[...]                                           # (K, inner) tap-major
    acc = x_m * cw[k_conv - 1:k_conv, :]                       # zero-shift tap
    for t in range(k_conv - 1):                                # y[i] += w[t]*x[i-(K-1-t)]
        shift = k_conv - 1 - t
        shifted = pltpu.roll(x_m, shift, axis=0)
        acc = acc + jnp.where(row_col >= shift, shifted, 0.0) * cw[t:t + 1, :]
    acc = acc + cb_ref[...]
    x_conv = acc * jax.nn.sigmoid(acc)                         # SiLU
    xconv_s[...] = x_conv

    # ---- [q | k | i_c | f_c] projection -------------------------------------
    qkif = jnp.dot(x_conv, wc_ref[...], preferred_element_type=jnp.float32) + bc_ref[...]
    qkif_s[...] = qkif

    # ---- gate prep (all in-kernel; no HBM round trip) -----------------------
    if_pre = qkif[:, 2 * inner:] + ifm_ref[0]                  # (S, 2*nh)
    i_pre = if_pre[:, :nh]
    f_pre = if_pre[:, nh:]
    # numerically stable log-sigmoid
    logf = jnp.minimum(f_pre, 0.0) - jnp.log(1.0 + jnp.exp(-jnp.abs(f_pre)))
    # inclusive cumulative sum along the sequence (Hillis-Steele: log2(S) roll+adds)
    f_cum = logf
    row_g = lax.broadcasted_iota(jnp.int32, (s, nh), 0)
    shift = 1
    while shift < s:
        f_cum = f_cum + jnp.where(row_g >= shift,
                                  pltpu.roll(f_cum, shift, axis=0), 0.0)
        shift *= 2
    # row-oriented gates per kv tile:  growt_s[j] = [F ; i_pre]^T  for tile j
    f_row = jnp.transpose(f_cum)                               # (nh, S)
    i_row = jnp.transpose(i_pre)                               # (nh, S)
    for j in range(nk):                                        # static; small
        growt_s[j, :nh, :] = f_row[:, j * tk:(j + 1) * tk]
        growt_s[j, nh:, :] = i_row[:, j * tk:(j + 1) * tk]

    # ---- per-head stabilized mLSTM, flash-chunked over kv tiles -------------
    # (big (S, tk) temporaries are bounded inside the fori_loop body; only the
    #  tiny (S,1)/(S,dh) running stats are carried across tiles)
    for h in range(nh):                                        # static lane offsets
        q_h = (qkif_s[:, h * dh:(h + 1) * dh] * inv_sqrt_dh).astype(jnp.bfloat16)
        f_col = f_cum[:, h:h + 1]                              # (S,1): F[i]

        def kv_step(j, carry):
            m_run, l_run, acc_run = carry
            start = pl.multiple_of(j * tk, tk)
            k_t = qkif_s[pl.ds(start, tk),
                         inner + h * dh:inner + (h + 1) * dh].astype(jnp.bfloat16)
            v_t = v_ref[0, pl.ds(start, tk), h * dh:(h + 1) * dh].astype(jnp.bfloat16)
            f_j = growt_s[j, h:h + 1, :]                       # (1, tk): F[j]
            i_j = growt_s[j, nh + h:nh + h + 1, :]             # (1, tk): i_pre[j]

            qk = lax.dot_general(q_h, k_t, (((1,), (1,)), ((), ())),
                                 preferred_element_type=jnp.float32)     # (S, tk)
            col = start + lax.broadcasted_iota(jnp.int32, (1, tk), 1)
            causal = row_col >= col
            log_d = jnp.where(causal, (f_col - f_j) + i_j, _NEG)
            m_new = jnp.maximum(m_run, jnp.max(log_d, axis=1, keepdims=True))
            alpha = jnp.exp(m_run - m_new)
            c = qk * jnp.exp(log_d - m_new)
            l_new = alpha * l_run + jnp.sum(c, axis=1, keepdims=True)
            acc_new = alpha * acc_run + jnp.dot(c.astype(jnp.bfloat16), v_t,
                                                preferred_element_type=jnp.float32)
            return m_new, l_new, acc_new

        # finite init (not -inf) so an all-masked tile can never yield inf-inf NaNs
        m0 = jnp.full((s, 1), _NEG, jnp.float32)
        l0 = jnp.zeros((s, 1), jnp.float32)
        a0 = jnp.zeros((s, dh), jnp.float32)
        m_f, l_f, acc_f = lax.fori_loop(0, nk, kv_step, (m0, l0, a0))

        norm = jnp.maximum(jnp.abs(l_f), jnp.exp(-m_f)) + 1e-6
        ht = acc_f * (1.0 / norm)                              # exact recip on (S,1) only
        mu = jnp.mean(ht, axis=1, keepdims=True)
        var = jnp.mean((ht - mu) ** 2, axis=1, keepdims=True)
        ht_s[:, h * dh:(h + 1) * dh] = (ht - mu) * lax.rsqrt(var + 1e-5)

    # ---- output glue: outnorm weight, conv skip, SiLU(z) gate, down-proj ----
    z = z_ref[0]
    h_tilde = ht_s[...] * outw_ref[...]
    h_state = (h_tilde + skip_ref[...] * xconv_s[...]) * (z * jax.nn.sigmoid(z))
    y = jnp.dot(h_state, wdown_ref[...], preferred_element_type=jnp.float32) + bdown_ref[...]
    # TODO(synk): dropout(p=0.1) is identity in eval mode; not emulated.
    o_ref[0] = (res_ref[0] + y).astype(o_ref.dtype)


def pallas_mlstm_core(x_m, z, v, if_m, res, p, nh):
    b_sz, s, inner = x_m.shape
    d = res.shape[-1]
    dh = inner // nh
    k_conv = p["conv_w_t"].shape[0]
    wq = p["W_c_cat"].shape[1]                 # 2*inner + 2*nh
    tk = _kv_tile(s)
    nk = s // tk
    kernel = functools.partial(_mlstm_block_core_kernel, inner=inner, nh=nh,
                               dh=dh, k_conv=k_conv, tk=tk)
    return pl.pallas_call(
        kernel,
        out_shape=jax.ShapeDtypeStruct((b_sz, s, d), res.dtype),
        grid=(b_sz,),
        in_specs=[
            pl.BlockSpec((1, s, inner), lambda b: (b, 0, 0)),     # x_m (conv input)
            pl.BlockSpec((1, s, inner), lambda b: (b, 0, 0)),     # z
            pl.BlockSpec((1, s, inner), lambda b: (b, 0, 0)),     # v
            pl.BlockSpec((1, s, 2 * nh), lambda b: (b, 0, 0)),    # i/f part from x_m
            pl.BlockSpec((1, s, d), lambda b: (b, 0, 0)),         # residual
            pl.BlockSpec((k_conv, inner), lambda b: (0, 0)),
            pl.BlockSpec((1, inner), lambda b: (0, 0)),
            pl.BlockSpec((inner, wq), lambda b: (0, 0)),
            pl.BlockSpec((1, wq), lambda b: (0, 0)),
            pl.BlockSpec((1, inner), lambda b: (0, 0)),           # outnorm_w
            pl.BlockSpec((1, inner), lambda b: (0, 0)),           # skip
            pl.BlockSpec((inner, d), lambda b: (0, 0)),
            pl.BlockSpec((1, d), lambda b: (0, 0)),
        ],
        out_specs=pl.BlockSpec((1, s, d), lambda b: (b, 0, 0)),
        scratch_shapes=[
            pltpu.VMEM((s, inner), jnp.float32),                  # x_conv
            pltpu.VMEM((s, wq), jnp.float32),                     # [q|k|i_c|f_c]
            pltpu.VMEM((nk, 2 * nh, tk), jnp.float32),            # row-oriented gates / kv tile
            pltpu.VMEM((s, inner), jnp.float32),                  # normalized head outputs
        ],
        compiler_params=pltpu.CompilerParams(
            dimension_semantics=("parallel",), vmem_limit_bytes=_vmem_limit()),
    )(x_m, z, v, if_m, res,
      p["conv_w_t"], p["conv_b"].reshape(1, inner),
      p["W_c_cat"], p["b_c_cat"].reshape(1, wq),
      p["outnorm_w"].reshape(1, inner), p["skip"].reshape(1, inner),
      p["W_down"], p["b_down"].reshape(1, d))


# ---------------------------------------------------------------------------
# Block / model glue
# ---------------------------------------------------------------------------
def mlstm_block(x, p, nh):
    inner = p["W_up"].shape[1] // 2
    x_m, z, v, if_m = pallas_ln_up_split(x, p["ln_w"], p["ln_b"], p["W_up"], p["b_up"],
                                         p["W_m_cat"], p["b_m_cat"], inner, nh)
    return pallas_mlstm_core(x_m, z, v, if_m, x, p, nh)


def double_xlstm_up(x1, x2, params):
    x = pallas_linear_add(x1, params["W_init"], params["b_init"], x2)   # initial + add
    for p in params["blocks"]:                                          # blocks=['m','m']
        x = mlstm_block(x, p, params["num_heads"])
    return pallas_layernorm(x, params["post_ln_w"], params["post_ln_b"])


# ---------------------------------------------------------------------------
# Parameter preparation: fold i/f gate projections into the fused matmuls.
#   i_pre = [q,k,v] @ Wi + bi  with q,k linear in x_conv and v linear in x_m,
#   so i_pre = x_conv @ Wi_conv + x_m @ Wi_m + bi_fold  (exact algebraic fold).
# ---------------------------------------------------------------------------
def prepare_params(raw):
    nh = raw["num_heads"]
    out = {"num_heads": nh, "W_init": raw["W_init"], "b_init": raw["b_init"],
           "post_ln_w": raw["post_ln_w"], "post_ln_b": raw["post_ln_b"], "blocks": []}
    for p in raw["blocks"]:
        inner = p["W_up"].shape[1] // 2
        Wi_q, Wi_k, Wi_v = p["Wi"][:inner], p["Wi"][inner:2 * inner], p["Wi"][2 * inner:]
        Wf_q, Wf_k, Wf_v = p["Wf"][:inner], p["Wf"][inner:2 * inner], p["Wf"][2 * inner:]
        Wi_conv = p["Wq"] @ Wi_q + p["Wk"] @ Wi_k
        Wf_conv = p["Wq"] @ Wf_q + p["Wk"] @ Wf_k
        Wi_m = p["Wv"] @ Wi_v
        Wf_m = p["Wv"] @ Wf_v
        bi_fold = p["bq"] @ Wi_q + p["bk"] @ Wi_k + p["bv"] @ Wi_v + p["bi"]
        bf_fold = p["bq"] @ Wf_q + p["bk"] @ Wf_k + p["bv"] @ Wf_v + p["bf"]
        out["blocks"].append({
            "ln_w": p["ln_w"], "ln_b": p["ln_b"],
            "W_up": p["W_up"], "b_up": p["b_up"],
            # x_m -> [v | i_m | f_m]
            "W_m_cat": jnp.concatenate([p["Wv"], Wi_m, Wf_m], axis=1),
            "b_m_cat": jnp.concatenate([p["bv"], bi_fold, bf_fold], axis=0),
            # x_conv -> [q | k | i_c | f_c]
            "W_c_cat": jnp.concatenate([p["Wq"], p["Wk"], Wi_conv, Wf_conv], axis=1),
            "b_c_cat": jnp.concatenate(
                [p["bq"], p["bk"], jnp.zeros((2 * nh,), p["bq"].dtype)], axis=0),
            "conv_w_t": p["conv_w"].T,          # (K, inner) tap-major
            "conv_b": p["conv_b"],
            "outnorm_w": p["outnorm_w"], "skip": p["skip"],
            "W_down": p["W_down"], "b_down": p["b_down"],
        })
    return out


# ---------------------------------------------------------------------------
# Deterministic parameter init (synthetic; shapes follow the module __init__)
# ---------------------------------------------------------------------------
def init_params(key, d_in, d, nh=4, proj_factor=2, k_conv=4, n_blocks=2):
    inner = proj_factor * d
    keys = list(jax.random.split(key, 64))
    kit = iter(keys)

    def nrm(shape, scale=0.02):
        return scale * jax.random.normal(next(kit), shape, jnp.float32)

    params = {
        "num_heads": nh,
        "W_init": nrm((d_in, d)),
        "b_init": jnp.zeros((d,), jnp.float32),
        "post_ln_w": jnp.ones((d,), jnp.float32),
        "post_ln_b": jnp.zeros((d,), jnp.float32),
        "blocks": [],
    }
    for _ in range(n_blocks):
        blk = {
            "ln_w": jnp.ones((d,), jnp.float32),
            "ln_b": jnp.zeros((d,), jnp.float32),
            "W_up": nrm((d, 2 * inner)),
            "b_up": jnp.zeros((2 * inner,), jnp.float32),
            "conv_w": nrm((inner, k_conv), 0.1),
            "conv_b": jnp.zeros((inner,), jnp.float32),
            "Wq": nrm((inner, inner)),
            "bq": jnp.zeros((inner,), jnp.float32),
            "Wk": nrm((inner, inner)),
            "bk": jnp.zeros((inner,), jnp.float32),
            "Wv": nrm((inner, inner)),
            "bv": jnp.zeros((inner,), jnp.float32),
            "Wi": nrm((3 * inner, nh)),
            "bi": jnp.zeros((nh,), jnp.float32),
            "Wf": nrm((3 * inner, nh)),
            "bf": jnp.linspace(3.0, 6.0, nh).astype(jnp.float32),
            "skip": jnp.ones((inner,), jnp.float32),
            "outnorm_w": jnp.ones((inner,), jnp.float32),
            "W_down": nrm((inner, d)),
            "b_down": jnp.zeros((d,), jnp.float32),
        }
        params["blocks"].append(blk)
    return params


if __name__ == "__main__":
    B, S, D_IN, D = 2, 8, 16, 32     # emb_size=32, initial_size=16
    key = jax.random.PRNGKey(0)
    k1, k2, k3 = jax.random.split(key, 3)
    x1 = jax.random.normal(k1, (B, S, D_IN), jnp.float32)
    x2 = jax.random.normal(k2, (B, S, D), jnp.float32)
    params = prepare_params(init_params(k3, D_IN, D))

    out = jax.jit(lambda a, b: double_xlstm_up(a, b, params))(x1, x2)
    jax.block_until_ready(out)
    assert out.shape == (B, S, D)
    assert bool(jnp.all(jnp.isfinite(out)))
    print("KERNEL_OK")
</pallas_src>

<mosaic_0001>
module attributes {stable_mosaic.version = 11 : i64} {
  func.func @_linear_add_kernel(%arg0: i32, %arg1: memref<16x16xf32, #tpu.memory_space<vmem>>, %arg2: memref<16x32xf32, #tpu.memory_space<vmem>>, %arg3: memref<1x32xf32, #tpu.memory_space<vmem>>, %arg4: memref<16x32xf32, #tpu.memory_space<vmem>>, %arg5: memref<16x32xf32, #tpu.memory_space<vmem>>) attributes {dimension_semantics = [#tpu.dimension_semantics<parallel>], iteration_bounds = array<i64: 1>, scalar_prefetch = 0 : i64, scratch_operands = 0 : i64, tpu.core_type = #tpu.core_type<tc>, window_params = [{transform_indices = @transform_0, window_bounds = array<i64: 16, 16>}, {pipeline_mode = #tpu.pipeline_mode<synchronous>, transform_indices = @transform_1, window_bounds = array<i64: 16, 32>}, {pipeline_mode = #tpu.pipeline_mode<synchronous>, transform_indices = @transform_2, window_bounds = array<i64: 1, 32>}, {transform_indices = @transform_3, window_bounds = array<i64: 16, 32>}, {transform_indices = @transform_4, window_bounds = array<i64: 16, 32>}]} {
    %c0 = arith.constant 0 : index
    %c0_0 = arith.constant 0 : index
    %0 = vector.load %arg1[%c0, %c0_0] : memref<16x16xf32, #tpu.memory_space<vmem>>, vector<16x16xf32>
    %c0_1 = arith.constant 0 : index
    %c0_2 = arith.constant 0 : index
    %1 = vector.load %arg2[%c0_1, %c0_2] : memref<16x32xf32, #tpu.memory_space<vmem>>, vector<16x32xf32>
    %cst = arith.constant dense<0.000000e+00> : vector<16x32xf32>
    %2 = tpu.matmul %0, %1, %cst {dimension_numbers = #tpu.dot_dimension_numbers<[1], [0], [0], [1], [0, 0, 1, 1], [], []>} : vector<16x16xf32>, vector<16x32xf32>, vector<16x32xf32> -> vector<16x32xf32>
    %c0_3 = arith.constant 0 : index
    %c0_4 = arith.constant 0 : index
    %3 = vector.load %arg3[%c0_3, %c0_4] : memref<1x32xf32, #tpu.memory_space<vmem>>, vector<1x32xf32>
    %4 = vector.broadcast %3 : vector<1x32xf32> to vector<16x32xf32>
    %5 = arith.addf %2, %4 : vector<16x32xf32>
    %c0_5 = arith.constant 0 : index
    %c0_6 = arith.constant 0 : index
    %6 = vector.load %arg4[%c0_5, %c0_6] : memref<16x32xf32, #tpu.memory_space<vmem>>, vector<16x32xf32>
    %7 = arith.addf %5, %6 : vector<16x32xf32>
    %c0_7 = arith.constant 0 : index
    %c0_8 = arith.constant 0 : index
    %8 = vector.load %arg5[%c0_7, %c0_8] : memref<16x32xf32, #tpu.memory_space<vmem>>, vector<16x32xf32>
    tpu.vector_store %arg5[%c0_7, %c0_8], %7 {strides = array<i32>} : memref<16x32xf32, #tpu.memory_space<vmem>>, vector<16x32xf32>,
    return
  }
  func.func @transform_0(%arg0: i32) -> (i32, i32) {
    %c0_i32 = arith.constant 0 : i32
    %c0_i32_0 = arith.constant 0 : i32
    return %arg0, %c0_i32 : i32, i32
  }
  func.func @transform_1(%arg0: i32) -> (i32, i32) {
    %c0_i32 = arith.constant 0 : i32
    %c0_i32_0 = arith.constant 0 : i32
    %c0_i32_1 = arith.constant 0 : i32
    return %c0_i32, %c0_i32_0 : i32, i32
  }
  func.func @transform_2(%arg0: i32) -> (i32, i32) {
    %c0_i32 = arith.constant 0 : i32
    %c0_i32_0 = arith.constant 0 : i32
    %c0_i32_1 = arith.constant 0 : i32
    return %c0_i32, %c0_i32_0 : i32, i32
  }
  func.func @transform_3(%arg0: i32) -> (i32, i32) {
    %c0_i32 = arith.constant 0 : i32
    %c0_i32_0 = arith.constant 0 : i32
    return %arg0, %c0_i32 : i32, i32
  }
  func.func @transform_4(%arg0: i32) -> (i32, i32) {
    %c0_i32 = arith.constant 0 : i32
    %c0_i32_0 = arith.constant 0 : i32
    return %arg0, %c0_i32 : i32, i32
  }
}

module attributes {stable_mosaic.version = 11 : i64} {
  func.func @_ln_up_split_kernel(%arg0: i32, %arg1: memref<16x32xf32, #tpu.memory_space<vmem>>, %arg2: memref<1x32xf32, #tpu.memory_space<vmem>>, %arg3: memref<1x32xf32, #tpu.memory_space<vmem>>, %arg4: memref<32x128xf32, #tpu.memory_space<vmem>>, %arg5: memref<1x128xf32, #tpu.memory_space<vmem>>, %arg6: memref<64x72xf32, #tpu.memory_space<vmem>>, %arg7: memref<1x72xf32, #tpu.memory_space<vmem>>, %arg8: memref<16x64xf32, #tpu.memory_space<vmem>>, %arg9: memref<16x64xf32, #tpu.memory_space<vmem>>, %arg10: memref<16x64xf32, #tpu.memory_space<vmem>>, %arg11: memref<16x8xf32, #tpu.memory_space<vmem>>) attributes {dimension_semantics = [#tpu.dimension_semantics<parallel>], iteration_bounds = array<i64: 1>, scalar_prefetch = 0 : i64, scratch_operands = 0 : i64, tpu.core_type = #tpu.core_type<tc>, window_params = [{transform_indices = @transform_0, window_bounds = array<i64: 16, 32>}, {pipeline_mode = #tpu.pipeline_mode<synchronous>, transform_indices = @transform_1, window_bounds = array<i64: 1, 32>}, {pipeline_mode = #tpu.pipeline_mode<synchronous>, transform_indices = @transform_2, window_bounds = array<i64: 1, 32>}, {pipeline_mode = #tpu.pipeline_mode<synchronous>, transform_indices = @transform_3, window_bounds = array<i64: 32, 128>}, {pipeline_mode = #tpu.pipeline_mode<synchronous>, transform_indices = @transform_4, window_bounds = array<i64: 1, 128>}, {pipeline_mode = #tpu.pipeline_mode<synchronous>, transform_indices = @transform_5, window_bounds = array<i64: 64, 72>}, {pipeline_mode = #tpu.pipeline_mode<synchronous>, transform_indices = @transform_6, window_bounds = array<i64: 1, 72>}, {transform_indices = @transform_7, window_bounds = array<i64: 16, 64>}, {transform_indices = @transform_8, window_bounds = array<i64: 16, 64>}, {transform_indices = @transform_9, window_bounds = array<i64: 16, 64>}, {transform_indices = @transform_10, window_bounds = array<i64: 16, 8>}]} {
    %c0 = arith.constant 0 : index
    %c0_0 = arith.constant 0 : index
    %0 = vector.load %arg1[%c0, %c0_0] : memref<16x32xf32, #tpu.memory_space<vmem>>, vector<16x32xf32>
    %cst = arith.constant dense<0.000000e+00> : vector<16xf32>
    %1 = vector.multi_reduction <add>, %0, %cst [1] : vector<16x32xf32> to vector<16xf32>
    %2 = vector.shape_cast %1 : vector<16xf32> to vector<16x1xf32>
    %cst_1 = arith.constant 3.200000e+01 : f32
    %3 = vector.broadcast %cst_1 : f32 to vector<16x1xf32>
    %4 = arith.divf %2, %3 : vector<16x1xf32>
    %5 = vector.broadcast %4 : vector<16x1xf32> to vector<16x32xf32>
    %6 = arith.subf %0, %5 : vector<16x32xf32>
    %7 = arith.mulf %6, %6 : vector<16x32xf32>
    %cst_2 = arith.constant dense<0.000000e+00> : vector<16xf32>
    %8 = vector.multi_reduction <add>, %7, %cst_2 [1] : vector<16x32xf32> to vector<16xf32>
    %9 = vector.shape_cast %8 : vector<16xf32> to vector<16x1xf32>
    %cst_3 = arith.constant 3.200000e+01 : f32
    %10 = vector.broadcast %cst_3 : f32 to vector<16x1xf32>
    %11 = arith.divf %9, %10 : vector<16x1xf32>
    %12 = vector.broadcast %4 : vector<16x1xf32> to vector<16x32xf32>
    %13 = arith.subf %0, %12 : vector<16x32xf32>
    %cst_4 = arith.constant 9.99999974E-6 : f32
    %14 = vector.broadcast %cst_4 : f32 to vector<16x1xf32>
    %15 = arith.addf %11, %14 : vector<16x1xf32>
    %16 = math.rsqrt %15 : vector<16x1xf32>
    %17 = vector.broadcast %16 : vector<16x1xf32> to vector<16x32xf32>
    %18 = arith.mulf %13, %17 : vector<16x32xf32>
    %c0_5 = arith.constant 0 : index
    %c0_6 = arith.constant 0 : index
    %19 = vector.load %arg2[%c0_5, %c0_6] : memref<1x32xf32, #tpu.memory_space<vmem>>, vector<1x32xf32>
    %20 = vector.broadcast %19 : vector<1x32xf32> to vector<16x32xf32>
    %21 = arith.mulf %18, %20 : vector<16x32xf32>
    %c0_7 = arith.constant 0 : index
    %c0_8 = arith.constant 0 : index
    %22 = vector.load %arg3[%c0_7, %c0_8] : memref<1x32xf32, #tpu.memory_space<vmem>>, vector<1x32xf32>
    %23 = vector.broadcast %22 : vector<1x32xf32> to vector<16x32xf32>
    %24 = arith.addf %21, %23 : vector<16x32xf32>
    %c0_9 = arith.constant 0 : index
    %c0_10 = arith.constant 0 : index
    %25 = vector.load %arg4[%c0_9, %c0_10] : memref<32x128xf32, #tpu.memory_space<vmem>>, vector<32x128xf32>
    %cst_11 = arith.constant dense<0.000000e+00> : vector<16x128xf32>
    %26 = tpu.matmul %24, %25, %cst_11 {dimension_numbers = #tpu.dot_dimension_numbers<[1], [0], [0], [1], [0, 0, 1, 1], [], []>} : vector<16x32xf32>, vector<32x128xf32>, vector<16x128xf32> -> vector<16x128xf32>
    %c0_12 = arith.constant 0 : index
    %c0_13 = arith.constant 0 : index
    %27 = vector.load %arg5[%c0_12, %c0_13] : memref<1x128xf32, #tpu.memory_space<vmem>>, vector<1x128xf32>
    %28 = vector.broadcast %27 : vector<1x128xf32> to vector<16x128xf32>
    %29 = arith.addf %26, %28 : vector<16x128xf32>
    %30 = vector.extract_strided_slice %29 {offsets = [0, 0], sizes = [16, 64], strides = [1, 1]} : vector<16x128xf32> to vector<16x64xf32>
    %c0_14 = arith.constant 0 : index
    %c0_15 = arith.constant 0 : index
    %31 = vector.load %arg8[%c0_14, %c0_15] : memref<16x64xf32, #tpu.memory_space<vmem>>, vector<16x64xf32>
    tpu.vector_store %arg8[%c0_14, %c0_15], %30 {strides = array<i32>} : memref<16x64xf32, #tpu.memory_space<vmem>>, vector<16x64xf32>,
    %32 = vector.extract_strided_slice %29 {offsets = [0, 64], sizes = [16, 64], strides = [1, 1]} : vector<16x128xf32> to vector<16x64xf32>
    %c0_16 = arith.constant 0 : index
    %c0_17 = arith.constant 0 : index
    %33 = vector.load %arg9[%c0_16, %c0_17] : memref<16x64xf32, #tpu.memory_space<vmem>>, vector<16x64xf32>
    tpu.vector_store %arg9[%c0_16, %c0_17], %32 {strides = array<i32>} : memref<16x64xf32, #tpu.memory_space<vmem>>, vector<16x64xf32>,
    %c0_18 = arith.constant 0 : index
    %c0_19 = arith.constant 0 : index
    %34 = vector.load %arg6[%c0_18, %c0_19] : memref<64x72xf32, #tpu.memory_space<vmem>>, vector<64x72xf32>
    %cst_20 = arith.constant dense<0.000000e+00> : vector<16x72xf32>
    %35 = tpu.matmul %30, %34, %cst_20 {dimension_numbers = #tpu.dot_dimension_numbers<[1], [0], [0], [1], [0, 0, 1, 1], [], []>} : vector<16x64xf32>, vector<64x72xf32>, vector<16x72xf32> -> vector<16x72xf32>
    %c0_21 = arith.constant 0 : index
    %c0_22 = arith.constant 0 : index
    %36 = vector.load %arg7[%c0_21, %c0_22] : memref<1x72xf32, #tpu.memory_space<vmem>>, vector<1x72xf32>
    %37 = vector.broadcast %36 : vector<1x72xf32> to vector<16x72xf32>
    %38 = arith.addf %35, %37 : vector<16x72xf32>
    %39 = vector.extract_strided_slice %38 {offsets = [0, 0], sizes = [16, 64], strides = [1, 1]} : vector<16x72xf32> to vector<16x64xf32>
    %c0_23 = arith.constant 0 : index
    %c0_24 = arith.constant 0 : index
    %40 = vector.load %arg10[%c0_23, %c0_24] : memref<16x64xf32, #tpu.memory_space<vmem>>, vector<16x64xf32>
    tpu.vector_store %arg10[%c0_23, %c0_24], %39 {strides = array<i32>} : memref<16x64xf32, #tpu.memory_space<vmem>>, vector<16x64xf32>,
    %41 = vector.extract_strided_slice %38 {offsets = [0, 64], sizes = [16, 8], strides = [1, 1]} : vector<16x72xf32> to vector<16x8xf32>
    %c0_25 = arith.constant 0 : index
    %c0_26 = arith.constant 0 : index
    %42 = vector.load %arg11[%c0_25, %c0_26] : memref<16x8xf32, #tpu.memory_space<vmem>>, vector<16x8xf32>
    tpu.vector_store %arg11[%c0_25, %c0_26], %41 {strides = array<i32>} : memref<16x8xf32, #tpu.memory_space<vmem>>, vector<16x8xf32>,
    return
  }
  func.func @transform_0(%arg0: i32) -> (i32, i32) {
    %c0_i32 = arith.constant 0 : i32
    %c0_i32_0 = arith.constant 0 : i32
    return %arg0, %c0_i32 : i32, i32
  }
  func.func @transform_1(%arg0: i32) -> (i32, i32) {
    %c0_i32 = arith.constant 0 : i32
    %c0_i32_0 = arith.constant 0 : i32
    %c0_i32_1 = arith.constant 0 : i32
    return %c0_i32, %c0_i32_0 : i32, i32
  }
  func.func @transform_2(%arg0: i32) -> (i32, i32) {
    %c0_i32 = arith.constant 0 : i32
    %c0_i32_0 = arith.constant 0 : i32
    %c0_i32_1 = arith.constant 0 : i32
    return %c0_i32, %c0_i32_0 : i32, i32
  }
  func.func @transform_3(%arg0: i32) -> (i32, i32) {
    %c0_i32 = arith.constant 0 : i32
    %c0_i32_0 = arith.constant 0 : i32
    %c0_i32_1 = arith.constant 0 : i32
    return %c0_i32, %c0_i32_0 : i32, i32
  }
  func.func @transform_4(%arg0: i32) -> (i32, i32) {
    %c0_i32 = arith.constant 0 : i32
    %c0_i32_0 = arith.constant 0 : i32
    %c0_i32_1 = arith.constant 0 : i32
    return %c0_i32, %c0_i32_0 : i32, i32
  }
  func.func @transform_5(%arg0: i32) -> (i32, i32) {
    %c0_i32 = arith.constant 0 : i32
    %c0_i32_0 = arith.constant 0 : i32
    %c0_i32_1 = arith.constant 0 : i32
    return %c0_i32, %c0_i32_0 : i32, i32
  }
  func.func @transform_6(%arg0: i32) -> (i32, i32) {
    %c0_i32 = arith.constant 0 : i32
    %c0_i32_0 = arith.constant 0 : i32
    %c0_i32_1 = arith.constant 0 : i32
    return %c0_i32, %c0_i32_0 : i32, i32
  }
  func.func @transform_7(%arg0: i32) -> (i32, i32) {
    %c0_i32 = arith.constant 0 : i32
    %c0_i32_0 = arith.constant 0 : i32
    return %arg0, %c0_i32 : i32, i32
  }
  func.func @transform_8(%arg0: i32) -> (i32, i32) {
    %c0_i32 = arith.constant 0 : i32
    %c0_i32_0 = arith.constant 0 : i32
    return %arg0, %c0_i32 : i32, i32
  }
  func.func @transform_9(%arg0: i32) -> (i32, i32) {
    %c0_i32 = arith.constant 0 : i32
    %c0_i32_0 = arith.constant 0 : i32
    return %arg0, %c0_i32 : i32, i32
  }
  func.func @transform_10(%arg0: i32) -> (i32, i32) {
    %c0_i32 = arith.constant 0 : i32
    %c0_i32_0 = arith.constant 0 : i32
    return %arg0, %c0_i32 : i32, i32
  }
}

module attributes {stable_mosaic.version = 11 : i64} {
  func.func @_mlstm_block_core_kernel(%arg0: i32, %arg1: memref<1x8x64xf32, #tpu.memory_space<vmem>>, %arg2: memref<1x8x64xf32, #tpu.memory_space<vmem>>, %arg3: memref<1x8x64xf32, #tpu.memory_space<vmem>>, %arg4: memref<1x8x8xf32, #tpu.memory_space<vmem>>, %arg5: memref<1x8x32xf32, #tpu.memory_space<vmem>>, %arg6: memref<4x64xf32, #tpu.memory_space<vmem>>, %arg7: memref<1x64xf32, #tpu.memory_space<vmem>>, %arg8: memref<64x136xf32, #tpu.memory_space<vmem>>, %arg9: memref<1x136xf32, #tpu.memory_space<vmem>>, %arg10: memref<1x64xf32, #tpu.memory_space<vmem>>, %arg11: memref<1x64xf32, #tpu.memory_space<vmem>>, %arg12: memref<64x32xf32, #tpu.memory_space<vmem>>, %arg13: memref<1x32xf32, #tpu.memory_space<vmem>>, %arg14: memref<1x8x32xf32, #tpu.memory_space<vmem>>, %arg15: memref<8x64xf32, #tpu.memory_space<vmem>>, %arg16: memref<8x136xf32, #tpu.memory_space<vmem>>, %arg17: memref<1x8x8xf32, #tpu.memory_space<vmem>>, %arg18: memref<8x64xf32, #tpu.memory_space<vmem>>) attributes {dimension_semantics = [#tpu.dimension_semantics<parallel>], iteration_bounds = array<i64: 2>, scalar_prefetch = 0 : i64, scratch_operands = 4 : i64, tpu.core_type = #tpu.core_type<tc>, window_params = [{transform_indices = @transform_0, window_bounds = array<i64: 1, 8, 64>}, {transform_indices = @transform_1, window_bounds = array<i64: 1, 8, 64>}, {transform_indices = @transform_2, window_bounds = array<i64: 1, 8, 64>}, {transform_indices = @transform_3, window_bounds = array<i64: 1, 8, 8>}, {transform_indices = @transform_4, window_bounds = array<i64: 1, 8, 32>}, {pipeline_mode = #tpu.pipeline_mode<synchronous>, transform_indices = @transform_5, window_bounds = array<i64: 4, 64>}, {pipeline_mode = #tpu.pipeline_mode<synchronous>, transform_indices = @transform_6, window_bounds = array<i64: 1, 64>}, {pipeline_mode = #tpu.pipeline_mode<synchronous>, transform_indices = @transform_7, window_bounds = array<i64: 64, 136>}, {pipeline_mode = #tpu.pipeline_mode<synchronous>, transform_indices = @transform_8, window_bounds = array<i64: 1, 136>}, {pipeline_mode = #tpu.pipeline_mode<synchronous>, transform_indices = @transform_9, window_bounds = array<i64: 1, 64>}, {pipeline_mode = #tpu.pipeline_mode<synchronous>, transform_indices = @transform_10, window_bounds = array<i64: 1, 64>}, {pipeline_mode = #tpu.pipeline_mode<synchronous>, transform_indices = @transform_11, window_bounds = array<i64: 64, 32>}, {pipeline_mode = #tpu.pipeline_mode<synchronous>, transform_indices = @transform_12, window_bounds = array<i64: 1, 32>}, {transform_indices = @transform_13, window_bounds = array<i64: 1, 8, 32>}]} {
    %0 = tpu.iota {dimensions = array<i32: 0>} : vector<8x1xi32>
    %c0 = arith.constant 0 : index
    %c0_0 = arith.constant 0 : index
    %c0_1 = arith.constant 0 : index
    %1 = vector.load %arg1[%c0, %c0_0, %c0_1] : memref<1x8x64xf32, #tpu.memory_space<vmem>>, vector<1x8x64xf32>
    %2 = vector.shape_cast %1 : vector<1x8x64xf32> to vector<8x64xf32>
    %c0_2 = arith.constant 0 : index
    %c0_3 = arith.constant 0 : index
    %3 = vector.load %arg6[%c0_2, %c0_3] : memref<4x64xf32, #tpu.memory_space<vmem>>, vector<4x64xf32>
    %4 = vector.extract_strided_slice %3 {offsets = [3, 0], sizes = [1, 64], strides = [1, 1]} : vector<4x64xf32> to vector<1x64xf32>
    %5 = vector.broadcast %4 : vector<1x64xf32> to vector<8x64xf32>
    %6 = arith.mulf %2, %5 : vector<8x64xf32>
    %c3_i32 = arith.constant 3 : i32
    %7 = tpu.dynamic_rotate %2 by %c3_i32 dim 0 : vector<8x64xf32>, i32 -> vector<8x64xf32>
    %c3_i32_4 = arith.constant 3 : i32
    %8 = vector.broadcast %c3_i32_4 : i32 to vector<8x1xi32>
    %9 = arith.cmpi sge, %0, %8 : vector<8x1xi32>
    %cst = arith.constant 0.000000e+00 : f32
    %10 = vector.shape_cast %9 : vector<8x1xi1> to vector<8x1xi1>
    %11 = vector.broadcast %10 : vector<8x1xi1> to vector<8x64xi1>
    %12 = vector.broadcast %cst : f32 to vector<8x64xf32>
    %13 = arith.select %11, %7, %12 : vector<8x64xi1>, vector<8x64xf32>
    %14 = vector.extract_strided_slice %3 {offsets = [0, 0], sizes = [1, 64], strides = [1, 1]} : vector<4x64xf32> to vector<1x64xf32>
    %15 = vector.broadcast %14 : vector<1x64xf32> to vector<8x64xf32>
    %16 = arith.mulf %13, %15 : vector<8x64xf32>
    %17 = arith.addf %6, %16 : vector<8x64xf32>
    %c2_i32 = arith.constant 2 : i32
    %18 = tpu.dynamic_rotate %2 by %c2_i32 dim 0 : vector<8x64xf32>, i32 -> vector<8x64xf32>
    %c2_i32_5 = arith.constant 2 : i32
    %19 = vector.broadcast %c2_i32_5 : i32 to vector<8x1xi32>
    %20 = arith.cmpi sge, %0, %19 : vector<8x1xi32>
    %cst_6 = arith.constant 0.000000e+00 : f32
    %21 = vector.shape_cast %20 : vector<8x1xi1> to vector<8x1xi1>
    %22 = vector.broadcast %21 : vector<8x1xi1> to vector<8x64xi1>
    %23 = vector.broadcast %cst_6 : f32 to vector<8x64xf32>
    %24 = arith.select %22, %18, %23 : vector<8x64xi1>, vector<8x64xf32>
    %25 = vector.extract_strided_slice %3 {offsets = [1, 0], sizes = [1, 64], strides = [1, 1]} : vector<4x64xf32> to vector<1x64xf32>
    %26 = vector.broadcast %25 : vector<1x64xf32> to vector<8x64xf32>
    %27 = arith.mulf %24, %26 : vector<8x64xf32>
    %28 = arith.addf %17, %27 : vector<8x64xf32>
    %c1_i32 = arith.constant 1 : i32
    %29 = tpu.dynamic_rotate %2 by %c1_i32 dim 0 : vector<8x64xf32>, i32 -> vector<8x64xf32>
    %c1_i32_7 = arith.constant 1 : i32
    %30 = vector.broadcast %c1_i32_7 : i32 to vector<8x1xi32>
    %31 = arith.cmpi sge, %0, %30 : vector<8x1xi32>
    %cst_8 = arith.constant 0.000000e+00 : f32
    %32 = vector.shape_cast %31 : vector<8x1xi1> to vector<8x1xi1>
    %33 = vector.broadcast %32 : vector<8x1xi1> to vector<8x64xi1>
    %34 = vector.broadcast %cst_8 : f32 to vector<8x64xf32>
    %35 = arith.select %33, %29, %34 : vector<8x64xi1>, vector<8x64xf32>
    %36 = vector.extract_strided_slice %3 {offsets = [2, 0], sizes = [1, 64], strides = [1, 1]} : vector<4x64xf32> to vector<1x64xf32>
    %37 = vector.broadcast %36 : vector<1x64xf32> to vector<8x64xf32>
    %38 = arith.mulf %35, %37 : vector<8x64xf32>
    %39 = arith.addf %28, %38 : vector<8x64xf32>
    %c0_9 = arith.constant 0 : index
    %c0_10 = arith.constant 0 : index
    %40 = vector.load %arg7[%c0_9, %c0_10] : memref<1x64xf32, #tpu.memory_space<vmem>>, vector<1x64xf32>
    %41 = vector.broadcast %40 : vector<1x64xf32> to vector<8x64xf32>
    %42 = arith.addf %39, %41 : vector<8x64xf32>
    %43 = arith.negf %42 : vector<8x64xf32>
    %44 = math.exp %43 : vector<8x64xf32>
    %cst_11 = arith.constant 1.000000e+00 : f32
    %45 = vector.broadcast %cst_11 : f32 to vector<8x64xf32>
    %46 = arith.addf %45, %44 : vector<8x64xf32>
    %47 = arith.divf %45, %46 : vector<8x64xf32>
    %48 = arith.mulf %42, %47 : vector<8x64xf32>
    %c0_12 = arith.constant 0 : index
    %c0_13 = arith.constant 0 : index
    %49 = vector.load %arg15[%c0_12, %c0_13] : memref<8x64xf32, #tpu.memory_space<vmem>>, vector<8x64xf32>
    tpu.vector_store %arg15[%c0_12, %c0_13], %48 {strides = array<i32>} : memref<8x64xf32, #tpu.memory_space<vmem>>, vector<8x64xf32>,
    %c0_14 = arith.constant 0 : index
    %c0_15 = arith.constant 0 : index
    %50 = vector.load %arg8[%c0_14, %c0_15] : memref<64x136xf32, #tpu.memory_space<vmem>>, vector<64x136xf32>
    %cst_16 = arith.constant dense<0.000000e+00> : vector<8x136xf32>
    %51 = tpu.matmul %48, %50, %cst_16 {dimension_numbers = #tpu.dot_dimension_numbers<[1], [0], [0], [1], [0, 0, 1, 1], [], []>} : vector<8x64xf32>, vector<64x136xf32>, vector<8x136xf32> -> vector<8x136xf32>
    %c0_17 = arith.constant 0 : index
    %c0_18 = arith.constant 0 : index
    %52 = vector.load %arg9[%c0_17, %c0_18] : memref<1x136xf32, #tpu.memory_space<vmem>>, vector<1x136xf32>
    %53 = vector.broadcast %52 : vector<1x136xf32> to vector<8x136xf32>
    %54 = arith.addf %51, %53 : vector<8x136xf32>
    %c0_19 = arith.constant 0 : index
    %c0_20 = arith.constant 0 : index
    %55 = vector.load %arg16[%c0_19, %c0_20] : memref<8x136xf32, #tpu.memory_space<vmem>>, vector<8x136xf32>
    tpu.vector_store %arg16[%c0_19, %c0_20], %54 {strides = array<i32>} : memref<8x136xf32, #tpu.memory_space<vmem>>, vector<8x136xf32>,
    %56 = vector.extract_strided_slice %54 {offsets = [0, 128], sizes = [8, 8], strides = [1, 1]} : vector<8x136xf32> to vector<8x8xf32>
    %c0_21 = arith.constant 0 : index
    %c0_22 = arith.constant 0 : index
    %c0_23 = arith.constant 0 : index
    %57 = vector.load %arg4[%c0_21, %c0_22, %c0_23] : memref<1x8x8xf32, #tpu.memory_space<vmem>>, vector<1x8x8xf32>
    %58 = vector.shape_cast %57 : vector<1x8x8xf32> to vector<8x8xf32>
    %59 = arith.addf %56, %58 : vector<8x8xf32>
    %60 = vector.extract_strided_slice %59 {offsets = [0, 0], sizes = [8, 4], strides = [1, 1]} : vector<8x8xf32> to vector<8x4xf32>
    %61 = vector.extract_strided_slice %59 {offsets = [0, 4], sizes = [8, 4], strides = [1, 1]} : vector<8x8xf32> to vector<8x4xf32>
    %cst_24 = arith.constant 0.000000e+00 : f32
    %62 = vector.broadcast %cst_24 : f32 to vector<8x4xf32>
    %63 = arith.minimumf %61, %62 : vector<8x4xf32>
    %64 = math.absf %61 : vector<8x4xf32>
    %cst_25 = arith.constant 0.000000e+00 : f32
    %65 = vector.broadcast %cst_25 : f32 to vector<8x4xf32>
    %66 = arith.subf %65, %64 : vector<8x4xf32>
    %67 = math.exp %66 : vector<8x4xf32>
    %cst_26 = arith.constant 1.000000e+00 : f32
    %68 = vector.broadcast %cst_26 : f32 to vector<8x4xf32>
    %69 = arith.addf %68, %67 : vector<8x4xf32>
    %70 = math.log %69 : vector<8x4xf32>
    %71 = arith.subf %63, %70 : vector<8x4xf32>
    %72 = tpu.iota {dimensions = array<i32: 0>} : vector<8x4xi32>
    %c1_i32_27 = arith.constant 1 : i32
    %73 = vector.broadcast %c1_i32_27 : i32 to vector<8x4xi32>
    %74 = arith.cmpi sge, %72, %73 : vector<8x4xi32>
    %c1_i32_28 = arith.constant 1 : i32
    %75 = tpu.dynamic_rotate %71 by %c1_i32_28 dim 0 : vector<8x4xf32>, i32 -> vector<8x4xf32>
    %cst_29 = arith.constant 0.000000e+00 : f32
    %76 = vector.broadcast %cst_29 : f32 to vector<8x4xf32>
    %77 = arith.select %74, %75, %76 : vector<8x4xi1>, vector<8x4xf32>
    %78 = arith.addf %71, %77 : vector<8x4xf32>
    %c2_i32_30 = arith.constant 2 : i32
    %79 = vector.broadcast %c2_i32_30 : i32 to vector<8x4xi32>
    %80 = arith.cmpi sge, %72, %79 : vector<8x4xi32>
    %c2_i32_31 = arith.constant 2 : i32
    %81 = tpu.dynamic_rotate %78 by %c2_i32_31 dim 0 : vector<8x4xf32>, i32 -> vector<8x4xf32>
    %cst_32 = arith.constant 0.000000e+00 : f32
    %82 = vector.broadcast %cst_32 : f32 to vector<8x4xf32>
    %83 = arith.select %80, %81, %82 : vector<8x4xi1>, vector<8x4xf32>
    %84 = arith.addf %78, %83 : vector<8x4xf32>
    %c4_i32 = arith.constant 4 : i32
    %85 = vector.broadcast %c4_i32 : i32 to vector<8x4xi32>
    %86 = arith.cmpi sge, %72, %85 : vector<8x4xi32>
    %c4_i32_33 = arith.constant 4 : i32
    %87 = tpu.dynamic_rotate %84 by %c4_i32_33 dim 0 : vector<8x4xf32>, i32 -> vector<8x4xf32>
    %cst_34 = arith.constant 0.000000e+00 : f32
    %88 = vector.broadcast %cst_34 : f32 to vector<8x4xf32>
    %89 = arith.select %86, %87, %88 : vector<8x4xi1>, vector<8x4xf32>
    %90 = arith.addf %84, %89 : vector<8x4xf32>
    %91 = tpu.transpose %90, [1, 0] : vector<8x4xf32> -> vector<4x8xf32>
    %92 = tpu.transpose %60, [1, 0] : vector<8x4xf32> -> vector<4x8xf32>
    %c0_35 = arith.constant 0 : index
    %c0_36 = arith.constant 0 : index
    %c0_37 = arith.constant 0 : index
    %93 = vector.load %arg17[%c0_35, %c0_36, %c0_37] : memref<1x8x8xf32, #tpu.memory_space<vmem>>, vector<1x4x8xf32>
    %94 = vector.shape_cast %93 : vector<1x4x8xf32> to vector<4x8xf32>
    %95 = vector.shape_cast %91 : vector<4x8xf32> to vector<1x4x8xf32>
    tpu.vector_store %arg17[%c0_35, %c0_36, %c0_37], %95 {strides = array<i32>} : memref<1x8x8xf32, #tpu.memory_space<vmem>>, vector<1x4x8xf32>,
    %c0_38 = arith.constant 0 : index
    %c4 = arith.constant 4 : index
    %c0_39 = arith.constant 0 : index
    %96 = vector.load %arg17[%c0_38, %c4, %c0_39] : memref<1x8x8xf32, #tpu.memory_space<vmem>>, vector<1x4x8xf32>
    %97 = vector.shape_cast %96 : vector<1x4x8xf32> to vector<4x8xf32>
    %98 = vector.shape_cast %92 : vector<4x8xf32> to vector<1x4x8xf32>
    tpu.vector_store %arg17[%c0_38, %c4, %c0_39], %98 {strides = array<i32>} : memref<1x8x8xf32, #tpu.memory_space<vmem>>, vector<1x4x8xf32>,
    %c0_40 = arith.constant 0 : index
    %c0_41 = arith.constant 0 : index
    %99 = vector.load %arg16[%c0_40, %c0_41] : memref<8x136xf32, #tpu.memory_space<vmem>>, vector<8x16xf32>
    %cst_42 = arith.constant 2.500000e-01 : f32
    %100 = vector.broadcast %cst_42 : f32 to vector<8x16xf32>
    %101 = arith.mulf %99, %100 : vector<8x16xf32>
    %102 = arith.truncf %101 : vector<8x16xf32> to vector<8x16xbf16>
    %103 = vector.extract_strided_slice %90 {offsets = [0, 0], sizes = [8, 1], strides = [1, 1]} : vector<8x4xf32> to vector<8x1xf32>
    %cst_43 = arith.constant -1.000000e+30 : f32
    %104 = vector.broadcast %cst_43 : f32 to vector<8x1xf32>
    %cst_44 = arith.constant 0.000000e+00 : f32
    %105 = vector.broadcast %cst_44 : f32 to vector<8x1xf32>
    %cst_45 = arith.constant 0.000000e+00 : f32
    %106 = vector.broadcast %cst_45 : f32 to vector<8x16xf32>
    %c0_i32 = arith.constant 0 : i32
    %c8_i32 = arith.constant 8 : i32
    %107 = arith.muli %c0_i32, %c8_i32 : i32
    %108 = tpu.assume_multiple %107, 8 : i32
    %109 = arith.index_cast %108 : i32 to index
    %c64 = arith.constant 64 : index
    %110 = vector.load %arg16[%109, %c64] : memref<8x136xf32, #tpu.memory_space<vmem>>, vector<8x16xf32>
    %111 = arith.truncf %110 : vector<8x16xf32> to vector<8x16xbf16>
    %c0_46 = arith.constant 0 : index
    %112 = arith.index_cast %108 : i32 to index
    %c0_47 = arith.constant 0 : index
    %113 = vector.load %arg3[%c0_46, %112, %c0_47] : memref<1x8x64xf32, #tpu.memory_space<vmem>>, vector<1x8x16xf32>
    %114 = vector.shape_cast %113 : vector<1x8x16xf32> to vector<8x16xf32>
    %115 = arith.truncf %114 : vector<8x16xf32> to vector<8x16xbf16>
    %116 = arith.index_cast %c0_i32 : i32 to index
    %c0_48 = arith.constant 0 : index
    %c0_49 = arith.constant 0 : index
    %117 = vector.load %arg17[%116, %c0_48, %c0_49] : memref<1x8x8xf32, #tpu.memory_space<vmem>>, vector<1x1x8xf32>
    %118 = vector.shape_cast %117 : vector<1x1x8xf32> to vector<1x8xf32>
    %119 = arith.index_cast %c0_i32 : i32 to index
    %c4_50 = arith.constant 4 : index
    %c0_51 = arith.constant 0 : index
    %120 = vector.load %arg17[%119, %c4_50, %c0_51] : memref<1x8x8xf32, #tpu.memory_space<vmem>>, vector<1x1x8xf32>
    %121 = vector.shape_cast %120 : vector<1x1x8xf32> to vector<1x8xf32>
    %cst_52 = arith.constant dense<0.000000e+00> : vector<8x8xf32>
    %122 = tpu.matmul %102, %111, %cst_52 {dimension_numbers = #tpu.dot_dimension_numbers<[1], [1], [0], [0], [0, 0, 1, 0], [], []>} : vector<8x16xbf16>, vector<8x16xbf16>, vector<8x8xf32> -> vector<8x8xf32>
    %123 = tpu.iota {dimensions = array<i32: 1>} : vector<1x8xi32>
    %124 = vector.broadcast %108 : i32 to vector<1x8xi32>
    %125 = arith.addi %124, %123 : vector<1x8xi32>
    %126 = vector.broadcast %0 : vector<8x1xi32> to vector<8x8xi32>
    %127 = vector.broadcast %125 : vector<1x8xi32> to vector<8x8xi32>
    %128 = arith.cmpi sge, %126, %127 : vector<8x8xi32>
    %129 = vector.broadcast %103 : vector<8x1xf32> to vector<8x8xf32>
    %130 = vector.broadcast %118 : vector<1x8xf32> to vector<8x8xf32>
    %131 = arith.subf %129, %130 : vector<8x8xf32>
    %132 = vector.broadcast %121 : vector<1x8xf32> to vector<8x8xf32>
    %133 = arith.addf %131, %132 : vector<8x8xf32>
    %cst_53 = arith.constant -1.000000e+30 : f32
    %134 = vector.broadcast %cst_53 : f32 to vector<8x8xf32>
    %135 = arith.select %128, %133, %134 : vector<8x8xi1>, vector<8x8xf32>
    %cst_54 = arith.constant dense<0xFF800000> : vector<8xf32>
    %136 = vector.multi_reduction <maximumf>, %135, %cst_54 [1] : vector<8x8xf32> to vector<8xf32>
    %137 = vector.shape_cast %136 : vector<8xf32> to vector<8x1xf32>
    %138 = arith.maximumf %104, %137 : vector<8x1xf32>
    %139 = arith.subf %104, %138 : vector<8x1xf32>
    %140 = math.exp %139 : vector<8x1xf32>
    %141 = vector.broadcast %138 : vector<8x1xf32> to vector<8x8xf32>
    %142 = arith.subf %135, %141 : vector<8x8xf32>
    %143 = math.exp %142 : vector<8x8xf32>
    %144 = arith.mulf %122, %143 : vector<8x8xf32>
    %145 = arith.mulf %140, %105 : vector<8x1xf32>
    %cst_55 = arith.constant dense<0.000000e+00> : vector<8xf32>
    %146 = vector.multi_reduction <add>, %144, %cst_55 [1] : vector<8x8xf32> to vector<8xf32>
    %147 = vector.shape_cast %146 : vector<8xf32> to vector<8x1xf32>
    %148 = arith.addf %145, %147 : vector<8x1xf32>
    %149 = vector.broadcast %140 : vector<8x1xf32> to vector<8x16xf32>
    %150 = arith.mulf %149, %106 : vector<8x16xf32>
    %151 = arith.truncf %144 : vector<8x8xf32> to vector<8x8xbf16>
    %cst_56 = arith.constant dense<0.000000e+00> : vector<8x16xf32>
    %152 = tpu.matmul %151, %115, %cst_56 {dimension_numbers = #tpu.dot_dimension_numbers<[1], [0], [0], [1], [0, 0, 1, 1], [], []>} : vector<8x8xbf16>, vector<8x16xbf16>, vector<8x16xf32> -> vector<8x16xf32>
    %153 = arith.addf %150, %152 : vector<8x16xf32>
    %c1_i32_57 = arith.constant 1 : i32
    %154 = math.absf %148 : vector<8x1xf32>
    %cst_58 = arith.constant 0.000000e+00 : f32
    %155 = vector.broadcast %cst_58 : f32 to vector<8x1xf32>
    %156 = arith.subf %155, %138 : vector<8x1xf32>
    %157 = math.exp %156 : vector<8x1xf32>
    %158 = arith.maximumf %154, %157 : vector<8x1xf32>
    %cst_59 = arith.constant 9.99999997E-7 : f32
    %159 = vector.broadcast %cst_59 : f32 to vector<8x1xf32>
    %160 = arith.addf %158, %159 : vector<8x1xf32>
    %cst_60 = arith.constant 1.000000e+00 : f32
    %161 = vector.broadcast %cst_60 : f32 to vector<8x1xf32>
    %162 = arith.divf %161, %160 : vector<8x1xf32>
    %163 = vector.broadcast %162 : vector<8x1xf32> to vector<8x16xf32>
    %164 = arith.mulf %153, %163 : vector<8x16xf32>
    %cst_61 = arith.constant dense<0.000000e+00> : vector<8xf32>
    %165 = vector.multi_reduction <add>, %164, %cst_61 [1] : vector<8x16xf32> to vector<8xf32>
    %166 = vector.shape_cast %165 : vector<8xf32> to vector<8x1xf32>
    %cst_62 = arith.constant 1.600000e+01 : f32
    %167 = vector.broadcast %cst_62 : f32 to vector<8x1xf32>
    %168 = arith.divf %166, %167 : vector<8x1xf32>
    %169 = vector.broadcast %168 : vector<8x1xf32> to vector<8x16xf32>
    %170 = arith.subf %164, %169 : vector<8x16xf32>
    %171 = arith.mulf %170, %170 : vector<8x16xf32>
    %cst_63 = arith.constant dense<0.000000e+00> : vector<8xf32>
    %172 = vector.multi_reduction <add>, %171, %cst_63 [1] : vector<8x16xf32> to vector<8xf32>
    %173 = vector.shape_cast %172 : vector<8xf32> to vector<8x1xf32>
    %cst_64 = arith.constant 1.600000e+01 : f32
    %174 = vector.broadcast %cst_64 : f32 to vector<8x1xf32>
    %175 = arith.divf %173, %174 : vector<8x1xf32>
    %176 = vector.broadcast %168 : vector<8x1xf32> to vector<8x16xf32>
    %177 = arith.subf %164, %176 : vector<8x16xf32>
    %cst_65 = arith.constant 9.99999974E-6 : f32
    %178 = vector.broadcast %cst_65 : f32 to vector<8x1xf32>
    %179 = arith.addf %175, %178 : vector<8x1xf32>
    %180 = math.rsqrt %179 : vector<8x1xf32>
    %181 = vector.broadcast %180 : vector<8x1xf32> to vector<8x16xf32>
    %182 = arith.mulf %177, %181 : vector<8x16xf32>
    %c0_66 = arith.constant 0 : index
    %c0_67 = arith.constant 0 : index
    %183 = vector.load %arg18[%c0_66, %c0_67] : memref<8x64xf32, #tpu.memory_space<vmem>>, vector<8x16xf32>
    tpu.vector_store %arg18[%c0_66, %c0_67], %182 {strides = array<i32>} : memref<8x64xf32, #tpu.memory_space<vmem>>, vector<8x16xf32>,
    %c0_68 = arith.constant 0 : index
    %c16 = arith.constant 16 : index
    %184 = vector.load %arg16[%c0_68, %c16] : memref<8x136xf32, #tpu.memory_space<vmem>>, vector<8x16xf32>
    %cst_69 = arith.constant 2.500000e-01 : f32
    %185 = vector.broadcast %cst_69 : f32 to vector<8x16xf32>
    %186 = arith.mulf %184, %185 : vector<8x16xf32>
    %187 = arith.truncf %186 : vector<8x16xf32> to vector<8x16xbf16>
    %188 = vector.extract_strided_slice %90 {offsets = [0, 1], sizes = [8, 1], strides = [1, 1]} : vector<8x4xf32> to vector<8x1xf32>
    %cst_70 = arith.constant -1.000000e+30 : f32
    %189 = vector.broadcast %cst_70 : f32 to vector<8x1xf32>
    %cst_71 = arith.constant 0.000000e+00 : f32
    %190 = vector.broadcast %cst_71 : f32 to vector<8x1xf32>
    %cst_72 = arith.constant 0.000000e+00 : f32
    %191 = vector.broadcast %cst_72 : f32 to vector<8x16xf32>
    %c0_i32_73 = arith.constant 0 : i32
    %c8_i32_74 = arith.constant 8 : i32
    %192 = arith.muli %c0_i32_73, %c8_i32_74 : i32
    %193 = tpu.assume_multiple %192, 8 : i32
    %194 = arith.index_cast %193 : i32 to index
    %c80 = arith.constant 80 : index
    %195 = vector.load %arg16[%194, %c80] : memref<8x136xf32, #tpu.memory_space<vmem>>, vector<8x16xf32>
    %196 = arith.truncf %195 : vector<8x16xf32> to vector<8x16xbf16>
    %c0_75 = arith.constant 0 : index
    %197 = arith.index_cast %193 : i32 to index
    %c16_76 = arith.constant 16 : index
    %198 = vector.load %arg3[%c0_75, %197, %c16_76] : memref<1x8x64xf32, #tpu.memory_space<vmem>>, vector<1x8x16xf32>
    %199 = vector.shape_cast %198 : vector<1x8x16xf32> to vector<8x16xf32>
    %200 = arith.truncf %199 : vector<8x16xf32> to vector<8x16xbf16>
    %201 = arith.index_cast %c0_i32_73 : i32 to index
    %c1 = arith.constant 1 : index
    %c0_77 = arith.constant 0 : index
    %202 = vector.load %arg17[%201, %c1, %c0_77] : memref<1x8x8xf32, #tpu.memory_space<vmem>>, vector<1x1x8xf32>
    %203 = vector.shape_cast %202 : vector<1x1x8xf32> to vector<1x8xf32>
    %204 = arith.index_cast %c0_i32_73 : i32 to index
    %c5 = arith.constant 5 : index
    %c0_78 = arith.constant 0 : index
    %205 = vector.load %arg17[%204, %c5, %c0_78] : memref<1x8x8xf32, #tpu.memory_space<vmem>>, vector<1x1x8xf32>
    %206 = vector.shape_cast %205 : vector<1x1x8xf32> to vector<1x8xf32>
    %cst_79 = arith.constant dense<0.000000e+00> : vector<8x8xf32>
    %207 = tpu.matmul %187, %196, %cst_79 {dimension_numbers = #tpu.dot_dimension_numbers<[1], [1], [0], [0], [0, 0, 1, 0], [], []>} : vector<8x16xbf16>, vector<8x16xbf16>, vector<8x8xf32> -> vector<8x8xf32>
    %208 = tpu.iota {dimensions = array<i32: 1>} : vector<1x8xi32>
    %209 = vector.broadcast %193 : i32 to vector<1x8xi32>
    %210 = arith.addi %209, %208 : vector<1x8xi32>
    %211 = vector.broadcast %0 : vector<8x1xi32> to vector<8x8xi32>
    %212 = vector.broadcast %210 : vector<1x8xi32> to vector<8x8xi32>
    %213 = arith.cmpi sge, %211, %212 : vector<8x8xi32>
    %214 = vector.broadcast %188 : vector<8x1xf32> to vector<8x8xf32>
    %215 = vector.broadcast %203 : vector<1x8xf32> to vector<8x8xf32>
    %216 = arith.subf %214, %215 : vector<8x8xf32>
    %217 = vector.broadcast %206 : vector<1x8xf32> to vector<8x8xf32>
    %218 = arith.addf %216, %217 : vector<8x8xf32>
    %cst_80 = arith.constant -1.000000e+30 : f32
    %219 = vector.broadcast %cst_80 : f32 to vector<8x8xf32>
    %220 = arith.select %213, %218, %219 : vector<8x8xi1>, vector<8x8xf32>
    %cst_81 = arith.constant dense<0xFF800000> : vector<8xf32>
    %221 = vector.multi_reduction <maximumf>, %220, %cst_81 [1] : vector<8x8xf32> to vector<8xf32>
    %222 = vector.shape_cast %221 : vector<8xf32> to vector<8x1xf32>
    %223 = arith.maximumf %189, %222 : vector<8x1xf32>
    %224 = arith.subf %189, %223 : vector<8x1xf32>
    %225 = math.exp %224 : vector<8x1xf32>
    %226 = vector.broadcast %223 : vector<8x1xf32> to vector<8x8xf32>
    %227 = arith.subf %220, %226 : vector<8x8xf32>
    %228 = math.exp %227 : vector<8x8xf32>
    %229 = arith.mulf %207, %228 : vector<8x8xf32>
    %230 = arith.mulf %225, %190 : vector<8x1xf32>
    %cst_82 = arith.constant dense<0.000000e+00> : vector<8xf32>
    %231 = vector.multi_reduction <add>, %229, %cst_82 [1] : vector<8x8xf32> to vector<8xf32>
    %232 = vector.shape_cast %231 : vector<8xf32> to vector<8x1xf32>
    %233 = arith.addf %230, %232 : vector<8x1xf32>
    %234 = vector.broadcast %225 : vector<8x1xf32> to vector<8x16xf32>
    %235 = arith.mulf %234, %191 : vector<8x16xf32>
    %236 = arith.truncf %229 : vector<8x8xf32> to vector<8x8xbf16>
    %cst_83 = arith.constant dense<0.000000e+00> : vector<8x16xf32>
    %237 = tpu.matmul %236, %200, %cst_83 {dimension_numbers = #tpu.dot_dimension_numbers<[1], [0], [0], [1], [0, 0, 1, 1], [], []>} : vector<8x8xbf16>, vector<8x16xbf16>, vector<8x16xf32> -> vector<8x16xf32>
    %238 = arith.addf %235, %237 : vector<8x16xf32>
    %c1_i32_84 = arith.constant 1 : i32
    %239 = math.absf %233 : vector<8x1xf32>
    %cst_85 = arith.constant 0.000000e+00 : f32
    %240 = vector.broadcast %cst_85 : f32 to vector<8x1xf32>
    %241 = arith.subf %240, %223 : vector<8x1xf32>
    %242 = math.exp %241 : vector<8x1xf32>
    %243 = arith.maximumf %239, %242 : vector<8x1xf32>
    %cst_86 = arith.constant 9.99999997E-7 : f32
    %244 = vector.broadcast %cst_86 : f32 to vector<8x1xf32>
    %245 = arith.addf %243, %244 : vector<8x1xf32>
    %cst_87 = arith.constant 1.000000e+00 : f32
    %246 = vector.broadcast %cst_87 : f32 to vector<8x1xf32>
    %247 = arith.divf %246, %245 : vector<8x1xf32>
    %248 = vector.broadcast %247 : vector<8x1xf32> to vector<8x16xf32>
    %249 = arith.mulf %238, %248 : vector<8x16xf32>
    %cst_88 = arith.constant dense<0.000000e+00> : vector<8xf32>
    %250 = vector.multi_reduction <add>, %249, %cst_88 [1] : vector<8x16xf32> to vector<8xf32>
    %251 = vector.shape_cast %250 : vector<8xf32> to vector<8x1xf32>
    %cst_89 = arith.constant 1.600000e+01 : f32
    %252 = vector.broadcast %cst_89 : f32 to vector<8x1xf32>
    %253 = arith.divf %251, %252 : vector<8x1xf32>
    %254 = vector.broadcast %253 : vector<8x1xf32> to vector<8x16xf32>
    %255 = arith.subf %249, %254 : vector<8x16xf32>
    %256 = arith.mulf %255, %255 : vector<8x16xf32>
    %cst_90 = arith.constant dense<0.000000e+00> : vector<8xf32>
    %257 = vector.multi_reduction <add>, %256, %cst_90 [1] : vector<8x16xf32> to vector<8xf32>
    %258 = vector.shape_cast %257 : vector<8xf32> to vector<8x1xf32>
    %cst_91 = arith.constant 1.600000e+01 : f32
    %259 = vector.broadcast %cst_91 : f32 to vector<8x1xf32>
    %260 = arith.divf %258, %259 : vector<8x1xf32>
    %261 = vector.broadcast %253 : vector<8x1xf32> to vector<8x16xf32>
    %262 = arith.subf %249, %261 : vector<8x16xf32>
    %cst_92 = arith.constant 9.99999974E-6 : f32
    %263 = vector.broadcast %cst_92 : f32 to vector<8x1xf32>
    %264 = arith.addf %260, %263 : vector<8x1xf32>
    %265 = math.rsqrt %264 : vector<8x1xf32>
    %266 = vector.broadcast %265 : vector<8x1xf32> to vector<8x16xf32>
    %267 = arith.mulf %262, %266 : vector<8x16xf32>
    %c0_93 = arith.constant 0 : index
    %c16_94 = arith.constant 16 : index
    %268 = vector.load %arg18[%c0_93, %c16_94] : memref<8x64xf32, #tpu.memory_space<vmem>>, vector<8x16xf32>
    tpu.vector_store %arg18[%c0_93, %c16_94], %267 {strides = array<i32>} : memref<8x64xf32, #tpu.memory_space<vmem>>, vector<8x16xf32>,
    %c0_95 = arith.constant 0 : index
    %c32 = arith.constant 32 : index
    %269 = vector.load %arg16[%c0_95, %c32] : memref<8x136xf32, #tpu.memory_space<vmem>>, vector<8x16xf32>
    %cst_96 = arith.constant 2.500000e-01 : f32
    %270 = vector.broadcast %cst_96 : f32 to vector<8x16xf32>
    %271 = arith.mulf %269, %270 : vector<8x16xf32>
    %272 = arith.truncf %271 : vector<8x16xf32> to vector<8x16xbf16>
    %273 = vector.extract_strided_slice %90 {offsets = [0, 2], sizes = [8, 1], strides = [1, 1]} : vector<8x4xf32> to vector<8x1xf32>
    %cst_97 = arith.constant -1.000000e+30 : f32
    %274 = vector.broadcast %cst_97 : f32 to vector<8x1xf32>
    %cst_98 = arith.constant 0.000000e+00 : f32
    %275 = vector.broadcast %cst_98 : f32 to vector<8x1xf32>
    %cst_99 = arith.constant 0.000000e+00 : f32
    %276 = vector.broadcast %cst_99 : f32 to vector<8x16xf32>
    %c0_i32_100 = arith.constant 0 : i32
    %c8_i32_101 = arith.constant 8 : i32
    %277 = arith.muli %c0_i32_100, %c8_i32_101 : i32
    %278 = tpu.assume_multiple %277, 8 : i32
    %279 = arith.index_cast %278 : i32 to index
    %c96 = arith.constant 96 : index
    %280 = vector.load %arg16[%279, %c96] : memref<8x136xf32, #tpu.memory_space<vmem>>, vector<8x16xf32>
    %281 = arith.truncf %280 : vector<8x16xf32> to vector<8x16xbf16>
    %c0_102 = arith.constant 0 : index
    %282 = arith.index_cast %278 : i32 to index
    %c32_103 = arith.constant 32 : index
    %283 = vector.load %arg3[%c0_102, %282, %c32_103] : memref<1x8x64xf32, #tpu.memory_space<vmem>>, vector<1x8x16xf32>
    %284 = vector.shape_cast %283 : vector<1x8x16xf32> to vector<8x16xf32>
    %285 = arith.truncf %284 : vector<8x16xf32> to vector<8x16xbf16>
    %286 = arith.index_cast %c0_i32_100 : i32 to index
    %c2 = arith.constant 2 : index
    %c0_104 = arith.constant 0 : index
    %287 = vector.load %arg17[%286, %c2, %c0_104] : memref<1x8x8xf32, #tpu.memory_space<vmem>>, vector<1x1x8xf32>
    %288 = vector.shape_cast %287 : vector<1x1x8xf32> to vector<1x8xf32>
    %289 = arith.index_cast %c0_i32_100 : i32 to index
    %c6 = arith.constant 6 : index
    %c0_105 = arith.constant 0 : index
    %290 = vector.load %arg17[%289, %c6, %c0_105] : memref<1x8x8xf32, #tpu.memory_space<vmem>>, vector<1x1x8xf32>
    %291 = vector.shape_cast %290 : vector<1x1x8xf32> to vector<1x8xf32>
    %cst_106 = arith.constant dense<0.000000e+00> : vector<8x8xf32>
    %292 = tpu.matmul %272, %281, %cst_106 {dimension_numbers = #tpu.dot_dimension_numbers<[1], [1], [0], [0], [0, 0, 1, 0], [], []>} : vector<8x16xbf16>, vector<8x16xbf16>, vector<8x8xf32> -> vector<8x8xf32>
    %293 = tpu.iota {dimensions = array<i32: 1>} : vector<1x8xi32>
    %294 = vector.broadcast %278 : i32 to vector<1x8xi32>
    %295 = arith.addi %294, %293 : vector<1x8xi32>
    %296 = vector.broadcast %0 : vector<8x1xi32> to vector<8x8xi32>
    %297 = vector.broadcast %295 : vector<1x8xi32> to vector<8x8xi32>
    %298 = arith.cmpi sge, %296, %297 : vector<8x8xi32>
    %299 = vector.broadcast %273 : vector<8x1xf32> to vector<8x8xf32>
    %300 = vector.broadcast %288 : vector<1x8xf32> to vector<8x8xf32>
    %301 = arith.subf %299, %300 : vector<8x8xf32>
    %302 = vector.broadcast %291 : vector<1x8xf32> to vector<8x8xf32>
    %303 = arith.addf %301, %302 : vector<8x8xf32>
    %cst_107 = arith.constant -1.000000e+30 : f32
    %304 = vector.broadcast %cst_107 : f32 to vector<8x8xf32>
    %305 = arith.select %298, %303, %304 : vector<8x8xi1>, vector<8x8xf32>
    %cst_108 = arith.constant dense<0xFF800000> : vector<8xf32>
    %306 = vector.multi_reduction <maximumf>, %305, %cst_108 [1] : vector<8x8xf32> to vector<8xf32>
    %307 = vector.shape_cast %306 : vector<8xf32> to vector<8x1xf32>
    %308 = arith.maximumf %274, %307 : vector<8x1xf32>
    %309 = arith.subf %274, %308 : vector<8x1xf32>
    %310 = math.exp %309 : vector<8x1xf32>
    %311 = vector.broadcast %308 : vector<8x1xf32> to vector<8x8xf32>
    %312 = arith.subf %305, %311 : vector<8x8xf32>
    %313 = math.exp %312 : vector<8x8xf32>
    %314 = arith.mulf %292, %313 : vector<8x8xf32>
    %315 = arith.mulf %310, %275 : vector<8x1xf32>
    %cst_109 = arith.constant dense<0.000000e+00> : vector<8xf32>
    %316 = vector.multi_reduction <add>, %314, %cst_109 [1] : vector<8x8xf32> to vector<8xf32>
    %317 = vector.shape_cast %316 : vector<8xf32> to vector<8x1xf32>
    %318 = arith.addf %315, %317 : vector<8x1xf32>
    %319 = vector.broadcast %310 : vector<8x1xf32> to vector<8x16xf32>
    %320 = arith.mulf %319, %276 : vector<8x16xf32>
    %321 = arith.truncf %314 : vector<8x8xf32> to vector<8x8xbf16>
    %cst_110 = arith.constant dense<0.000000e+00> : vector<8x16xf32>
    %322 = tpu.matmul %321, %285, %cst_110 {dimension_numbers = #tpu.dot_dimension_numbers<[1], [0], [0], [1], [0, 0, 1, 1], [], []>} : vector<8x8xbf16>, vector<8x16xbf16>, vector<8x16xf32> -> vector<8x16xf32>
    %323 = arith.addf %320, %322 : vector<8x16xf32>
    %c1_i32_111 = arith.constant 1 : i32
    %324 = math.absf %318 : vector<8x1xf32>
    %cst_112 = arith.constant 0.000000e+00 : f32
    %325 = vector.broadcast %cst_112 : f32 to vector<8x1xf32>
    %326 = arith.subf %325, %308 : vector<8x1xf32>
    %327 = math.exp %326 : vector<8x1xf32>
    %328 = arith.maximumf %324, %327 : vector<8x1xf32>
    %cst_113 = arith.constant 9.99999997E-7 : f32
    %329 = vector.broadcast %cst_113 : f32 to vector<8x1xf32>
    %330 = arith.addf %328, %329 : vector<8x1xf32>
    %cst_114 = arith.constant 1.000000e+00 : f32
    %331 = vector.broadcast %cst_114 : f32 to vector<8x1xf32>
    %332 = arith.divf %331, %330 : vector<8x1xf32>
    %333 = vector.broadcast %332 : vector<8x1xf32> to vector<8x16xf32>
    %334 = arith.mulf %323, %333 : vector<8x16xf32>
    %cst_115 = arith.constant dense<0.000000e+00> : vector<8xf32>
    %335 = vector.multi_reduction <add>, %334, %cst_115 [1] : vector<8x16xf32> to vector<8xf32>
    %336 = vector.shape_cast %335 : vector<8xf32> to vector<8x1xf32>
    %cst_116 = arith.constant 1.600000e+01 : f32
    %337 = vector.broadcast %cst_116 : f32 to vector<8x1xf32>
    %338 = arith.divf %336, %337 : vector<8x1xf32>
    %339 = vector.broadcast %338 : vector<8x1xf32> to vector<8x16xf32>
    %340 = arith.subf %334, %339 : vector<8x16xf32>
    %341 = arith.mulf %340, %340 : vector<8x16xf32>
    %cst_117 = arith.constant dense<0.000000e+00> : vector<8xf32>
    %342 = vector.multi_reduction <add>, %341, %cst_117 [1] : vector<8x16xf32> to vector<8xf32>
    %343 = vector.shape_cast %342 : vector<8xf32> to vector<8x1xf32>
    %cst_118 = arith.constant 1.600000e+01 : f32
    %344 = vector.broadcast %cst_118 : f32 to vector<8x1xf32>
    %345 = arith.divf %343, %344 : vector<8x1xf32>
    %346 = vector.broadcast %338 : vector<8x1xf32> to vector<8x16xf32>
    %347 = arith.subf %334, %346 : vector<8x16xf32>
    %cst_119 = arith.constant 9.99999974E-6 : f32
    %348 = vector.broadcast %cst_119 : f32 to vector<8x1xf32>
    %349 = arith.addf %345, %348 : vector<8x1xf32>
    %350 = math.rsqrt %349 : vector<8x1xf32>
    %351 = vector.broadcast %350 : vector<8x1xf32> to vector<8x16xf32>
    %352 = arith.mulf %347, %351 : vector<8x16xf32>
    %c0_120 = arith.constant 0 : index
    %c32_121 = arith.constant 32 : index
    %353 = vector.load %arg18[%c0_120, %c32_121] : memref<8x64xf32, #tpu.memory_space<vmem>>, vector<8x16xf32>
    tpu.vector_store %arg18[%c0_120, %c32_121], %352 {strides = array<i32>} : memref<8x64xf32, #tpu.memory_space<vmem>>, vector<8x16xf32>,
    %c0_122 = arith.constant 0 : index
    %c48 = arith.constant 48 : index
    %354 = vector.load %arg16[%c0_122, %c48] : memref<8x136xf32, #tpu.memory_space<vmem>>, vector<8x16xf32>
    %cst_123 = arith.constant 2.500000e-01 : f32
    %355 = vector.broadcast %cst_123 : f32 to vector<8x16xf32>
    %356 = arith.mulf %354, %355 : vector<8x16xf32>
    %357 = arith.truncf %356 : vector<8x16xf32> to vector<8x16xbf16>
    %358 = vector.extract_strided_slice %90 {offsets = [0, 3], sizes = [8, 1], strides = [1, 1]} : vector<8x4xf32> to vector<8x1xf32>
    %cst_124 = arith.constant -1.000000e+30 : f32
    %359 = vector.broadcast %cst_124 : f32 to vector<8x1xf32>
    %cst_125 = arith.constant 0.000000e+00 : f32
    %360 = vector.broadcast %cst_125 : f32 to vector<8x1xf32>
    %cst_126 = arith.constant 0.000000e+00 : f32
    %361 = vector.broadcast %cst_126 : f32 to vector<8x16xf32>
    %c0_i32_127 = arith.constant 0 : i32
    %c8_i32_128 = arith.constant 8 : i32
    %362 = arith.muli %c0_i32_127, %c8_i32_128 : i32
    %363 = tpu.assume_multiple %362, 8 : i32
    %364 = arith.index_cast %363 : i32 to index
    %c112 = arith.constant 112 : index
    %365 = vector.load %arg16[%364, %c112] : memref<8x136xf32, #tpu.memory_space<vmem>>, vector<8x16xf32>
    %366 = arith.truncf %365 : vector<8x16xf32> to vector<8x16xbf16>
    %c0_129 = arith.constant 0 : index
    %367 = arith.index_cast %363 : i32 to index
    %c48_130 = arith.constant 48 : index
    %368 = vector.load %arg3[%c0_129, %367, %c48_130] : memref<1x8x64xf32, #tpu.memory_space<vmem>>, vector<1x8x16xf32>
    %369 = vector.shape_cast %368 : vector<1x8x16xf32> to vector<8x16xf32>
    %370 = arith.truncf %369 : vector<8x16xf32> to vector<8x16xbf16>
    %371 = arith.index_cast %c0_i32_127 : i32 to index
    %c3 = arith.constant 3 : index
    %c0_131 = arith.constant 0 : index
    %372 = vector.load %arg17[%371, %c3, %c0_131] : memref<1x8x8xf32, #tpu.memory_space<vmem>>, vector<1x1x8xf32>
    %373 = vector.shape_cast %372 : vector<1x1x8xf32> to vector<1x8xf32>
    %374 = arith.index_cast %c0_i32_127 : i32 to index
    %c7 = arith.constant 7 : index
    %c0_132 = arith.constant 0 : index
    %375 = vector.load %arg17[%374, %c7, %c0_132] : memref<1x8x8xf32, #tpu.memory_space<vmem>>, vector<1x1x8xf32>
    %376 = vector.shape_cast %375 : vector<1x1x8xf32> to vector<1x8xf32>
    %cst_133 = arith.constant dense<0.000000e+00> : vector<8x8xf32>
    %377 = tpu.matmul %357, %366, %cst_133 {dimension_numbers = #tpu.dot_dimension_numbers<[1], [1], [0], [0], [0, 0, 1, 0], [], []>} : vector<8x16xbf16>, vector<8x16xbf16>, vector<8x8xf32> -> vector<8x8xf32>
    %378 = tpu.iota {dimensions = array<i32: 1>} : vector<1x8xi32>
    %379 = vector.broadcast %363 : i32 to vector<1x8xi32>
    %380 = arith.addi %379, %378 : vector<1x8xi32>
    %381 = vector.broadcast %0 : vector<8x1xi32> to vector<8x8xi32>
    %382 = vector.broadcast %380 : vector<1x8xi32> to vector<8x8xi32>
    %383 = arith.cmpi sge, %381, %382 : vector<8x8xi32>
    %384 = vector.broadcast %358 : vector<8x1xf32> to vector<8x8xf32>
    %385 = vector.broadcast %373 : vector<1x8xf32> to vector<8x8xf32>
    %386 = arith.subf %384, %385 : vector<8x8xf32>
    %387 = vector.broadcast %376 : vector<1x8xf32> to vector<8x8xf32>
    %388 = arith.addf %386, %387 : vector<8x8xf32>
    %cst_134 = arith.constant -1.000000e+30 : f32
    %389 = vector.broadcast %cst_134 : f32 to vector<8x8xf32>
    %390 = arith.select %383, %388, %389 : vector<8x8xi1>, vector<8x8xf32>
    %cst_135 = arith.constant dense<0xFF800000> : vector<8xf32>
    %391 = vector.multi_reduction <maximumf>, %390, %cst_135 [1] : vector<8x8xf32> to vector<8xf32>
    %392 = vector.shape_cast %391 : vector<8xf32> to vector<8x1xf32>
    %393 = arith.maximumf %359, %392 : vector<8x1xf32>
    %394 = arith.subf %359, %393 : vector<8x1xf32>
    %395 = math.exp %394 : vector<8x1xf32>
    %396 = vector.broadcast %393 : vector<8x1xf32> to vector<8x8xf32>
    %397 = arith.subf %390, %396 : vector<8x8xf32>
    %398 = math.exp %397 : vector<8x8xf32>
    %399 = arith.mulf %377, %398 : vector<8x8xf32>
    %400 = arith.mulf %395, %360 : vector<8x1xf32>
    %cst_136 = arith.constant dense<0.000000e+00> : vector<8xf32>
    %401 = vector.multi_reduction <add>, %399, %cst_136 [1] : vector<8x8xf32> to vector<8xf32>
    %402 = vector.shape_cast %401 : vector<8xf32> to vector<8x1xf32>
    %403 = arith.addf %400, %402 : vector<8x1xf32>
    %404 = vector.broadcast %395 : vector<8x1xf32> to vector<8x16xf32>
    %405 = arith.mulf %404, %361 : vector<8x16xf32>
    %406 = arith.truncf %399 : vector<8x8xf32> to vector<8x8xbf16>
    %cst_137 = arith.constant dense<0.000000e+00> : vector<8x16xf32>
    %407 = tpu.matmul %406, %370, %cst_137 {dimension_numbers = #tpu.dot_dimension_numbers<[1], [0], [0], [1], [0, 0, 1, 1], [], []>} : vector<8x8xbf16>, vector<8x16xbf16>, vector<8x16xf32> -> vector<8x16xf32>
    %408 = arith.addf %405, %407 : vector<8x16xf32>
    %c1_i32_138 = arith.constant 1 : i32
    %409 = math.absf %403 : vector<8x1xf32>
    %cst_139 = arith.constant 0.000000e+00 : f32
    %410 = vector.broadcast %cst_139 : f32 to vector<8x1xf32>
    %411 = arith.subf %410, %393 : vector<8x1xf32>
    %412 = math.exp %411 : vector<8x1xf32>
    %413 = arith.maximumf %409, %412 : vector<8x1xf32>
    %cst_140 = arith.constant 9.99999997E-7 : f32
    %414 = vector.broadcast %cst_140 : f32 to vector<8x1xf32>
    %415 = arith.addf %413, %414 : vector<8x1xf32>
    %cst_141 = arith.constant 1.000000e+00 : f32
    %416 = vector.broadcast %cst_141 : f32 to vector<8x1xf32>
    %417 = arith.divf %416, %415 : vector<8x1xf32>
    %418 = vector.broadcast %417 : vector<8x1xf32> to vector<8x16xf32>
    %419 = arith.mulf %408, %418 : vector<8x16xf32>
    %cst_142 = arith.constant dense<0.000000e+00> : vector<8xf32>
    %420 = vector.multi_reduction <add>, %419, %cst_142 [1] : vector<8x16xf32> to vector<8xf32>
    %421 = vector.shape_cast %420 : vector<8xf32> to vector<8x1xf32>
    %cst_143 = arith.constant 1.600000e+01 : f32
    %422 = vector.broadcast %cst_143 : f32 to vector<8x1xf32>
    %423 = arith.divf %421, %422 : vector<8x1xf32>
    %424 = vector.broadcast %423 : vector<8x1xf32> to vector<8x16xf32>
    %425 = arith.subf %419, %424 : vector<8x16xf32>
    %426 = arith.mulf %425, %425 : vector<8x16xf32>
    %cst_144 = arith.constant dense<0.000000e+00> : vector<8xf32>
    %427 = vector.multi_reduction <add>, %426, %cst_144 [1] : vector<8x16xf32> to vector<8xf32>
    %428 = vector.shape_cast %427 : vector<8xf32> to vector<8x1xf32>
    %cst_145 = arith.constant 1.600000e+01 : f32
    %429 = vector.broadcast %cst_145 : f32 to vector<8x1xf32>
    %430 = arith.divf %428, %429 : vector<8x1xf32>
    %431 = vector.broadcast %423 : vector<8x1xf32> to vector<8x16xf32>
    %432 = arith.subf %419, %431 : vector<8x16xf32>
    %cst_146 = arith.constant 9.99999974E-6 : f32
    %433 = vector.broadcast %cst_146 : f32 to vector<8x1xf32>
    %434 = arith.addf %430, %433 : vector<8x1xf32>
    %435 = math.rsqrt %434 : vector<8x1xf32>
    %436 = vector.broadcast %435 : vector<8x1xf32> to vector<8x16xf32>
    %437 = arith.mulf %432, %436 : vector<8x16xf32>
    %c0_147 = arith.constant 0 : index
    %c48_148 = arith.constant 48 : index
    %438 = vector.load %arg18[%c0_147, %c48_148] : memref<8x64xf32, #tpu.memory_space<vmem>>, vector<8x16xf32>
    tpu.vector_store %arg18[%c0_147, %c48_148], %437 {strides = array<i32>} : memref<8x64xf32, #tpu.memory_space<vmem>>, vector<8x16xf32>,
    %c0_149 = arith.constant 0 : index
    %c0_150 = arith.constant 0 : index
    %c0_151 = arith.constant 0 : index
    %439 = vector.load %arg2[%c0_149, %c0_150, %c0_151] : memref<1x8x64xf32, #tpu.memory_space<vmem>>, vector<1x8x64xf32>
    %440 = vector.shape_cast %439 : vector<1x8x64xf32> to vector<8x64xf32>
    %c0_152 = arith.constant 0 : index
    %c0_153 = arith.constant 0 : index
    %441 = vector.load %arg18[%c0_152, %c0_153] : memref<8x64xf32, #tpu.memory_space<vmem>>, vector<8x64xf32>
    %c0_154 = arith.constant 0 : index
    %c0_155 = arith.constant 0 : index
    %442 = vector.load %arg10[%c0_154, %c0_155] : memref<1x64xf32, #tpu.memory_space<vmem>>, vector<1x64xf32>
    %443 = vector.broadcast %442 : vector<1x64xf32> to vector<8x64xf32>
    %444 = arith.mulf %441, %443 : vector<8x64xf32>
    %c0_156 = arith.constant 0 : index
    %c0_157 = arith.constant 0 : index
    %445 = vector.load %arg11[%c0_156, %c0_157] : memref<1x64xf32, #tpu.memory_space<vmem>>, vector<1x64xf32>
    %c0_158 = arith.constant 0 : index
    %c0_159 = arith.constant 0 : index
    %446 = vector.load %arg15[%c0_158, %c0_159] : memref<8x64xf32, #tpu.memory_space<vmem>>, vector<8x64xf32>
    %447 = vector.broadcast %445 : vector<1x64xf32> to vector<8x64xf32>
    %448 = arith.mulf %447, %446 : vector<8x64xf32>
    %449 = arith.addf %444, %448 : vector<8x64xf32>
    %450 = arith.negf %440 : vector<8x64xf32>
    %451 = math.exp %450 : vector<8x64xf32>
    %cst_160 = arith.constant 1.000000e+00 : f32
    %452 = vector.broadcast %cst_160 : f32 to vector<8x64xf32>
    %453 = arith.addf %452, %451 : vector<8x64xf32>
    %454 = arith.divf %452, %453 : vector<8x64xf32>
    %455 = arith.mulf %440, %454 : vector<8x64xf32>
    %456 = arith.mulf %449, %455 : vector<8x64xf32>
    %c0_161 = arith.constant 0 : index
    %c0_162 = arith.constant 0 : index
    %457 = vector.load %arg12[%c0_161, %c0_162] : memref<64x32xf32, #tpu.memory_space<vmem>>, vector<64x32xf32>
    %cst_163 = arith.constant dense<0.000000e+00> : vector<8x32xf32>
    %458 = tpu.matmul %456, %457, %cst_163 {dimension_numbers = #tpu.dot_dimension_numbers<[1], [0], [0], [1], [0, 0, 1, 1], [], []>} : vector<8x64xf32>, vector<64x32xf32>, vector<8x32xf32> -> vector<8x32xf32>
    %c0_164 = arith.constant 0 : index
    %c0_165 = arith.constant 0 : index
    %459 = vector.load %arg13[%c0_164, %c0_165] : memref<1x32xf32, #tpu.memory_space<vmem>>, vector<1x32xf32>
    %460 = vector.broadcast %459 : vector<1x32xf32> to vector<8x32xf32>
    %461 = arith.addf %458, %460 : vector<8x32xf32>
    %c0_166 = arith.constant 0 : index
    %c0_167 = arith.constant 0 : index
    %c0_168 = arith.constant 0 : index
    %462 = vector.load %arg5[%c0_166, %c0_167, %c0_168] : memref<1x8x32xf32, #tpu.memory_space<vmem>>, vector<1x8x32xf32>
    %463 = vector.shape_cast %462 : vector<1x8x32xf32> to vector<8x32xf32>
    %464 = arith.addf %463, %461 : vector<8x32xf32>
    %c0_169 = arith.constant 0 : index
    %c0_170 = arith.constant 0 : index
    %c0_171 = arith.constant 0 : index
    %465 = vector.load %arg14[%c0_169, %c0_170, %c0_171] : memref<1x8x32xf32, #tpu.memory_space<vmem>>, vector<1x8x32xf32>
    %466 = vector.shape_cast %465 : vector<1x8x32xf32> to vector<8x32xf32>
    %467 = vector.shape_cast %464 : vector<8x32xf32> to vector<1x8x32xf32>
    tpu.vector_store %arg14[%c0_169, %c0_170, %c0_171], %467 {strides = array<i32>} : memref<1x8x32xf32, #tpu.memory_space<vmem>>, vector<1x8x32xf32>,
    return
  }
  func.func @transform_0(%arg0: i32) -> (i32, i32, i32) {
    %c0_i32 = arith.constant 0 : i32
    %c0_i32_0 = arith.constant 0 : i32
    %c0_i32_1 = arith.constant 0 : i32
    return %arg0, %c0_i32, %c0_i32_0 : i32, i32, i32
  }
  func.func @transform_1(%arg0: i32) -> (i32, i32, i32) {
    %c0_i32 = arith.constant 0 : i32
    %c0_i32_0 = arith.constant 0 : i32
    %c0_i32_1 = arith.constant 0 : i32
    return %arg0, %c0_i32, %c0_i32_0 : i32, i32, i32
  }
  func.func @transform_2(%arg0: i32) -> (i32, i32, i32) {
    %c0_i32 = arith.constant 0 : i32
    %c0_i32_0 = arith.constant 0 : i32
    %c0_i32_1 = arith.constant 0 : i32
    return %arg0, %c0_i32, %c0_i32_0 : i32, i32, i32
  }
  func.func @transform_3(%arg0: i32) -> (i32, i32, i32) {
    %c0_i32 = arith.constant 0 : i32
    %c0_i32_0 = arith.constant 0 : i32
    %c0_i32_1 = arith.constant 0 : i32
    return %arg0, %c0_i32, %c0_i32_0 : i32, i32, i32
  }
  func.func @transform_4(%arg0: i32) -> (i32, i32, i32) {
    %c0_i32 = arith.constant 0 : i32
    %c0_i32_0 = arith.constant 0 : i32
    %c0_i32_1 = arith.constant 0 : i32
    return %arg0, %c0_i32, %c0_i32_0 : i32, i32, i32
  }
  func.func @transform_5(%arg0: i32) -> (i32, i32) {
    %c0_i32 = arith.constant 0 : i32
    %c0_i32_0 = arith.constant 0 : i32
    %c0_i32_1 = arith.constant 0 : i32
    return %c0_i32, %c0_i32_0 : i32, i32
  }
  func.func @transform_6(%arg0: i32) -> (i32, i32) {
    %c0_i32 = arith.constant 0 : i32
    %c0_i32_0 = arith.constant 0 : i32
    %c0_i32_1 = arith.constant 0 : i32
    return %c0_i32, %c0_i32_0 : i32, i32
  }
  func.func @transform_7(%arg0: i32) -> (i32, i32) {
    %c0_i32 = arith.constant 0 : i32
    %c0_i32_0 = arith.constant 0 : i32
    %c0_i32_1 = arith.constant 0 : i32
    return %c0_i32, %c0_i32_0 : i32, i32
  }
  func.func @transform_8(%arg0: i32) -> (i32, i32) {
    %c0_i32 = arith.constant 0 : i32
    %c0_i32_0 = arith.constant 0 : i32
    %c0_i32_1 = arith.constant 0 : i32
    return %c0_i32, %c0_i32_0 : i32, i32
  }
  func.func @transform_9(%arg0: i32) -> (i32, i32) {
    %c0_i32 = arith.constant 0 : i32
    %c0_i32_0 = arith.constant 0 : i32
    %c0_i32_1 = arith.constant 0 : i32
    return %c0_i32, %c0_i32_0 : i32, i32
  }
  func.func @transform_10(%arg0: i32) -> (i32, i32) {
    %c0_i32 = arith.constant 0 : i32
    %c0_i32_0 = arith.constant 0 : i32
    %c0_i32_1 = arith.constant 0 : i32
    return %c0_i32, %c0_i32_0 : i32, i32
  }
  func.func @transform_11(%arg0: i32) -> (i32, i32) {
    %c0_i32 = arith.constant 0 : i32
    %c0_i32_0 = arith.constant 0 : i32
    %c0_i32_1 = arith.constant 0 : i32
    return %c0_i32, %c0_i32_0 : i32, i32
  }
  func.func @transform_12(%arg0: i32) -> (i32, i32) {
    %c0_i32 = arith.constant 0 : i32
    %c0_i32_0 = arith.constant 0 : i32
    %c0_i32_1 = arith.constant 0 : i32
    return %c0_i32, %c0_i32_0 : i32, i32
  }
  func.func @transform_13(%arg0: i32) -> (i32, i32, i32) {
    %c0_i32 = arith.constant 0 : i32
    %c0_i32_0 = arith.constant 0 : i32
    %c0_i32_1 = arith.constant 0 : i32
    return %arg0, %c0_i32, %c0_i32_0 : i32, i32, i32
  }
}

module attributes {stable_mosaic.version = 11 : i64} {
  func.func @_mlstm_block_core_kernel(%arg0: i32, %arg1: memref<1x8x64xf32, #tpu.memory_space<vmem>>, %arg2: memref<1x8x64xf32, #tpu.memory_space<vmem>>, %arg3: memref<1x8x64xf32, #tpu.memory_space<vmem>>, %arg4: memref<1x8x8xf32, #tpu.memory_space<vmem>>, %arg5: memref<1x8x32xf32, #tpu.memory_space<vmem>>, %arg6: memref<4x64xf32, #tpu.memory_space<vmem>>, %arg7: memref<1x64xf32, #tpu.memory_space<vmem>>, %arg8: memref<64x136xf32, #tpu.memory_space<vmem>>, %arg9: memref<1x136xf32, #tpu.memory_space<vmem>>, %arg10: memref<1x64xf32, #tpu.memory_space<vmem>>, %arg11: memref<1x64xf32, #tpu.memory_space<vmem>>, %arg12: memref<64x32xf32, #tpu.memory_space<vmem>>, %arg13: memref<1x32xf32, #tpu.memory_space<vmem>>, %arg14: memref<1x8x32xf32, #tpu.memory_space<vmem>>, %arg15: memref<8x64xf32, #tpu.memory_space<vmem>>, %arg16: memref<8x136xf32, #tpu.memory_space<vmem>>, %arg17: memref<1x8x8xf32, #tpu.memory_space<vmem>>, %arg18: memref<8x64xf32, #tpu.memory_space<vmem>>) attributes {dimension_semantics = [#tpu.dimension_semantics<parallel>], iteration_bounds = array<i64: 2>, scalar_prefetch = 0 : i64, scratch_operands = 4 : i64, tpu.core_type = #tpu.core_type<tc>, window_params = [{transform_indices = @transform_0, window_bounds = array<i64: 1, 8, 64>}, {transform_indices = @transform_1, window_bounds = array<i64: 1, 8, 64>}, {transform_indices = @transform_2, window_bounds = array<i64: 1, 8, 64>}, {transform_indices = @transform_3, window_bounds = array<i64: 1, 8, 8>}, {transform_indices = @transform_4, window_bounds = array<i64: 1, 8, 32>}, {pipeline_mode = #tpu.pipeline_mode<synchronous>, transform_indices = @transform_5, window_bounds = array<i64: 4, 64>}, {pipeline_mode = #tpu.pipeline_mode<synchronous>, transform_indices = @transform_6, window_bounds = array<i64: 1, 64>}, {pipeline_mode = #tpu.pipeline_mode<synchronous>, transform_indices = @transform_7, window_bounds = array<i64: 64, 136>}, {pipeline_mode = #tpu.pipeline_mode<synchronous>, transform_indices = @transform_8, window_bounds = array<i64: 1, 136>}, {pipeline_mode = #tpu.pipeline_mode<synchronous>, transform_indices = @transform_9, window_bounds = array<i64: 1, 64>}, {pipeline_mode = #tpu.pipeline_mode<synchronous>, transform_indices = @transform_10, window_bounds = array<i64: 1, 64>}, {pipeline_mode = #tpu.pipeline_mode<synchronous>, transform_indices = @transform_11, window_bounds = array<i64: 64, 32>}, {pipeline_mode = #tpu.pipeline_mode<synchronous>, transform_indices = @transform_12, window_bounds = array<i64: 1, 32>}, {transform_indices = @transform_13, window_bounds = array<i64: 1, 8, 32>}]} {
    %0 = tpu.iota {dimensions = array<i32: 0>} : vector<8x1xi32>
    %c0 = arith.constant 0 : index
    %c0_0 = arith.constant 0 : index
    %c0_1 = arith.constant 0 : index
    %1 = vector.load %arg1[%c0, %c0_0, %c0_1] : memref<1x8x64xf32, #tpu.memory_space<vmem>>, vector<1x8x64xf32>
    %2 = vector.shape_cast %1 : vector<1x8x64xf32> to vector<8x64xf32>
    %c0_2 = arith.constant 0 : index
    %c0_3 = arith.constant 0 : index
    %3 = vector.load %arg6[%c0_2, %c0_3] : memref<4x64xf32, #tpu.memory_space<vmem>>, vector<4x64xf32>
    %4 = vector.extract_strided_slice %3 {offsets = [3, 0], sizes = [1, 64], strides = [1, 1]} : vector<4x64xf32> to vector<1x64xf32>
    %5 = vector.broadcast %4 : vector<1x64xf32> to vector<8x64xf32>
    %6 = arith.mulf %2, %5 : vector<8x64xf32>
    %c3_i32 = arith.constant 3 : i32
    %7 = tpu.dynamic_rotate %2 by %c3_i32 dim 0 : vector<8x64xf32>, i32 -> vector<8x64xf32>
    %c3_i32_4 = arith.constant 3 : i32
    %8 = vector.broadcast %c3_i32_4 : i32 to vector<8x1xi32>
    %9 = arith.cmpi sge, %0, %8 : vector<8x1xi32>
    %cst = arith.constant 0.000000e+00 : f32
    %10 = vector.shape_cast %9 : vector<8x1xi1> to vector<8x1xi1>
    %11 = vector.broadcast %10 : vector<8x1xi1> to vector<8x64xi1>
    %12 = vector.broadcast %cst : f32 to vector<8x64xf32>
    %13 = arith.select %11, %7, %12 : vector<8x64xi1>, vector<8x64xf32>
    %14 = vector.extract_strided_slice %3 {offsets = [0, 0], sizes = [1, 64], strides = [1, 1]} : vector<4x64xf32> to vector<1x64xf32>
    %15 = vector.broadcast %14 : vector<1x64xf32> to vector<8x64xf32>
    %16 = arith.mulf %13, %15 : vector<8x64xf32>
    %17 = arith.addf %6, %16 : vector<8x64xf32>
    %c2_i32 = arith.constant 2 : i32
    %18 = tpu.dynamic_rotate %2 by %c2_i32 dim 0 : vector<8x64xf32>, i32 -> vector<8x64xf32>
    %c2_i32_5 = arith.constant 2 : i32
    %19 = vector.broadcast %c2_i32_5 : i32 to vector<8x1xi32>
    %20 = arith.cmpi sge, %0, %19 : vector<8x1xi32>
    %cst_6 = arith.constant 0.000000e+00 : f32
    %21 = vector.shape_cast %20 : vector<8x1xi1> to vector<8x1xi1>
    %22 = vector.broadcast %21 : vector<8x1xi1> to vector<8x64xi1>
    %23 = vector.broadcast %cst_6 : f32 to vector<8x64xf32>
    %24 = arith.select %22, %18, %23 : vector<8x64xi1>, vector<8x64xf32>
    %25 = vector.extract_strided_slice %3 {offsets = [1, 0], sizes = [1, 64], strides = [1, 1]} : vector<4x64xf32> to vector<1x64xf32>
    %26 = vector.broadcast %25 : vector<1x64xf32> to vector<8x64xf32>
    %27 = arith.mulf %24, %26 : vector<8x64xf32>
    %28 = arith.addf %17, %27 : vector<8x64xf32>
    %c1_i32 = arith.constant 1 : i32
    %29 = tpu.dynamic_rotate %2 by %c1_i32 dim 0 : vector<8x64xf32>, i32 -> vector<8x64xf32>
    %c1_i32_7 = arith.constant 1 : i32
    %30 = vector.broadcast %c1_i32_7 : i32 to vector<8x1xi32>
    %31 = arith.cmpi sge, %0, %30 : vector<8x1xi32>
    %cst_8 = arith.constant 0.000000e+00 : f32
    %32 = vector.shape_cast %31 : vector<8x1xi1> to vector<8x1xi1>
    %33 = vector.broadcast %32 : vector<8x1xi1> to vector<8x64xi1>
    %34 = vector.broadcast %cst_8 : f32 to vector<8x64xf32>
    %35 = arith.select %33, %29, %34 : vector<8x64xi1>, vector<8x64xf32>
    %36 = vector.extract_strided_slice %3 {offsets = [2, 0], sizes = [1, 64], strides = [1, 1]} : vector<4x64xf32> to vector<1x64xf32>
    %37 = vector.broadcast %36 : vector<1x64xf32> to vector<8x64xf32>
    %38 = arith.mulf %35, %37 : vector<8x64xf32>
    %39 = arith.addf %28, %38 : vector<8x64xf32>
    %c0_9 = arith.constant 0 : index
    %c0_10 = arith.constant 0 : index
    %40 = vector.load %arg7[%c0_9, %c0_10] : memref<1x64xf32, #tpu.memory_space<vmem>>, vector<1x64xf32>
    %41 = vector.broadcast %40 : vector<1x64xf32> to vector<8x64xf32>
    %42 = arith.addf %39, %41 : vector<8x64xf32>
    %43 = arith.negf %42 : vector<8x64xf32>
    %44 = math.exp %43 : vector<8x64xf32>
    %cst_11 = arith.constant 1.000000e+00 : f32
    %45 = vector.broadcast %cst_11 : f32 to vector<8x64xf32>
    %46 = arith.addf %45, %44 : vector<8x64xf32>
    %47 = arith.divf %45, %46 : vector<8x64xf32>
    %48 = arith.mulf %42, %47 : vector<8x64xf32>
    %c0_12 = arith.constant 0 : index
    %c0_13 = arith.constant 0 : index
    %49 = vector.load %arg15[%c0_12, %c0_13] : memref<8x64xf32, #tpu.memory_space<vmem>>, vector<8x64xf32>
    tpu.vector_store %arg15[%c0_12, %c0_13], %48 {strides = array<i32>} : memref<8x64xf32, #tpu.memory_space<vmem>>, vector<8x64xf32>,
    %c0_14 = arith.constant 0 : index
    %c0_15 = arith.constant 0 : index
    %50 = vector.load %arg8[%c0_14, %c0_15] : memref<64x136xf32, #tpu.memory_space<vmem>>, vector<64x136xf32>
    %cst_16 = arith.constant dense<0.000000e+00> : vector<8x136xf32>
    %51 = tpu.matmul %48, %50, %cst_16 {dimension_numbers = #tpu.dot_dimension_numbers<[1], [0], [0], [1], [0, 0, 1, 1], [], []>} : vector<8x64xf32>, vector<64x136xf32>, vector<8x136xf32> -> vector<8x136xf32>
    %c0_17 = arith.constant 0 : index
    %c0_18 = arith.constant 0 : index
    %52 = vector.load %arg9[%c0_17, %c0_18] : memref<1x136xf32, #tpu.memory_space<vmem>>, vector<1x136xf32>
    %53 = vector.broadcast %52 : vector<1x136xf32> to vector<8x136xf32>
    %54 = arith.addf %51, %53 : vector<8x136xf32>
    %c0_19 = arith.constant 0 : index
    %c0_20 = arith.constant 0 : index
    %55 = vector.load %arg16[%c0_19, %c0_20] : memref<8x136xf32, #tpu.memory_space<vmem>>, vector<8x136xf32>
    tpu.vector_store %arg16[%c0_19, %c0_20], %54 {strides = array<i32>} : memref<8x136xf32, #tpu.memory_space<vmem>>, vector<8x136xf32>,
    %56 = vector.extract_strided_slice %54 {offsets = [0, 128], sizes = [8, 8], strides = [1, 1]} : vector<8x136xf32> to vector<8x8xf32>
    %c0_21 = arith.constant 0 : index
    %c0_22 = arith.constant 0 : index
    %c0_23 = arith.constant 0 : index
    %57 = vector.load %arg4[%c0_21, %c0_22, %c0_23] : memref<1x8x8xf32, #tpu.memory_space<vmem>>, vector<1x8x8xf32>
    %58 = vector.shape_cast %57 : vector<1x8x8xf32> to vector<8x8xf32>
    %59 = arith.addf %56, %58 : vector<8x8xf32>
    %60 = vector.extract_strided_slice %59 {offsets = [0, 0], sizes = [8, 4], strides = [1, 1]} : vector<8x8xf32> to vector<8x4xf32>
    %61 = vector.extract_strided_slice %59 {offsets = [0, 4], sizes = [8, 4], strides = [1, 1]} : vector<8x8xf32> to vector<8x4xf32>
    %cst_24 = arith.constant 0.000000e+00 : f32
    %62 = vector.broadcast %cst_24 : f32 to vector<8x4xf32>
    %63 = arith.minimumf %61, %62 : vector<8x4xf32>
    %64 = math.absf %61 : vector<8x4xf32>
    %cst_25 = arith.constant 0.000000e+00 : f32
    %65 = vector.broadcast %cst_25 : f32 to vector<8x4xf32>
    %66 = arith.subf %65, %64 : vector<8x4xf32>
    %67 = math.exp %66 : vector<8x4xf32>
    %cst_26 = arith.constant 1.000000e+00 : f32
    %68 = vector.broadcast %cst_26 : f32 to vector<8x4xf32>
    %69 = arith.addf %68, %67 : vector<8x4xf32>
    %70 = math.log %69 : vector<8x4xf32>
    %71 = arith.subf %63, %70 : vector<8x4xf32>
    %72 = tpu.iota {dimensions = array<i32: 0>} : vector<8x4xi32>
    %c1_i32_27 = arith.constant 1 : i32
    %73 = vector.broadcast %c1_i32_27 : i32 to vector<8x4xi32>
    %74 = arith.cmpi sge, %72, %73 : vector<8x4xi32>
    %c1_i32_28 = arith.constant 1 : i32
    %75 = tpu.dynamic_rotate %71 by %c1_i32_28 dim 0 : vector<8x4xf32>, i32 -> vector<8x4xf32>
    %cst_29 = arith.constant 0.000000e+00 : f32
    %76 = vector.broadcast %cst_29 : f32 to vector<8x4xf32>
    %77 = arith.select %74, %75, %76 : vector<8x4xi1>, vector<8x4xf32>
    %78 = arith.addf %71, %77 : vector<8x4xf32>
    %c2_i32_30 = arith.constant 2 : i32
    %79 = vector.broadcast %c2_i32_30 : i32 to vector<8x4xi32>
    %80 = arith.cmpi sge, %72, %79 : vector<8x4xi32>
    %c2_i32_31 = arith.constant 2 : i32
    %81 = tpu.dynamic_rotate %78 by %c2_i32_31 dim 0 : vector<8x4xf32>, i32 -> vector<8x4xf32>
    %cst_32 = arith.constant 0.000000e+00 : f32
    %82 = vector.broadcast %cst_32 : f32 to vector<8x4xf32>
    %83 = arith.select %80, %81, %82 : vector<8x4xi1>, vector<8x4xf32>
    %84 = arith.addf %78, %83 : vector<8x4xf32>
    %c4_i32 = arith.constant 4 : i32
    %85 = vector.broadcast %c4_i32 : i32 to vector<8x4xi32>
    %86 = arith.cmpi sge, %72, %85 : vector<8x4xi32>
    %c4_i32_33 = arith.constant 4 : i32
    %87 = tpu.dynamic_rotate %84 by %c4_i32_33 dim 0 : vector<8x4xf32>, i32 -> vector<8x4xf32>
    %cst_34 = arith.constant 0.000000e+00 : f32
    %88 = vector.broadcast %cst_34 : f32 to vector<8x4xf32>
    %89 = arith.select %86, %87, %88 : vector<8x4xi1>, vector<8x4xf32>
    %90 = arith.addf %84, %89 : vector<8x4xf32>
    %91 = tpu.transpose %90, [1, 0] : vector<8x4xf32> -> vector<4x8xf32>
    %92 = tpu.transpose %60, [1, 0] : vector<8x4xf32> -> vector<4x8xf32>
    %c0_35 = arith.constant 0 : index
    %c0_36 = arith.constant 0 : index
    %c0_37 = arith.constant 0 : index
    %93 = vector.load %arg17[%c0_35, %c0_36, %c0_37] : memref<1x8x8xf32, #tpu.memory_space<vmem>>, vector<1x4x8xf32>
    %94 = vector.shape_cast %93 : vector<1x4x8xf32> to vector<4x8xf32>
    %95 = vector.shape_cast %91 : vector<4x8xf32> to vector<1x4x8xf32>
    tpu.vector_store %arg17[%c0_35, %c0_36, %c0_37], %95 {strides = array<i32>} : memref<1x8x8xf32, #tpu.memory_space<vmem>>, vector<1x4x8xf32>,
    %c0_38 = arith.constant 0 : index
    %c4 = arith.constant 4 : index
    %c0_39 = arith.constant 0 : index
    %96 = vector.load %arg17[%c0_38, %c4, %c0_39] : memref<1x8x8xf32, #tpu.memory_space<vmem>>, vector<1x4x8xf32>
    %97 = vector.shape_cast %96 : vector<1x4x8xf32> to vector<4x8xf32>
    %98 = vector.shape_cast %92 : vector<4x8xf32> to vector<1x4x8xf32>
    tpu.vector_store %arg17[%c0_38, %c4, %c0_39], %98 {strides = array<i32>} : memref<1x8x8xf32, #tpu.memory_space<vmem>>, vector<1x4x8xf32>,
    %c0_40 = arith.constant 0 : index
    %c0_41 = arith.constant 0 : index
    %99 = vector.load %arg16[%c0_40, %c0_41] : memref<8x136xf32, #tpu.memory_space<vmem>>, vector<8x16xf32>
    %cst_42 = arith.constant 2.500000e-01 : f32
    %100 = vector.broadcast %cst_42 : f32 to vector<8x16xf32>
    %101 = arith.mulf %99, %100 : vector<8x16xf32>
    %102 = arith.truncf %101 : vector<8x16xf32> to vector<8x16xbf16>
    %103 = vector.extract_strided_slice %90 {offsets = [0, 0], sizes = [8, 1], strides = [1, 1]} : vector<8x4xf32> to vector<8x1xf32>
    %cst_43 = arith.constant -1.000000e+30 : f32
    %104 = vector.broadcast %cst_43 : f32 to vector<8x1xf32>
    %cst_44 = arith.constant 0.000000e+00 : f32
    %105 = vector.broadcast %cst_44 : f32 to vector<8x1xf32>
    %cst_45 = arith.constant 0.000000e+00 : f32
    %106 = vector.broadcast %cst_45 : f32 to vector<8x16xf32>
    %c0_i32 = arith.constant 0 : i32
    %c8_i32 = arith.constant 8 : i32
    %107 = arith.muli %c0_i32, %c8_i32 : i32
    %108 = tpu.assume_multiple %107, 8 : i32
    %109 = arith.index_cast %108 : i32 to index
    %c64 = arith.constant 64 : index
    %110 = vector.load %arg16[%109, %c64] : memref<8x136xf32, #tpu.memory_space<vmem>>, vector<8x16xf32>
    %111 = arith.truncf %110 : vector<8x16xf32> to vector<8x16xbf16>
    %c0_46 = arith.constant 0 : index
    %112 = arith.index_cast %108 : i32 to index
    %c0_47 = arith.constant 0 : index
    %113 = vector.load %arg3[%c0_46, %112, %c0_47] : memref<1x8x64xf32, #tpu.memory_space<vmem>>, vector<1x8x16xf32>
    %114 = vector.shape_cast %113 : vector<1x8x16xf32> to vector<8x16xf32>
    %115 = arith.truncf %114 : vector<8x16xf32> to vector<8x16xbf16>
    %116 = arith.index_cast %c0_i32 : i32 to index
    %c0_48 = arith.constant 0 : index
    %c0_49 = arith.constant 0 : index
    %117 = vector.load %arg17[%116, %c0_48, %c0_49] : memref<1x8x8xf32, #tpu.memory_space<vmem>>, vector<1x1x8xf32>
    %118 = vector.shape_cast %117 : vector<1x1x8xf32> to vector<1x8xf32>
    %119 = arith.index_cast %c0_i32 : i32 to index
    %c4_50 = arith.constant 4 : index
    %c0_51 = arith.constant 0 : index
    %120 = vector.load %arg17[%119, %c4_50, %c0_51] : memref<1x8x8xf32, #tpu.memory_space<vmem>>, vector<1x1x8xf32>
    %121 = vector.shape_cast %120 : vector<1x1x8xf32> to vector<1x8xf32>
    %cst_52 = arith.constant dense<0.000000e+00> : vector<8x8xf32>
    %122 = tpu.matmul %102, %111, %cst_52 {dimension_numbers = #tpu.dot_dimension_numbers<[1], [1], [0], [0], [0, 0, 1, 0], [], []>} : vector<8x16xbf16>, vector<8x16xbf16>, vector<8x8xf32> -> vector<8x8xf32>
    %123 = tpu.iota {dimensions = array<i32: 1>} : vector<1x8xi32>
    %124 = vector.broadcast %108 : i32 to vector<1x8xi32>
    %125 = arith.addi %124, %123 : vector<1x8xi32>
    %126 = vector.broadcast %0 : vector<8x1xi32> to vector<8x8xi32>
    %127 = vector.broadcast %125 : vector<1x8xi32> to vector<8x8xi32>
    %128 = arith.cmpi sge, %126, %127 : vector<8x8xi32>
    %129 = vector.broadcast %103 : vector<8x1xf32> to vector<8x8xf32>
    %130 = vector.broadcast %118 : vector<1x8xf32> to vector<8x8xf32>
    %131 = arith.subf %129, %130 : vector<8x8xf32>
    %132 = vector.broadcast %121 : vector<1x8xf32> to vector<8x8xf32>
    %133 = arith.addf %131, %132 : vector<8x8xf32>
    %cst_53 = arith.constant -1.000000e+30 : f32
    %134 = vector.broadcast %cst_53 : f32 to vector<8x8xf32>
    %135 = arith.select %128, %133, %134 : vector<8x8xi1>, vector<8x8xf32>
    %cst_54 = arith.constant dense<0xFF800000> : vector<8xf32>
    %136 = vector.multi_reduction <maximumf>, %135, %cst_54 [1] : vector<8x8xf32> to vector<8xf32>
    %137 = vector.shape_cast %136 : vector<8xf32> to vector<8x1xf32>
    %138 = arith.maximumf %104, %137 : vector<8x1xf32>
    %139 = arith.subf %104, %138 : vector<8x1xf32>
    %140 = math.exp %139 : vector<8x1xf32>
    %141 = vector.broadcast %138 : vector<8x1xf32> to vector<8x8xf32>
    %142 = arith.subf %135, %141 : vector<8x8xf32>
    %143 = math.exp %142 : vector<8x8xf32>
    %144 = arith.mulf %122, %143 : vector<8x8xf32>
    %145 = arith.mulf %140, %105 : vector<8x1xf32>
    %cst_55 = arith.constant dense<0.000000e+00> : vector<8xf32>
    %146 = vector.multi_reduction <add>, %144, %cst_55 [1] : vector<8x8xf32> to vector<8xf32>
    %147 = vector.shape_cast %146 : vector<8xf32> to vector<8x1xf32>
    %148 = arith.addf %145, %147 : vector<8x1xf32>
    %149 = vector.broadcast %140 : vector<8x1xf32> to vector<8x16xf32>
    %150 = arith.mulf %149, %106 : vector<8x16xf32>
    %151 = arith.truncf %144 : vector<8x8xf32> to vector<8x8xbf16>
    %cst_56 = arith.constant dense<0.000000e+00> : vector<8x16xf32>
    %152 = tpu.matmul %151, %115, %cst_56 {dimension_numbers = #tpu.dot_dimension_numbers<[1], [0], [0], [1], [0, 0, 1, 1], [], []>} : vector<8x8xbf16>, vector<8x16xbf16>, vector<8x16xf32> -> vector<8x16xf32>
    %153 = arith.addf %150, %152 : vector<8x16xf32>
    %c1_i32_57 = arith.constant 1 : i32
    %154 = math.absf %148 : vector<8x1xf32>
    %cst_58 = arith.constant 0.000000e+00 : f32
    %155 = vector.broadcast %cst_58 : f32 to vector<8x1xf32>
    %156 = arith.subf %155, %138 : vector<8x1xf32>
    %157 = math.exp %156 : vector<8x1xf32>
    %158 = arith.maximumf %154, %157 : vector<8x1xf32>
    %cst_59 = arith.constant 9.99999997E-7 : f32
    %159 = vector.broadcast %cst_59 : f32 to vector<8x1xf32>
    %160 = arith.addf %158, %159 : vector<8x1xf32>
    %cst_60 = arith.constant 1.000000e+00 : f32
    %161 = vector.broadcast %cst_60 : f32 to vector<8x1xf32>
    %162 = arith.divf %161, %160 : vector<8x1xf32>
    %163 = vector.broadcast %162 : vector<8x1xf32> to vector<8x16xf32>
    %164 = arith.mulf %153, %163 : vector<8x16xf32>
    %cst_61 = arith.constant dense<0.000000e+00> : vector<8xf32>
    %165 = vector.multi_reduction <add>, %164, %cst_61 [1] : vector<8x16xf32> to vector<8xf32>
    %166 = vector.shape_cast %165 : vector<8xf32> to vector<8x1xf32>
    %cst_62 = arith.constant 1.600000e+01 : f32
    %167 = vector.broadcast %cst_62 : f32 to vector<8x1xf32>
    %168 = arith.divf %166, %167 : vector<8x1xf32>
    %169 = vector.broadcast %168 : vector<8x1xf32> to vector<8x16xf32>
    %170 = arith.subf %164, %169 : vector<8x16xf32>
    %171 = arith.mulf %170, %170 : vector<8x16xf32>
    %cst_63 = arith.constant dense<0.000000e+00> : vector<8xf32>
    %172 = vector.multi_reduction <add>, %171, %cst_63 [1] : vector<8x16xf32> to vector<8xf32>
    %173 = vector.shape_cast %172 : vector<8xf32> to vector<8x1xf32>
    %cst_64 = arith.constant 1.600000e+01 : f32
    %174 = vector.broadcast %cst_64 : f32 to vector<8x1xf32>
    %175 = arith.divf %173, %174 : vector<8x1xf32>
    %176 = vector.broadcast %168 : vector<8x1xf32> to vector<8x16xf32>
    %177 = arith.subf %164, %176 : vector<8x16xf32>
    %cst_65 = arith.constant 9.99999974E-6 : f32
    %178 = vector.broadcast %cst_65 : f32 to vector<8x1xf32>
    %179 = arith.addf %175, %178 : vector<8x1xf32>
    %180 = math.rsqrt %179 : vector<8x1xf32>
    %181 = vector.broadcast %180 : vector<8x1xf32> to vector<8x16xf32>
    %182 = arith.mulf %177, %181 : vector<8x16xf32>
    %c0_66 = arith.constant 0 : index
    %c0_67 = arith.constant 0 : index
    %183 = vector.load %arg18[%c0_66, %c0_67] : memref<8x64xf32, #tpu.memory_space<vmem>>, vector<8x16xf32>
    tpu.vector_store %arg18[%c0_66, %c0_67], %182 {strides = array<i32>} : memref<8x64xf32, #tpu.memory_space<vmem>>, vector<8x16xf32>,
    %c0_68 = arith.constant 0 : index
    %c16 = arith.constant 16 : index
    %184 = vector.load %arg16[%c0_68, %c16] : memref<8x136xf32, #tpu.memory_space<vmem>>, vector<8x16xf32>
    %cst_69 = arith.constant 2.500000e-01 : f32
    %185 = vector.broadcast %cst_69 : f32 to vector<8x16xf32>
    %186 = arith.mulf %184, %185 : vector<8x16xf32>
    %187 = arith.truncf %186 : vector<8x16xf32> to vector<8x16xbf16>
    %188 = vector.extract_strided_slice %90 {offsets = [0, 1], sizes = [8, 1], strides = [1, 1]} : vector<8x4xf32> to vector<8x1xf32>
    %cst_70 = arith.constant -1.000000e+30 : f32
    %189 = vector.broadcast %cst_70 : f32 to vector<8x1xf32>
    %cst_71 = arith.constant 0.000000e+00 : f32
    %190 = vector.broadcast %cst_71 : f32 to vector<8x1xf32>
    %cst_72 = arith.constant 0.000000e+00 : f32
    %191 = vector.broadcast %cst_72 : f32 to vector<8x16xf32>
    %c0_i32_73 = arith.constant 0 : i32
    %c8_i32_74 = arith.constant 8 : i32
    %192 = arith.muli %c0_i32_73, %c8_i32_74 : i32
    %193 = tpu.assume_multiple %192, 8 : i32
    %194 = arith.index_cast %193 : i32 to index
    %c80 = arith.constant 80 : index
    %195 = vector.load %arg16[%194, %c80] : memref<8x136xf32, #tpu.memory_space<vmem>>, vector<8x16xf32>
    %196 = arith.truncf %195 : vector<8x16xf32> to vector<8x16xbf16>
    %c0_75 = arith.constant 0 : index
    %197 = arith.index_cast %193 : i32 to index
    %c16_76 = arith.constant 16 : index
    %198 = vector.load %arg3[%c0_75, %197, %c16_76] : memref<1x8x64xf32, #tpu.memory_space<vmem>>, vector<1x8x16xf32>
    %199 = vector.shape_cast %198 : vector<1x8x16xf32> to vector<8x16xf32>
    %200 = arith.truncf %199 : vector<8x16xf32> to vector<8x16xbf16>
    %201 = arith.index_cast %c0_i32_73 : i32 to index
    %c1 = arith.constant 1 : index
    %c0_77 = arith.constant 0 : index
    %202 = vector.load %arg17[%201, %c1, %c0_77] : memref<1x8x8xf32, #tpu.memory_space<vmem>>, vector<1x1x8xf32>
    %203 = vector.shape_cast %202 : vector<1x1x8xf32> to vector<1x8xf32>
    %204 = arith.index_cast %c0_i32_73 : i32 to index
    %c5 = arith.constant 5 : index
    %c0_78 = arith.constant 0 : index
    %205 = vector.load %arg17[%204, %c5, %c0_78] : memref<1x8x8xf32, #tpu.memory_space<vmem>>, vector<1x1x8xf32>
    %206 = vector.shape_cast %205 : vector<1x1x8xf32> to vector<1x8xf32>
    %cst_79 = arith.constant dense<0.000000e+00> : vector<8x8xf32>
    %207 = tpu.matmul %187, %196, %cst_79 {dimension_numbers = #tpu.dot_dimension_numbers<[1], [1], [0], [0], [0, 0, 1, 0], [], []>} : vector<8x16xbf16>, vector<8x16xbf16>, vector<8x8xf32> -> vector<8x8xf32>
    %208 = tpu.iota {dimensions = array<i32: 1>} : vector<1x8xi32>
    %209 = vector.broadcast %193 : i32 to vector<1x8xi32>
    %210 = arith.addi %209, %208 : vector<1x8xi32>
    %211 = vector.broadcast %0 : vector<8x1xi32> to vector<8x8xi32>
    %212 = vector.broadcast %210 : vector<1x8xi32> to vector<8x8xi32>
    %213 = arith.cmpi sge, %211, %212 : vector<8x8xi32>
    %214 = vector.broadcast %188 : vector<8x1xf32> to vector<8x8xf32>
    %215 = vector.broadcast %203 : vector<1x8xf32> to vector<8x8xf32>
    %216 = arith.subf %214, %215 : vector<8x8xf32>
    %217 = vector.broadcast %206 : vector<1x8xf32> to vector<8x8xf32>
    %218 = arith.addf %216, %217 : vector<8x8xf32>
    %cst_80 = arith.constant -1.000000e+30 : f32
    %219 = vector.broadcast %cst_80 : f32 to vector<8x8xf32>
    %220 = arith.select %213, %218, %219 : vector<8x8xi1>, vector<8x8xf32>
    %cst_81 = arith.constant dense<0xFF800000> : vector<8xf32>
    %221 = vector.multi_reduction <maximumf>, %220, %cst_81 [1] : vector<8x8xf32> to vector<8xf32>
    %222 = vector.shape_cast %221 : vector<8xf32> to vector<8x1xf32>
    %223 = arith.maximumf %189, %222 : vector<8x1xf32>
    %224 = arith.subf %189, %223 : vector<8x1xf32>
    %225 = math.exp %224 : vector<8x1xf32>
    %226 = vector.broadcast %223 : vector<8x1xf32> to vector<8x8xf32>
    %227 = arith.subf %220, %226 : vector<8x8xf32>
    %228 = math.exp %227 : vector<8x8xf32>
    %229 = arith.mulf %207, %228 : vector<8x8xf32>
    %230 = arith.mulf %225, %190 : vector<8x1xf32>
    %cst_82 = arith.constant dense<0.000000e+00> : vector<8xf32>
    %231 = vector.multi_reduction <add>, %229, %cst_82 [1] : vector<8x8xf32> to vector<8xf32>
    %232 = vector.shape_cast %231 : vector<8xf32> to vector<8x1xf32>
    %233 = arith.addf %230, %232 : vector<8x1xf32>
    %234 = vector.broadcast %225 : vector<8x1xf32> to vector<8x16xf32>
    %235 = arith.mulf %234, %191 : vector<8x16xf32>
    %236 = arith.truncf %229 : vector<8x8xf32> to vector<8x8xbf16>
    %cst_83 = arith.constant dense<0.000000e+00> : vector<8x16xf32>
    %237 = tpu.matmul %236, %200, %cst_83 {dimension_numbers = #tpu.dot_dimension_numbers<[1], [0], [0], [1], [0, 0, 1, 1], [], []>} : vector<8x8xbf16>, vector<8x16xbf16>, vector<8x16xf32> -> vector<8x16xf32>
    %238 = arith.addf %235, %237 : vector<8x16xf32>
    %c1_i32_84 = arith.constant 1 : i32
    %239 = math.absf %233 : vector<8x1xf32>
    %cst_85 = arith.constant 0.000000e+00 : f32
    %240 = vector.broadcast %cst_85 : f32 to vector<8x1xf32>
    %241 = arith.subf %240, %223 : vector<8x1xf32>
    %242 = math.exp %241 : vector<8x1xf32>
    %243 = arith.maximumf %239, %242 : vector<8x1xf32>
    %cst_86 = arith.constant 9.99999997E-7 : f32
    %244 = vector.broadcast %cst_86 : f32 to vector<8x1xf32>
    %245 = arith.addf %243, %244 : vector<8x1xf32>
    %cst_87 = arith.constant 1.000000e+00 : f32
    %246 = vector.broadcast %cst_87 : f32 to vector<8x1xf32>
    %247 = arith.divf %246, %245 : vector<8x1xf32>
    %248 = vector.broadcast %247 : vector<8x1xf32> to vector<8x16xf32>
    %249 = arith.mulf %238, %248 : vector<8x16xf32>
    %cst_88 = arith.constant dense<0.000000e+00> : vector<8xf32>
    %250 = vector.multi_reduction <add>, %249, %cst_88 [1] : vector<8x16xf32> to vector<8xf32>
    %251 = vector.shape_cast %250 : vector<8xf32> to vector<8x1xf32>
    %cst_89 = arith.constant 1.600000e+01 : f32
    %252 = vector.broadcast %cst_89 : f32 to vector<8x1xf32>
    %253 = arith.divf %251, %252 : vector<8x1xf32>
    %254 = vector.broadcast %253 : vector<8x1xf32> to vector<8x16xf32>
    %255 = arith.subf %249, %254 : vector<8x16xf32>
    %256 = arith.mulf %255, %255 : vector<8x16xf32>
    %cst_90 = arith.constant dense<0.000000e+00> : vector<8xf32>
    %257 = vector.multi_reduction <add>, %256, %cst_90 [1] : vector<8x16xf32> to vector<8xf32>
    %258 = vector.shape_cast %257 : vector<8xf32> to vector<8x1xf32>
    %cst_91 = arith.constant 1.600000e+01 : f32
    %259 = vector.broadcast %cst_91 : f32 to vector<8x1xf32>
    %260 = arith.divf %258, %259 : vector<8x1xf32>
    %261 = vector.broadcast %253 : vector<8x1xf32> to vector<8x16xf32>
    %262 = arith.subf %249, %261 : vector<8x16xf32>
    %cst_92 = arith.constant 9.99999974E-6 : f32
    %263 = vector.broadcast %cst_92 : f32 to vector<8x1xf32>
    %264 = arith.addf %260, %263 : vector<8x1xf32>
    %265 = math.rsqrt %264 : vector<8x1xf32>
    %266 = vector.broadcast %265 : vector<8x1xf32> to vector<8x16xf32>
    %267 = arith.mulf %262, %266 : vector<8x16xf32>
    %c0_93 = arith.constant 0 : index
    %c16_94 = arith.constant 16 : index
    %268 = vector.load %arg18[%c0_93, %c16_94] : memref<8x64xf32, #tpu.memory_space<vmem>>, vector<8x16xf32>
    tpu.vector_store %arg18[%c0_93, %c16_94], %267 {strides = array<i32>} : memref<8x64xf32, #tpu.memory_space<vmem>>, vector<8x16xf32>,
    %c0_95 = arith.constant 0 : index
    %c32 = arith.constant 32 : index
    %269 = vector.load %arg16[%c0_95, %c32] : memref<8x136xf32, #tpu.memory_space<vmem>>, vector<8x16xf32>
    %cst_96 = arith.constant 2.500000e-01 : f32
    %270 = vector.broadcast %cst_96 : f32 to vector<8x16xf32>
    %271 = arith.mulf %269, %270 : vector<8x16xf32>
    %272 = arith.truncf %271 : vector<8x16xf32> to vector<8x16xbf16>
    %273 = vector.extract_strided_slice %90 {offsets = [0, 2], sizes = [8, 1], strides = [1, 1]} : vector<8x4xf32> to vector<8x1xf32>
    %cst_97 = arith.constant -1.000000e+30 : f32
    %274 = vector.broadcast %cst_97 : f32 to vector<8x1xf32>
    %cst_98 = arith.constant 0.000000e+00 : f32
    %275 = vector.broadcast %cst_98 : f32 to vector<8x1xf32>
    %cst_99 = arith.constant 0.000000e+00 : f32
    %276 = vector.broadcast %cst_99 : f32 to vector<8x16xf32>
    %c0_i32_100 = arith.constant 0 : i32
    %c8_i32_101 = arith.constant 8 : i32
    %277 = arith.muli %c0_i32_100, %c8_i32_101 : i32
    %278 = tpu.assume_multiple %277, 8 : i32
    %279 = arith.index_cast %278 : i32 to index
    %c96 = arith.constant 96 : index
    %280 = vector.load %arg16[%279, %c96] : memref<8x136xf32, #tpu.memory_space<vmem>>, vector<8x16xf32>
    %281 = arith.truncf %280 : vector<8x16xf32> to vector<8x16xbf16>
    %c0_102 = arith.constant 0 : index
    %282 = arith.index_cast %278 : i32 to index
    %c32_103 = arith.constant 32 : index
    %283 = vector.load %arg3[%c0_102, %282, %c32_103] : memref<1x8x64xf32, #tpu.memory_space<vmem>>, vector<1x8x16xf32>
    %284 = vector.shape_cast %283 : vector<1x8x16xf32> to vector<8x16xf32>
    %285 = arith.truncf %284 : vector<8x16xf32> to vector<8x16xbf16>
    %286 = arith.index_cast %c0_i32_100 : i32 to index
    %c2 = arith.constant 2 : index
    %c0_104 = arith.constant 0 : index
    %287 = vector.load %arg17[%286, %c2, %c0_104] : memref<1x8x8xf32, #tpu.memory_space<vmem>>, vector<1x1x8xf32>
    %288 = vector.shape_cast %287 : vector<1x1x8xf32> to vector<1x8xf32>
    %289 = arith.index_cast %c0_i32_100 : i32 to index
    %c6 = arith.constant 6 : index
    %c0_105 = arith.constant 0 : index
    %290 = vector.load %arg17[%289, %c6, %c0_105] : memref<1x8x8xf32, #tpu.memory_space<vmem>>, vector<1x1x8xf32>
    %291 = vector.shape_cast %290 : vector<1x1x8xf32> to vector<1x8xf32>
    %cst_106 = arith.constant dense<0.000000e+00> : vector<8x8xf32>
    %292 = tpu.matmul %272, %281, %cst_106 {dimension_numbers = #tpu.dot_dimension_numbers<[1], [1], [0], [0], [0, 0, 1, 0], [], []>} : vector<8x16xbf16>, vector<8x16xbf16>, vector<8x8xf32> -> vector<8x8xf32>
    %293 = tpu.iota {dimensions = array<i32: 1>} : vector<1x8xi32>
    %294 = vector.broadcast %278 : i32 to vector<1x8xi32>
    %295 = arith.addi %294, %293 : vector<1x8xi32>
    %296 = vector.broadcast %0 : vector<8x1xi32> to vector<8x8xi32>
    %297 = vector.broadcast %295 : vector<1x8xi32> to vector<8x8xi32>
    %298 = arith.cmpi sge, %296, %297 : vector<8x8xi32>
    %299 = vector.broadcast %273 : vector<8x1xf32> to vector<8x8xf32>
    %300 = vector.broadcast %288 : vector<1x8xf32> to vector<8x8xf32>
    %301 = arith.subf %299, %300 : vector<8x8xf32>
    %302 = vector.broadcast %291 : vector<1x8xf32> to vector<8x8xf32>
    %303 = arith.addf %301, %302 : vector<8x8xf32>
    %cst_107 = arith.constant -1.000000e+30 : f32
    %304 = vector.broadcast %cst_107 : f32 to vector<8x8xf32>
    %305 = arith.select %298, %303, %304 : vector<8x8xi1>, vector<8x8xf32>
    %cst_108 = arith.constant dense<0xFF800000> : vector<8xf32>
    %306 = vector.multi_reduction <maximumf>, %305, %cst_108 [1] : vector<8x8xf32> to vector<8xf32>
    %307 = vector.shape_cast %306 : vector<8xf32> to vector<8x1xf32>
    %308 = arith.maximumf %274, %307 : vector<8x1xf32>
    %309 = arith.subf %274, %308 : vector<8x1xf32>
    %310 = math.exp %309 : vector<8x1xf32>
    %311 = vector.broadcast %308 : vector<8x1xf32> to vector<8x8xf32>
    %312 = arith.subf %305, %311 : vector<8x8xf32>
    %313 = math.exp %312 : vector<8x8xf32>
    %314 = arith.mulf %292, %313 : vector<8x8xf32>
    %315 = arith.mulf %310, %275 : vector<8x1xf32>
    %cst_109 = arith.constant dense<0.000000e+00> : vector<8xf32>
    %316 = vector.multi_reduction <add>, %314, %cst_109 [1] : vector<8x8xf32> to vector<8xf32>
    %317 = vector.shape_cast %316 : vector<8xf32> to vector<8x1xf32>
    %318 = arith.addf %315, %317 : vector<8x1xf32>
    %319 = vector.broadcast %310 : vector<8x1xf32> to vector<8x16xf32>
    %320 = arith.mulf %319, %276 : vector<8x16xf32>
    %321 = arith.truncf %314 : vector<8x8xf32> to vector<8x8xbf16>
    %cst_110 = arith.constant dense<0.000000e+00> : vector<8x16xf32>
    %322 = tpu.matmul %321, %285, %cst_110 {dimension_numbers = #tpu.dot_dimension_numbers<[1], [0], [0], [1], [0, 0, 1, 1], [], []>} : vector<8x8xbf16>, vector<8x16xbf16>, vector<8x16xf32> -> vector<8x16xf32>
    %323 = arith.addf %320, %322 : vector<8x16xf32>
    %c1_i32_111 = arith.constant 1 : i32
    %324 = math.absf %318 : vector<8x1xf32>
    %cst_112 = arith.constant 0.000000e+00 : f32
    %325 = vector.broadcast %cst_112 : f32 to vector<8x1xf32>
    %326 = arith.subf %325, %308 : vector<8x1xf32>
    %327 = math.exp %326 : vector<8x1xf32>
    %328 = arith.maximumf %324, %327 : vector<8x1xf32>
    %cst_113 = arith.constant 9.99999997E-7 : f32
    %329 = vector.broadcast %cst_113 : f32 to vector<8x1xf32>
    %330 = arith.addf %328, %329 : vector<8x1xf32>
    %cst_114 = arith.constant 1.000000e+00 : f32
    %331 = vector.broadcast %cst_114 : f32 to vector<8x1xf32>
    %332 = arith.divf %331, %330 : vector<8x1xf32>
    %333 = vector.broadcast %332 : vector<8x1xf32> to vector<8x16xf32>
    %334 = arith.mulf %323, %333 : vector<8x16xf32>
    %cst_115 = arith.constant dense<0.000000e+00> : vector<8xf32>
    %335 = vector.multi_reduction <add>, %334, %cst_115 [1] : vector<8x16xf32> to vector<8xf32>
    %336 = vector.shape_cast %335 : vector<8xf32> to vector<8x1xf32>
    %cst_116 = arith.constant 1.600000e+01 : f32
    %337 = vector.broadcast %cst_116 : f32 to vector<8x1xf32>
    %338 = arith.divf %336, %337 : vector<8x1xf32>
    %339 = vector.broadcast %338 : vector<8x1xf32> to vector<8x16xf32>
    %340 = arith.subf %334, %339 : vector<8x16xf32>
    %341 = arith.mulf %340, %340 : vector<8x16xf32>
    %cst_117 = arith.constant dense<0.000000e+00> : vector<8xf32>
    %342 = vector.multi_reduction <add>, %341, %cst_117 [1] : vector<8x16xf32> to vector<8xf32>
    %343 = vector.shape_cast %342 : vector<8xf32> to vector<8x1xf32>
    %cst_118 = arith.constant 1.600000e+01 : f32
    %344 = vector.broadcast %cst_118 : f32 to vector<8x1xf32>
    %345 = arith.divf %343, %344 : vector<8x1xf32>
    %346 = vector.broadcast %338 : vector<8x1xf32> to vector<8x16xf32>
    %347 = arith.subf %334, %346 : vector<8x16xf32>
    %cst_119 = arith.constant 9.99999974E-6 : f32
    %348 = vector.broadcast %cst_119 : f32 to vector<8x1xf32>
    %349 = arith.addf %345, %348 : vector<8x1xf32>
    %350 = math.rsqrt %349 : vector<8x1xf32>
    %351 = vector.broadcast %350 : vector<8x1xf32> to vector<8x16xf32>
    %352 = arith.mulf %347, %351 : vector<8x16xf32>
    %c0_120 = arith.constant 0 : index
    %c32_121 = arith.constant 32 : index
    %353 = vector.load %arg18[%c0_120, %c32_121] : memref<8x64xf32, #tpu.memory_space<vmem>>, vector<8x16xf32>
    tpu.vector_store %arg18[%c0_120, %c32_121], %352 {strides = array<i32>} : memref<8x64xf32, #tpu.memory_space<vmem>>, vector<8x16xf32>,
    %c0_122 = arith.constant 0 : index
    %c48 = arith.constant 48 : index
    %354 = vector.load %arg16[%c0_122, %c48] : memref<8x136xf32, #tpu.memory_space<vmem>>, vector<8x16xf32>
    %cst_123 = arith.constant 2.500000e-01 : f32
    %355 = vector.broadcast %cst_123 : f32 to vector<8x16xf32>
    %356 = arith.mulf %354, %355 : vector<8x16xf32>
    %357 = arith.truncf %356 : vector<8x16xf32> to vector<8x16xbf16>
    %358 = vector.extract_strided_slice %90 {offsets = [0, 3], sizes = [8, 1], strides = [1, 1]} : vector<8x4xf32> to vector<8x1xf32>
    %cst_124 = arith.constant -1.000000e+30 : f32
    %359 = vector.broadcast %cst_124 : f32 to vector<8x1xf32>
    %cst_125 = arith.constant 0.000000e+00 : f32
    %360 = vector.broadcast %cst_125 : f32 to vector<8x1xf32>
    %cst_126 = arith.constant 0.000000e+00 : f32
    %361 = vector.broadcast %cst_126 : f32 to vector<8x16xf32>
    %c0_i32_127 = arith.constant 0 : i32
    %c8_i32_128 = arith.constant 8 : i32
    %362 = arith.muli %c0_i32_127, %c8_i32_128 : i32
    %363 = tpu.assume_multiple %362, 8 : i32
    %364 = arith.index_cast %363 : i32 to index
    %c112 = arith.constant 112 : index
    %365 = vector.load %arg16[%364, %c112] : memref<8x136xf32, #tpu.memory_space<vmem>>, vector<8x16xf32>
    %366 = arith.truncf %365 : vector<8x16xf32> to vector<8x16xbf16>
    %c0_129 = arith.constant 0 : index
    %367 = arith.index_cast %363 : i32 to index
    %c48_130 = arith.constant 48 : index
    %368 = vector.load %arg3[%c0_129, %367, %c48_130] : memref<1x8x64xf32, #tpu.memory_space<vmem>>, vector<1x8x16xf32>
    %369 = vector.shape_cast %368 : vector<1x8x16xf32> to vector<8x16xf32>
    %370 = arith.truncf %369 : vector<8x16xf32> to vector<8x16xbf16>
    %371 = arith.index_cast %c0_i32_127 : i32 to index
    %c3 = arith.constant 3 : index
    %c0_131 = arith.constant 0 : index
    %372 = vector.load %arg17[%371, %c3, %c0_131] : memref<1x8x8xf32, #tpu.memory_space<vmem>>, vector<1x1x8xf32>
    %373 = vector.shape_cast %372 : vector<1x1x8xf32> to vector<1x8xf32>
    %374 = arith.index_cast %c0_i32_127 : i32 to index
    %c7 = arith.constant 7 : index
    %c0_132 = arith.constant 0 : index
    %375 = vector.load %arg17[%374, %c7, %c0_132] : memref<1x8x8xf32, #tpu.memory_space<vmem>>, vector<1x1x8xf32>
    %376 = vector.shape_cast %375 : vector<1x1x8xf32> to vector<1x8xf32>
    %cst_133 = arith.constant dense<0.000000e+00> : vector<8x8xf32>
    %377 = tpu.matmul %357, %366, %cst_133 {dimension_numbers = #tpu.dot_dimension_numbers<[1], [1], [0], [0], [0, 0, 1, 0], [], []>} : vector<8x16xbf16>, vector<8x16xbf16>, vector<8x8xf32> -> vector<8x8xf32>
    %378 = tpu.iota {dimensions = array<i32: 1>} : vector<1x8xi32>
    %379 = vector.broadcast %363 : i32 to vector<1x8xi32>
    %380 = arith.addi %379, %378 : vector<1x8xi32>
    %381 = vector.broadcast %0 : vector<8x1xi32> to vector<8x8xi32>
    %382 = vector.broadcast %380 : vector<1x8xi32> to vector<8x8xi32>
    %383 = arith.cmpi sge, %381, %382 : vector<8x8xi32>
    %384 = vector.broadcast %358 : vector<8x1xf32> to vector<8x8xf32>
    %385 = vector.broadcast %373 : vector<1x8xf32> to vector<8x8xf32>
    %386 = arith.subf %384, %385 : vector<8x8xf32>
    %387 = vector.broadcast %376 : vector<1x8xf32> to vector<8x8xf32>
    %388 = arith.addf %386, %387 : vector<8x8xf32>
    %cst_134 = arith.constant -1.000000e+30 : f32
    %389 = vector.broadcast %cst_134 : f32 to vector<8x8xf32>
    %390 = arith.select %383, %388, %389 : vector<8x8xi1>, vector<8x8xf32>
    %cst_135 = arith.constant dense<0xFF800000> : vector<8xf32>
    %391 = vector.multi_reduction <maximumf>, %390, %cst_135 [1] : vector<8x8xf32> to vector<8xf32>
    %392 = vector.shape_cast %391 : vector<8xf32> to vector<8x1xf32>
    %393 = arith.maximumf %359, %392 : vector<8x1xf32>
    %394 = arith.subf %359, %393 : vector<8x1xf32>
    %395 = math.exp %394 : vector<8x1xf32>
    %396 = vector.broadcast %393 : vector<8x1xf32> to vector<8x8xf32>
    %397 = arith.subf %390, %396 : vector<8x8xf32>
    %398 = math.exp %397 : vector<8x8xf32>
    %399 = arith.mulf %377, %398 : vector<8x8xf32>
    %400 = arith.mulf %395, %360 : vector<8x1xf32>
    %cst_136 = arith.constant dense<0.000000e+00> : vector<8xf32>
    %401 = vector.multi_reduction <add>, %399, %cst_136 [1] : vector<8x8xf32> to vector<8xf32>
    %402 = vector.shape_cast %401 : vector<8xf32> to vector<8x1xf32>
    %403 = arith.addf %400, %402 : vector<8x1xf32>
    %404 = vector.broadcast %395 : vector<8x1xf32> to vector<8x16xf32>
    %405 = arith.mulf %404, %361 : vector<8x16xf32>
    %406 = arith.truncf %399 : vector<8x8xf32> to vector<8x8xbf16>
    %cst_137 = arith.constant dense<0.000000e+00> : vector<8x16xf32>
    %407 = tpu.matmul %406, %370, %cst_137 {dimension_numbers = #tpu.dot_dimension_numbers<[1], [0], [0], [1], [0, 0, 1, 1], [], []>} : vector<8x8xbf16>, vector<8x16xbf16>, vector<8x16xf32> -> vector<8x16xf32>
    %408 = arith.addf %405, %407 : vector<8x16xf32>
    %c1_i32_138 = arith.constant 1 : i32
    %409 = math.absf %403 : vector<8x1xf32>
    %cst_139 = arith.constant 0.000000e+00 : f32
    %410 = vector.broadcast %cst_139 : f32 to vector<8x1xf32>
    %411 = arith.subf %410, %393 : vector<8x1xf32>
    %412 = math.exp %411 : vector<8x1xf32>
    %413 = arith.maximumf %409, %412 : vector<8x1xf32>
    %cst_140 = arith.constant 9.99999997E-7 : f32
    %414 = vector.broadcast %cst_140 : f32 to vector<8x1xf32>
    %415 = arith.addf %413, %414 : vector<8x1xf32>
    %cst_141 = arith.constant 1.000000e+00 : f32
    %416 = vector.broadcast %cst_141 : f32 to vector<8x1xf32>
    %417 = arith.divf %416, %415 : vector<8x1xf32>
    %418 = vector.broadcast %417 : vector<8x1xf32> to vector<8x16xf32>
    %419 = arith.mulf %408, %418 : vector<8x16xf32>
    %cst_142 = arith.constant dense<0.000000e+00> : vector<8xf32>
    %420 = vector.multi_reduction <add>, %419, %cst_142 [1] : vector<8x16xf32> to vector<8xf32>
    %421 = vector.shape_cast %420 : vector<8xf32> to vector<8x1xf32>
    %cst_143 = arith.constant 1.600000e+01 : f32
    %422 = vector.broadcast %cst_143 : f32 to vector<8x1xf32>
    %423 = arith.divf %421, %422 : vector<8x1xf32>
    %424 = vector.broadcast %423 : vector<8x1xf32> to vector<8x16xf32>
    %425 = arith.subf %419, %424 : vector<8x16xf32>
    %426 = arith.mulf %425, %425 : vector<8x16xf32>
    %cst_144 = arith.constant dense<0.000000e+00> : vector<8xf32>
    %427 = vector.multi_reduction <add>, %426, %cst_144 [1] : vector<8x16xf32> to vector<8xf32>
    %428 = vector.shape_cast %427 : vector<8xf32> to vector<8x1xf32>
    %cst_145 = arith.constant 1.600000e+01 : f32
    %429 = vector.broadcast %cst_145 : f32 to vector<8x1xf32>
    %430 = arith.divf %428, %429 : vector<8x1xf32>
    %431 = vector.broadcast %423 : vector<8x1xf32> to vector<8x16xf32>
    %432 = arith.subf %419, %431 : vector<8x16xf32>
    %cst_146 = arith.constant 9.99999974E-6 : f32
    %433 = vector.broadcast %cst_146 : f32 to vector<8x1xf32>
    %434 = arith.addf %430, %433 : vector<8x1xf32>
    %435 = math.rsqrt %434 : vector<8x1xf32>
    %436 = vector.broadcast %435 : vector<8x1xf32> to vector<8x16xf32>
    %437 = arith.mulf %432, %436 : vector<8x16xf32>
    %c0_147 = arith.constant 0 : index
    %c48_148 = arith.constant 48 : index
    %438 = vector.load %arg18[%c0_147, %c48_148] : memref<8x64xf32, #tpu.memory_space<vmem>>, vector<8x16xf32>
    tpu.vector_store %arg18[%c0_147, %c48_148], %437 {strides = array<i32>} : memref<8x64xf32, #tpu.memory_space<vmem>>, vector<8x16xf32>,
    %c0_149 = arith.constant 0 : index
    %c0_150 = arith.constant 0 : index
    %c0_151 = arith.constant 0 : index
    %439 = vector.load %arg2[%c0_149, %c0_150, %c0_151] : memref<1x8x64xf32, #tpu.memory_space<vmem>>, vector<1x8x64xf32>
    %440 = vector.shape_cast %439 : vector<1x8x64xf32> to vector<8x64xf32>
    %c0_152 = arith.constant 0 : index
    %c0_153 = arith.constant 0 : index
    %441 = vector.load %arg18[%c0_152, %c0_153] : memref<8x64xf32, #tpu.memory_space<vmem>>, vector<8x64xf32>
    %c0_154 = arith.constant 0 : index
    %c0_155 = arith.constant 0 : index
    %442 = vector.load %arg10[%c0_154, %c0_155] : memref<1x64xf32, #tpu.memory_space<vmem>>, vector<1x64xf32>
    %443 = vector.broadcast %442 : vector<1x64xf32> to vector<8x64xf32>
    %444 = arith.mulf %441, %443 : vector<8x64xf32>
    %c0_156 = arith.constant 0 : index
    %c0_157 = arith.constant 0 : index
    %445 = vector.load %arg11[%c0_156, %c0_157] : memref<1x64xf32, #tpu.memory_space<vmem>>, vector<1x64xf32>
    %c0_158 = arith.constant 0 : index
    %c0_159 = arith.constant 0 : index
    %446 = vector.load %arg15[%c0_158, %c0_159] : memref<8x64xf32, #tpu.memory_space<vmem>>, vector<8x64xf32>
    %447 = vector.broadcast %445 : vector<1x64xf32> to vector<8x64xf32>
    %448 = arith.mulf %447, %446 : vector<8x64xf32>
    %449 = arith.addf %444, %448 : vector<8x64xf32>
    %450 = arith.negf %440 : vector<8x64xf32>
    %451 = math.exp %450 : vector<8x64xf32>
    %cst_160 = arith.constant 1.000000e+00 : f32
    %452 = vector.broadcast %cst_160 : f32 to vector<8x64xf32>
    %453 = arith.addf %452, %451 : vector<8x64xf32>
    %454 = arith.divf %452, %453 : vector<8x64xf32>
    %455 = arith.mulf %440, %454 : vector<8x64xf32>
    %456 = arith.mulf %449, %455 : vector<8x64xf32>
    %c0_161 = arith.constant 0 : index
    %c0_162 = arith.constant 0 : index
    %457 = vector.load %arg12[%c0_161, %c0_162] : memref<64x32xf32, #tpu.memory_space<vmem>>, vector<64x32xf32>
    %cst_163 = arith.constant dense<0.000000e+00> : vector<8x32xf32>
    %458 = tpu.matmul %456, %457, %cst_163 {dimension_numbers = #tpu.dot_dimension_numbers<[1], [0], [0], [1], [0, 0, 1, 1], [], []>} : vector<8x64xf32>, vector<64x32xf32>, vector<8x32xf32> -> vector<8x32xf32>
    %c0_164 = arith.constant 0 : index
    %c0_165 = arith.constant 0 : index
    %459 = vector.load %arg13[%c0_164, %c0_165] : memref<1x32xf32, #tpu.memory_space<vmem>>, vector<1x32xf32>
    %460 = vector.broadcast %459 : vector<1x32xf32> to vector<8x32xf32>
    %461 = arith.addf %458, %460 : vector<8x32xf32>
    %c0_166 = arith.constant 0 : index
    %c0_167 = arith.constant 0 : index
    %c0_168 = arith.constant 0 : index
    %462 = vector.load %arg5[%c0_166, %c0_167, %c0_168] : memref<1x8x32xf32, #tpu.memory_space<vmem>>, vector<1x8x32xf32>
    %463 = vector.shape_cast %462 : vector<1x8x32xf32> to vector<8x32xf32>
    %464 = arith.addf %463, %461 : vector<8x32xf32>
    %c0_169 = arith.constant 0 : index
    %c0_170 = arith.constant 0 : index
    %c0_171 = arith.constant 0 : index
    %465 = vector.load %arg14[%c0_169, %c0_170, %c0_171] : memref<1x8x32xf32, #tpu.memory_space<vmem>>, vector<1x8x32xf32>
    %466 = vector.shape_cast %465 : vector<1x8x32xf32> to vector<8x32xf32>
    %467 = vector.shape_cast %464 : vector<8x32xf32> to vector<1x8x32xf32>
    tpu.vector_store %arg14[%c0_169, %c0_170, %c0_171], %467 {strides = array<i32>} : memref<1x8x32xf32, #tpu.memory_space<vmem>>, vector<1x8x32xf32>,
    return
  }
  func.func @transform_0(%arg0: i32) -> (i32, i32, i32) {
    %c0_i32 = arith.constant 0 : i32
    %c0_i32_0 = arith.constant 0 : i32
    %c0_i32_1 = arith.constant 0 : i32
    return %arg0, %c0_i32, %c0_i32_0 : i32, i32, i32
  }
  func.func @transform_1(%arg0: i32) -> (i32, i32, i32) {
    %c0_i32 = arith.constant 0 : i32
    %c0_i32_0 = arith.constant 0 : i32
    %c0_i32_1 = arith.constant 0 : i32
    return %arg0, %c0_i32, %c0_i32_0 : i32, i32, i32
  }
  func.func @transform_2(%arg0: i32) -> (i32, i32, i32) {
    %c0_i32 = arith.constant 0 : i32
    %c0_i32_0 = arith.constant 0 : i32
    %c0_i32_1 = arith.constant 0 : i32
    return %arg0, %c0_i32, %c0_i32_0 : i32, i32, i32
  }
  func.func @transform_3(%arg0: i32) -> (i32, i32, i32) {
    %c0_i32 = arith.constant 0 : i32
    %c0_i32_0 = arith.constant 0 : i32
    %c0_i32_1 = arith.constant 0 : i32
    return %arg0, %c0_i32, %c0_i32_0 : i32, i32, i32
  }
  func.func @transform_4(%arg0: i32) -> (i32, i32, i32) {
    %c0_i32 = arith.constant 0 : i32
    %c0_i32_0 = arith.constant 0 : i32
    %c0_i32_1 = arith.constant 0 : i32
    return %arg0, %c0_i32, %c0_i32_0 : i32, i32, i32
  }
  func.func @transform_5(%arg0: i32) -> (i32, i32) {
    %c0_i32 = arith.constant 0 : i32
    %c0_i32_0 = arith.constant 0 : i32
    %c0_i32_1 = arith.constant 0 : i32
    return %c0_i32, %c0_i32_0 : i32, i32
  }
  func.func @transform_6(%arg0: i32) -> (i32, i32) {
    %c0_i32 = arith.constant 0 : i32
    %c0_i32_0 = arith.constant 0 : i32
    %c0_i32_1 = arith.constant 0 : i32
    return %c0_i32, %c0_i32_0 : i32, i32
  }
  func.func @transform_7(%arg0: i32) -> (i32, i32) {
    %c0_i32 = arith.constant 0 : i32
    %c0_i32_0 = arith.constant 0 : i32
    %c0_i32_1 = arith.constant 0 : i32
    return %c0_i32, %c0_i32_0 : i32, i32
  }
  func.func @transform_8(%arg0: i32) -> (i32, i32) {
    %c0_i32 = arith.constant 0 : i32
    %c0_i32_0 = arith.constant 0 : i32
    %c0_i32_1 = arith.constant 0 : i32
    return %c0_i32, %c0_i32_0 : i32, i32
  }
  func.func @transform_9(%arg0: i32) -> (i32, i32) {
    %c0_i32 = arith.constant 0 : i32
    %c0_i32_0 = arith.constant 0 : i32
    %c0_i32_1 = arith.constant 0 : i32
    return %c0_i32, %c0_i32_0 : i32, i32
  }
  func.func @transform_10(%arg0: i32) -> (i32, i32) {
    %c0_i32 = arith.constant 0 : i32
    %c0_i32_0 = arith.constant 0 : i32
    %c0_i32_1 = arith.constant 0 : i32
    return %c0_i32, %c0_i32_0 : i32, i32
  }
  func.func @transform_11(%arg0: i32) -> (i32, i32) {
    %c0_i32 = arith.constant 0 : i32
    %c0_i32_0 = arith.constant 0 : i32
    %c0_i32_1 = arith.constant 0 : i32
    return %c0_i32, %c0_i32_0 : i32, i32
  }
  func.func @transform_12(%arg0: i32) -> (i32, i32) {
    %c0_i32 = arith.constant 0 : i32
    %c0_i32_0 = arith.constant 0 : i32
    %c0_i32_1 = arith.constant 0 : i32
    return %c0_i32, %c0_i32_0 : i32, i32
  }
  func.func @transform_13(%arg0: i32) -> (i32, i32, i32) {
    %c0_i32 = arith.constant 0 : i32
    %c0_i32_0 = arith.constant 0 : i32
    %c0_i32_1 = arith.constant 0 : i32
    return %arg0, %c0_i32, %c0_i32_0 : i32, i32, i32
  }
}

module attributes {stable_mosaic.version = 11 : i64} {
  func.func @_layernorm_kernel(%arg0: i32, %arg1: memref<16x32xf32, #tpu.memory_space<vmem>>, %arg2: memref<1x32xf32, #tpu.memory_space<vmem>>, %arg3: memref<1x32xf32, #tpu.memory_space<vmem>>, %arg4: memref<16x32xf32, #tpu.memory_space<vmem>>) attributes {dimension_semantics = [#tpu.dimension_semantics<parallel>], iteration_bounds = array<i64: 1>, scalar_prefetch = 0 : i64, scratch_operands = 0 : i64, tpu.core_type = #tpu.core_type<tc>, window_params = [{transform_indices = @transform_0, window_bounds = array<i64: 16, 32>}, {pipeline_mode = #tpu.pipeline_mode<synchronous>, transform_indices = @transform_1, window_bounds = array<i64: 1, 32>}, {pipeline_mode = #tpu.pipeline_mode<synchronous>, transform_indices = @transform_2, window_bounds = array<i64: 1, 32>}, {transform_indices = @transform_3, window_bounds = array<i64: 16, 32>}]} {
    %c0 = arith.constant 0 : index
    %c0_0 = arith.constant 0 : index
    %0 = vector.load %arg1[%c0, %c0_0] : memref<16x32xf32, #tpu.memory_space<vmem>>, vector<16x32xf32>
    %cst = arith.constant dense<0.000000e+00> : vector<16xf32>
    %1 = vector.multi_reduction <add>, %0, %cst [1] : vector<16x32xf32> to vector<16xf32>
    %2 = vector.shape_cast %1 : vector<16xf32> to vector<16x1xf32>
    %cst_1 = arith.constant 3.200000e+01 : f32
    %3 = vector.broadcast %cst_1 : f32 to vector<16x1xf32>
    %4 = arith.divf %2, %3 : vector<16x1xf32>
    %5 = vector.broadcast %4 : vector<16x1xf32> to vector<16x32xf32>
    %6 = arith.subf %0, %5 : vector<16x32xf32>
    %7 = arith.mulf %6, %6 : vector<16x32xf32>
    %cst_2 = arith.constant dense<0.000000e+00> : vector<16xf32>
    %8 = vector.multi_reduction <add>, %7, %cst_2 [1] : vector<16x32xf32> to vector<16xf32>
    %9 = vector.shape_cast %8 : vector<16xf32> to vector<16x1xf32>
    %cst_3 = arith.constant 3.200000e+01 : f32
    %10 = vector.broadcast %cst_3 : f32 to vector<16x1xf32>
    %11 = arith.divf %9, %10 : vector<16x1xf32>
    %12 = vector.broadcast %4 : vector<16x1xf32> to vector<16x32xf32>
    %13 = arith.subf %0, %12 : vector<16x32xf32>
    %cst_4 = arith.constant 9.99999974E-6 : f32
    %14 = vector.broadcast %cst_4 : f32 to vector<16x1xf32>
    %15 = arith.addf %11, %14 : vector<16x1xf32>
    %16 = math.rsqrt %15 : vector<16x1xf32>
    %17 = vector.broadcast %16 : vector<16x1xf32> to vector<16x32xf32>
    %18 = arith.mulf %13, %17 : vector<16x32xf32>
    %c0_5 = arith.constant 0 : index
    %c0_6 = arith.constant 0 : index
    %19 = vector.load %arg2[%c0_5, %c0_6] : memref<1x32xf32, #tpu.memory_space<vmem>>, vector<1x32xf32>
    %20 = vector.broadcast %19 : vector<1x32xf32> to vector<16x32xf32>
    %21 = arith.mulf %18, %20 : vector<16x32xf32>
    %c0_7 = arith.constant 0 : index
    %c0_8 = arith.constant 0 : index
    %22 = vector.load %arg3[%c0_7, %c0_8] : memref<1x32xf32, #tpu.memory_space<vmem>>, vector<1x32xf32>
    %23 = vector.broadcast %22 : vector<1x32xf32> to vector<16x32xf32>
    %24 = arith.addf %21, %23 : vector<16x32xf32>
    %c0_9 = arith.constant 0 : index
    %c0_10 = arith.constant 0 : index
    %25 = vector.load %arg4[%c0_9, %c0_10] : memref<16x32xf32, #tpu.memory_space<vmem>>, vector<16x32xf32>
    tpu.vector_store %arg4[%c0_9, %c0_10], %24 {strides = array<i32>} : memref<16x32xf32, #tpu.memory_space<vmem>>, vector<16x32xf32>,
    return
  }
  func.func @transform_0(%arg0: i32) -> (i32, i32) {
    %c0_i32 = arith.constant 0 : i32
    %c0_i32_0 = arith.constant 0 : i32
    return %arg0, %c0_i32 : i32, i32
  }
  func.func @transform_1(%arg0: i32) -> (i32, i32) {
    %c0_i32 = arith.constant 0 : i32
    %c0_i32_0 = arith.constant 0 : i32
    %c0_i32_1 = arith.constant 0 : i32
    return %c0_i32, %c0_i32_0 : i32, i32
  }
  func.func @transform_2(%arg0: i32) -> (i32, i32) {
    %c0_i32 = arith.constant 0 : i32
    %c0_i32_0 = arith.constant 0 : i32
    %c0_i32_1 = arith.constant 0 : i32
    return %c0_i32, %c0_i32_0 : i32, i32
  }
  func.func @transform_3(%arg0: i32) -> (i32, i32) {
    %c0_i32 = arith.constant 0 : i32
    %c0_i32_0 = arith.constant 0 : i32
    return %arg0, %c0_i32 : i32, i32
  }
}

</mosaic_0001>

<bundles_post_ra>
// kernel: _lambda_.6
= control target key start
LH: loop header
LB: loop body
LE: loop exit
PB: predicated region body
PF: predicated region fallthrough
CT: control target
= control target key end

     0   :  { %9 = vsyncpa [#allocation3], 0  ;;  %s295_s0 = inlined_call_operand.hbm [shape: f32[16,16], index: 0, kind: input, shape index: {}]   ;;  %s296_s1 = inlined_call_operand.hbm [shape: f32[16,32], index: 1, kind: input, shape index: {}]   ;;  %s297_s2 = inlined_call_operand.vmem [shape: f32[1,32], index: 2, kind: input, shape index: {}]   ;;  %s298_s3 = inlined_call_operand.hbm [shape: f32[16,32], index: 3, kind: input, shape index: {}]   ;;  %s299_s4 = inlined_call_operand.vmem [shape: f32[16,32], index: 4, kind: output, shape index: {}]  }
   0x1   :  { %10 = vsyncpa [#allocation5], 0  ;;  %s247_s15 = smov [#allocation4]   ;;  %s248_s17 = smov [#allocation2]  }
   0x2   :  { %s28_s16 = sshll.u32 %s247_s15, 4  ;;  %s16_s18 = sshll.u32 %s248_s17, 4  ;;  %s29_s16 = int_to_ptr.vmem [resolvable:$true] %s28_s16  ;;  %s17_s18 = int_to_ptr.vmem [resolvable:$true] %s16_s18 }
   0x3   :  { %s191_s19 = scalar_lea.vmem %s29_s16, 256  ;;  %p196_p1 = scmp.lt.s32.totalorder %s29_s16, %s29_s16 }
   0x4   :  { %p192_p0 = scmp.ne.s32.totalorder %s29_s16, %s191_s19  ;;  %p197_p2 = scmp.lt.s32.totalorder %s191_s19, %s191_s19 }
   0x6   :  { %p198_p3 = por %p197_p2, %p196_p1 }
   0x8   :  { %p199_p4 = pnand %p198_p3, %p192_p0 }
   0xa   :  { %202 = shalt.err (!%p199_p4)
}
   0xb   :  { %s249_s20 = smov 128   ;;  %s250_s21 = smov 8  }
   0xc   :  { %34 = dma.hbm_to_vmem [thread:$0]  %s296_s1, 256, %s29_s16, [#allocation5], %s249_s20, %s249_s20, %s250_s21  }
   0xd   :  { %s211_s24 = scalar_lea.vmem %s17_s18, 256  ;;  %p216_p6 = scmp.lt.s32.totalorder %s17_s18, %s17_s18 }
   0xe   :  { %p212_p5 = scmp.ne.s32.totalorder %s17_s18, %s211_s24  ;;  %p217_p7 = scmp.lt.s32.totalorder %s211_s24, %s211_s24 }
  0x10   :  { %p218_p8 = por %p217_p7, %p216_p6 }
  0x12   :  { %p219_p9 = pnand %p218_p8, %p212_p5 }
  0x14   :  { %222 = shalt.err (!%p219_p9)
}
  0x15   :  { %22 = dma.hbm_to_vmem [thread:$0]  %s295_s0, 256, %s17_s18, [#allocation3], %s249_s20, %s249_s20, %s250_s21  }
  0x16   :  { %s251_s27 = smov [#allocation6]  }
  0x17   :  { %s42_s28 = sshll.u32 %s251_s27, 4  ;;  %s43_s28 = int_to_ptr.vmem [resolvable:$true] %s42_s28 }
  0x18   :  { %s231_s29 = scalar_lea.vmem %s43_s28, 256  ;;  %p236_p11 = scmp.lt.s32.totalorder %s43_s28, %s43_s28 }
  0x19   :  { %p232_p10 = scmp.ne.s32.totalorder %s43_s28, %s231_s29  ;;  %p237_p12 = scmp.lt.s32.totalorder %s231_s29, %s231_s29 }
  0x1b   :  { %p238_p13 = por %p237_p12, %p236_p11 }
  0x1d   :  { %p239_p0 = pnand %p238_p13, %p232_p10 }
  0x1f   :  { %242 = shalt.err (!%p239_p0)
}
  0x20   :  { %48 = dma.hbm_to_vmem [thread:$0]  %s298_s3, 256, %s43_s28, [#allocation5], %s249_s20, %s249_s20, %s250_s21  }
  0x21   :  { %243 = dma.done.wait [#allocation3], 256  }
  0x22   :  { %244 = vsyncadd [#allocation3], 4294967040 }
  0x23   :  { %245 = dma.done.wait [#allocation5], 512  }
  0x24   :  { %246 = vsyncadd [#allocation5], 4294966784  ;;  %vm69_vm0 = vcmask 130048   ;;  %v61_v0 = vld [vmem:[#allocation4 + $0x8] sm:$0xff]  ;;  %v60_v1 = vld [vmem:[#allocation4] sm:$0xff]  ;;  %vm155_vm1 = vcmask 261120  }
  0x25   :  { %v58_v2 = vld [vmem:[#allocation2] sm:$0xff]  ;;  %171 = vmatprep.subr.mxu0 %v61_v0  ;;  %v59_v3 = vld [vmem:[#allocation2 + $0x8] sm:$0xff] }
  0x26   :  { %175 = vmatprep.mubr.msk.f32.mxu0 %vm69_vm0, %v58_v2  ;;  %172 = vmatpush3.msra.mxu0 %v61_v0  ;;  %v164_v4 = vld [vmem:[%s297_s2] ss:$0 sm:$0xff]  ;;  %v152_v6 = vld [vmem:[#allocation6 + $0x8] sm:$0xff] }
  0x27   :  { %173 = vmatprep.subr.mxu0 %v60_v1  ;;  %v151_v9 = vld [vmem:[#allocation6] sm:$0xff] }
  0x28   :  { %174 = vmatpush3.msra.mxu0 %v60_v1 }
  0x29   :  { %176 = vmatmul.mubr.msk.f32.vlgmr.msra.gmra.mxu0 %vm69_vm0, %v59_v3 }
  0xe9   :  { %v177_v5 = vpop.f32.mrf.mxu0 }
  0xea   :  { %v148_v7 = vadd.f32 %v177_v5, %v164_v4 }
  0xeb   :  { %v142_v8 = vpop.f32.mrf.mxu0 }
  0xec   :  { %v154_v10 = vadd.f32 %v152_v6, %v148_v7  ;;  %v143_v11 = vadd.f32 %v164_v4, %v142_v8 }
  0xee   :  { %157 = vst.msk [vmem:[%s299_s4 + $0x8] sm:$0xff] %vm155_vm1, %v154_v10  ;;  %v153_v12 = vadd.f32 %v151_v9, %v143_v11 }
  0xf0   :  { %156 = vst.msk [vmem:[%s299_s4] sm:$0xff] %vm155_vm1, %v153_v12 }
  0xf1   :  { %162 = vsyncpa [#allocation3], 1 }
  0xf2   :  { %163 = vsyncpa [#allocation5], 1 }

// kernel: _lambda_.7
= control target key start
LH: loop header
LB: loop body
LE: loop exit
PB: predicated region body
PF: predicated region fallthrough
CT: control target
= control target key end

     0   :  { %vm32_vm0 = vcmask 261120   ;;  %vm170_vm1 = vcmask 523264   ;;  %s365_s24 = smov 64   ;;  %vm287_vm2 = vcmask 64512   ;;  %s513_s0 = inlined_call_operand.vmem [shape: f32[16,32], index: 0, kind: input, shape index: {}]   ;;  %s514_s3 = inlined_call_operand.vmem [shape: f32[32,128], index: 3, kind: input, shape index: {}]   ;;  %s515_s5 = inlined_call_operand.vmem [shape: f32[64,72], index: 5, kind: input, shape index: {}]   ;;  %s516_s1 = inlined_call_operand.vmem [shape: f32[1,32], index: 1, kind: input, shape index: {}]   ;;  %s517_s2 = inlined_call_operand.vmem [shape: f32[1,32], index: 2, kind: input, shape index: {}]   ;;  %s518_s4 = inlined_call_operand.vmem [shape: f32[1,128], index: 4, kind: input, shape index: {}]   ;;  %s519_s7 = inlined_call_operand.vmem [shape: f32[16,64], index: 7, kind: output, shape index: {0}]   ;;  %s520_s8 = inlined_call_operand.vmem [shape: f32[16,64], index: 8, kind: output, shape index: {1}]   ;;  %s521_s6 = inlined_call_operand.vmem [shape: f32[1,72], index: 6, kind: input, shape index: {}]   ;;  %s522_s9 = inlined_call_operand.vmem [shape: f32[16,64], index: 9, kind: output, shape index: {2}]   ;;  %s523_s10 = inlined_call_operand.vmem [shape: f32[16,8], index: 10, kind: output, shape index: {3}]  }
   0x1   :  { %v30_v0 = vld [vmem:[%s513_s0] sm:$0xff]  ;;  %v31_v1 = vld [vmem:[%s513_s0 + $0x8] sm:$0xff]  ;;  %v81_v14 = vld [vmem:[%s514_s3 + $0x18] sm:$0xff] }
   0x2   :  { %v33_v2 = vsel %vm32_vm0, %v30_v0, 0.0  ;;  %v36_v3 = vsel %vm32_vm0, %v31_v1, 0.0  ;;  %v80_v15 = vld [vmem:[%s514_s3 + $0x10] sm:$0xff]  ;;  %330 = vmatprep.subr.mxu0 %v81_v14  ;;  %v79_v16 = vld [vmem:[%s514_s3 + $0x8] sm:$0xff]  ;;  %v78_v17 = vld [vmem:[%s514_s3] sm:$0xff] }
   0x3   :  { %34 = vadd.xlane.f32.xlu0 %v33_v2  ;;  %331 = vmatpush3.msra.mxu0 %v81_v14  ;;  %v190_v18 = vld [vmem:[%s515_s5 + $0x38] sm:$0xff]  ;;  %v189_v19 = vld [vmem:[%s515_s5 + $0x30] sm:$0xff]  ;;  %v188_v20 = vld [vmem:[%s515_s5 + $0x28] sm:$0xff] }
   0x4   :  { %332 = vmatprep.subr.mxu0 %v80_v15  ;;  %341 = vmatprep.subr.mxu1 %v190_v18  ;;  %v187_v21 = vld [vmem:[%s515_s5 + $0x20] sm:$0xff]  ;;  %v186_v22 = vld [vmem:[%s515_s5 + $0x18] sm:$0xff]  ;;  %v185_v39 = vld [vmem:[%s515_s5 + $0x10] sm:$0xff] }
   0x5   :  { %333 = vmatpush3.msra.mxu0 %v80_v15  ;;  %342 = vmatpush3.msra.mxu1 %v190_v18  ;;  %v306_v30 = vld [vmem:[%s516_s1] ss:$0 sm:$0xff]  ;;  %v184_v40 = vld [vmem:[%s515_s5 + $0x8] sm:$0xff] }
   0x6   :  { %334 = vmatprep.subr.mxu0 %v79_v16  ;;  %343 = vmatprep.subr.mxu1 %v189_v19  ;;  %v307_v32 = vld [vmem:[%s517_s2] ss:$0 sm:$0xff] }
   0x7   :  { %37 = vadd.xlane.f32.xlu0 %v36_v3  ;;  %335 = vmatpush3.msra.mxu0 %v79_v16  ;;  %v183_v41 = vld [vmem:[%s515_s5] sm:$0xff] }
   0x8   :  { %336 = vmatprep.subr.mxu0 %v78_v17  ;;  %344 = vmatpush3.msra.mxu1 %v189_v19  ;;  %v308_v42 = vld [vmem:[%s518_s4] ss:$0 sm:$0xff] }
   0x9   :  { %337 = vmatpush3.msra.mxu0 %v78_v17  ;;  %345 = vmatprep.subr.mxu1 %v188_v20  ;;  %v311_v49 = vld [vmem:[%s521_s6] ss:$0 sm:$0xff] }
   0xa   :  { %346 = vmatpush3.msra.mxu1 %v188_v20 }
   0xb   :  { %347 = vmatprep.subr.mxu1 %v187_v21 }
   0xc   :  { %348 = vmatpush3.msra.mxu1 %v187_v21 }
   0xd   :  { %349 = vmatprep.subr.mxu1 %v186_v22 }
   0xe   :  { %350 = vmatpush3.msra.mxu1 %v186_v22 }
   0xf   :  { %351 = vmatprep.subr.mxu1 %v185_v39 }
  0x10   :  { %352 = vmatpush3.msra.mxu1 %v185_v39 }
  0x11   :  { %353 = vmatprep.subr.mxu1 %v184_v40 }
  0x12   :  { %354 = vmatpush3.msra.mxu1 %v184_v40 }
  0x13   :  { %355 = vmatprep.subr.mxu1 %v183_v41 }
  0x14   :  { %356 = vmatpush3.msra.mxu1 %v183_v41 }
  0x8c   :  { %v35_v4 = vpop.xlane.xlu0 %34 }
  0x8d   :  { %v40_v5 = vmul.f32 0.03125, %v35_v4 }
  0x8f   :  { %v42_v6 = vsub.f32 %v30_v0, %v40_v5 }
  0x90   :  { %v38_v7 = vpop.xlane.xlu0 %37 }
  0x91   :  { %v41_v8 = vmul.f32 0.03125, %v38_v7  ;;  %v44_v9 = vmul.f32 %v42_v6, %v42_v6 }
  0x93   :  { %v43_v10 = vsub.f32 %v31_v1, %v41_v8  ;;  %v46_v11 = vsel %vm32_vm0, %v44_v9, 0.0 }
  0x94   :  { %47 = vadd.xlane.f32.xlu1 %v46_v11 }
  0x95   :  { %v45_v12 = vmul.f32 %v43_v10, %v43_v10 }
  0x97   :  { %v49_v13 = vsel %vm32_vm0, %v45_v12, 0.0 }
  0x98   :  { %50 = vadd.xlane.f32.xlu1 %v49_v13 }
 0x11d   :  { %v48_v23 = vpop.xlane.xlu1 %47 }
 0x11e   :  { %v52_v24 = vmul.f32 0.03125, %v48_v23 }
 0x120   :  { %v54_v25 = vadd.f32 1e-05, %v52_v24 }
 0x121   :  { %v51_v26 = vpop.xlane.xlu1 %50 }
 0x122   :  { %361 = vrsqrt.f32 %v54_v25  ;;  %v53_v27 = vmul.f32 0.03125, %v51_v26 }
 0x124   :  { %v55_v28 = vadd.f32 1e-05, %v53_v27 }
 0x126   :  { %363 = vrsqrt.f32 %v55_v28 }
 0x12f   :  { %v362_v29 = vpop.eup %361 }
 0x130   :  { %v58_v31 = vmul.f32 %v362_v29, %v42_v6 }
 0x132   :  { %v67_v33 = vmul.f32 %v306_v30, %v58_v31 }
 0x133   :  { %v364_v34 = vpop.eup %363 }
 0x134   :  { %v59_v35 = vmul.f32 %v364_v34, %v43_v10  ;;  %v76_v36 = vadd.f32 %v307_v32, %v67_v33 }
 0x136   :  { %v68_v37 = vmul.f32 %v306_v30, %v59_v35  ;;  %338 = vmatprep.mubr.msk.f32.mxu0 %vm32_vm0, %v76_v36 }
 0x138   :  { %v77_v38 = vadd.f32 %v307_v32, %v68_v37 }
 0x13a   :  { %339 = vmatmul.mubr.msk.f32.vlgmr.msra.gmra.mxu0 %vm32_vm0, %v77_v38 }
 0x1fa   :  { %v340_v43 = vpop.f32.mrf.mxu0 }
 0x1fb   :  { %v167_v44 = vadd.f32 %v340_v43, %v308_v42 }
 0x1fc   :  { %v161_v45 = vpop.f32.mrf.mxu0 }
 0x1fd   :  { %172 = vst.msk [vmem:[%s519_s7 + $0x8] sm:$0xff] %vm170_vm1, %v167_v44  ;;  %v162_v46 = vadd.f32 %v308_v42, %v161_v45  ;;  %177 = vrot.lane.b32.xlu1 %v167_v44, %s365_s24 }
 0x1ff   :  { %171 = vst.msk [vmem:[%s519_s7] sm:$0xff] %vm170_vm1, %v162_v46  ;;  %175 = vrot.lane.b32.xlu0 %v162_v46, %s365_s24  ;;  %357 = vmatprep.mubr.msk.f32.mxu1 %vm170_vm1, %v162_v46 }
 0x200   :  { %358 = vmatmul.mubr.msk.f32.vlgmr.msra.gmra.mxu1 %vm170_vm1, %v167_v44 }
 0x26f   :  { %v178_v47 = vpop.permute.xlu1 %177 }
 0x270   :  { %182 = vst.msk [vmem:[%s520_s8 + $0x8] sm:$0xff] %vm170_vm1, %v178_v47 }
 0x271   :  { %v176_v48 = vpop.permute.xlu0 %175 }
 0x272   :  { %181 = vst.msk [vmem:[%s520_s8] sm:$0xff] %vm170_vm1, %v176_v48 }
 0x2c0   :  { %v359_v50 = vpop.f32.mrf.mxu1 }
 0x2c1   :  { %v274_v51 = vadd.f32 %v359_v50, %v311_v49 }
 0x2c2   :  { %v268_v52 = vpop.f32.mrf.mxu1 }
 0x2c3   :  { %278 = vst.msk [vmem:[%s522_s9 + $0x8] sm:$0xff] %vm170_vm1, %v274_v51  ;;  %v269_v53 = vadd.f32 %v311_v49, %v268_v52 }
 0x2c5   :  { %277 = vst.msk [vmem:[%s522_s9] sm:$0xff] %vm170_vm1, %v269_v53  ;;  %281 = vrot.lane.b32.xlu1 %v269_v53, %s365_s24 }
 0x2c9   :  { %283 = vrot.lane.b32.xlu1 %v274_v51, %s365_s24 }
 0x337   :  { %v282_v54 = vpop.permute.xlu1 %281 }
 0x338   :  { %288 = vst.msk [vmem:[%s523_s10] sm:$0xff] %vm287_vm2, %v282_v54 }
 0x33b   :  { %v284_v55 = vpop.permute.xlu1 %283 }
 0x33c   :  { %289 = vst.msk [vmem:[%s523_s10 + $0x8] sm:$0xff] %vm287_vm2, %v284_v55 }

// kernel: _lambda_.10
= control target key start
LH: loop header
LB: loop body
LE: loop exit
PB: predicated region body
PF: predicated region fallthrough
CT: control target
= control target key end

     0   :  { %s1992_s25 = smov 0   ;;  %s2288_s0 = inlined_call_operand.vmem [shape: f32[2,8,64], index: 0, kind: input, shape index: {}]   ;;  %s2289_s1 = inlined_call_operand.vmem [shape: f32[2,8,64], index: 1, kind: input, shape index: {}]   ;;  %s2290_s2 = inlined_call_operand.vmem [shape: f32[2,8,64], index: 2, kind: input, shape index: {}]   ;;  %s2291_s3 = inlined_call_operand.vmem [shape: f32[2,8,8], index: 3, kind: input, shape index: {}]   ;;  %s2292_s4 = inlined_call_operand.vmem [shape: f32[2,8,32], index: 4, kind: input, shape index: {}]   ;;  %s2293_s5 = inlined_call_operand.vmem [shape: f32[4,64], index: 5, kind: input, shape index: {}]   ;;  %s2294_s6 = inlined_call_operand.vmem [shape: f32[1,64], index: 6, kind: input, shape index: {}]   ;;  %s2295_s7 = inlined_call_operand.vmem [shape: f32[64,136], index: 7, kind: input, shape index: {}]   ;;  %s2296_s8 = inlined_call_operand.vmem [shape: f32[1,136], index: 8, kind: input, shape index: {}]   ;;  %s2297_s9 = inlined_call_operand.vmem [shape: f32[1,64], index: 9, kind: input, shape index: {}, may-alias: {9,10}]   ;;  %s2298_s10 = inlined_call_operand.vmem [shape: f32[1,64], index: 10, kind: input, shape index: {}, may-alias: {9,10}]   ;;  %s2299_s11 = inlined_call_operand.vmem [shape: f32[64,32], index: 11, kind: input, shape index: {}]   ;;  %s2300_s12 = inlined_call_operand.vmem [shape: f32[1,32], index: 12, kind: input, shape index: {}]   ;;  %s2301_s13 = inlined_call_operand.vmem [shape: f32[2,8,32], index: 13, kind: output, shape index: {}]  }
   0x1 LB: > { %s1690_s26 = sadd.s32 4294967295, %s1905_s25   ;;  %p1694_p0 = scmp.ge.s32.totalorder %s1905_s25, 1  ;;  %s1905_s25 = sphi %s1992_s25, %s23_s25  }
   0x2   : > { %p422_p1 = scmp.lt.s32.totalorder %s1905_s25, 3 }
   0x4   : > { %p423_p2 = pnand %p1694_p0, %p422_p1 }
   0x5   : > { %p480_p3 = scmp.lt.s32.totalorder (!%p423_p2), %s1690_s26, 1  ;;  %s1908_s27 = smov (!%p423_p2), 124  }
   0x6   : > { %426 = sbr.rel (%p423_p2) target bundleno = 2472 (0x9a8), region = 72  ;;  %s1909_s28 = smov (!%p423_p2), 4  }
   0x7   : > { %s1911_s29 = smov (!%p423_p2), 64   ;;  %s1914_s30 = smov (!%p423_p2), 48  }
   0x8   : > { %s1917_s15 = smov (!%p423_p2), 32   ;;  %s1918_s16 = smov (!%p423_p2), 96  }
   0x9   : > { %s1921_s20 = smov (!%p423_p2), 16  }
   0xb   : > { %v579_v0 = vld [vmem:[%s2295_s7 + $0x78] sm:$0xff]  ;;  %v578_v1 = vld [vmem:[%s2295_s7 + $0x70] sm:$0xff]  ;;  %v577_v2 = vld [vmem:[%s2295_s7 + $0x68] sm:$0xff]  ;;  %v505_v3 = vlaneseq  ;;  %v1907_v5 = vmov 0.0   ;;  %s2303_s26 = smov (!%p480_p3, %s1690_s26), 1  ;;  %vm562_vm3 = vcmask 523264  }
   0xc   : > { %611 = vmatprep.subr.mxu0 %v579_v0  ;;  %v576_v4 = vld [vmem:[%s2295_s7 + $0x60] sm:$0xff]  ;;  %659 = vmatprep.mubr.f32.mxu0 %v1907_v5  ;;  %v575_v6 = vld [vmem:[%s2295_s7 + $0x58] sm:$0xff]  ;;  %v574_v8 = vld [vmem:[%s2295_s7 + $0x50] sm:$0xff]  ;;  %s2026_s24 = sshll.u32 %s2303_s26, 3  ;;  %vm667_vm4 = vcmask 64512   ;;  %vm1910_vm5 = vmmov 0  }
   0xd   : > { %612 = vmatpush1.msra.mxu0 %v578_v1  ;;  %v2017_v7 = vshrl.u32 %v505_v3, 7  ;;  %1752 = vmatprep.subr.bf16.mxu1 %v1907_v5  ;;  %v573_v9 = vld [vmem:[%s2295_s7 + $0x48] sm:$0xff]  ;;  %v572_v11 = vld [vmem:[%s2295_s7 + $0x40] sm:$0xff]  ;;  %s483_s14 = scalar_lea.vmem %s2288_s0, %s2026_s24  ;;  %v571_v15 = vld [vmem:[%s2295_s7 + $0x38] sm:$0xff]  ;;  %s495_s23 = scalar_lea.vmem %s2291_s3, %s2026_s24  ;;  %vm800_vm6 = vcmask 130048   ;;  %vm782_vm8 = vcmask 60416  }
   0xe   : > { %613 = vmatprep.subr.mxu0 %v577_v2  ;;  %v508_v12 = vld [vmem:[%s2293_s5] sm:$0xf]  ;;  %v570_v19 = vld [vmem:[%s2295_s7 + $0x30] sm:$0xff]  ;;  %v569_v24 = vld [vmem:[%s2295_s7 + $0x28] sm:$0xff]  ;;  %1754 = vmatprep.mubr.msk.bf16.mxu1 %vm1910_vm5, %v1907_v5  ;;  %s1919_s26 = smov 80   ;;  %s491_s19 = scalar_lea.vmem %s2290_s2, %s2026_s24  ;;  %vm887_vm10 = vcmask 1043456  }
   0xf   : > { %614 = vmatpush1.msra.mxu0 %v576_v4  ;;  %v511_v10 = vsub.s32 3, %v2017_v7  ;;  %vm515_vm0 = vcmp.ge.s32.totalorder %v2017_v7, 3  ;;  %v521_v13 = vsub.s32 0, %v2017_v7  ;;  %v532_v14 = vsub.s32 1, %v2017_v7  ;;  %v507_v16 = vld [vmem:[%s483_s14] sm:$0xff]  ;;  %v567_v31 = vld [vmem:[%s2295_s7 + $0x18] sm:$0xff]  ;;  %s499_s18 = scalar_lea.vmem %s2292_s4, %s2026_s24  ;;  %s503_s22 = scalar_lea.vmem %s2301_s13, %s2026_s24 }
  0x10   : > { %615 = vmatprep.subr.mxu0 %v575_v6  ;;  %vm526_vm1 = vcmp.ge.s32.totalorder %v2017_v7, 2  ;;  %vm537_vm2 = vcmp.ge.s32.totalorder %v2017_v7, 1  ;;  %v543_v18 = vsub.s32 2, %v2017_v7  ;;  %v514_v20 = vrot.slane %v507_v16, 5  ;;  %v568_v28 = vld [vmem:[%s2295_s7 + $0x20] sm:$0xff]  ;;  %v566_v35 = vld [vmem:[%s2295_s7 + $0x10] sm:$0xff] }
  0x11   : > { %616 = vmatpush1.msra.mxu0 %v574_v8  ;;  %v512_v17 = vrot.slane %v508_v12, %v511_v10  ;;  %v522_v21 = vrot.slane %v508_v12, %v521_v13  ;;  %v525_v22 = vrot.slane %v507_v16, 6  ;;  %v533_v23 = vrot.slane %v508_v12, %v532_v14  ;;  %v565_v36 = vld [vmem:[%s2295_s7 + $0x8] sm:$0xff]  ;;  %v564_v39 = vld [vmem:[%s2295_s7] sm:$0xff]  ;;  %s1916_s14 = smov 112  }
  0x12   : > { %617 = vmatprep.subr.mxu0 %v573_v9  ;;  %v536_v26 = vrot.slane %v507_v16, 7  ;;  %v544_v27 = vrot.slane %v508_v12, %v543_v18  ;;  %v518_v29 = vsel %vm515_vm0, %v514_v20, 0.0  ;;  %v1701_v41 = vld [vmem:[%s2294_s6] ss:$0 sm:$0xff]  ;;  %vm702_vm7 = vcmp.ge.s32.totalorder %v2017_v7, 4 }
  0x13   : > { %618 = vmatpush1.msra.mxu0 %v572_v11  ;;  %v513_v25 = vmul.f32 %v512_v17, %v507_v16  ;;  %v529_v30 = vsel %vm526_vm1, %v525_v22, 0.0  ;;  %v523_v32 = vmul.f32 %v522_v21, %v518_v29  ;;  %v580_v49 = vld [vmem:[%s2296_s8] sm:$0x3]  ;;  %v1912_v21 = vmov 4  }
  0x14   : > { %619 = vmatprep.subr.mxu0 %v571_v15  ;;  %v534_v33 = vmul.f32 %v533_v23, %v529_v30  ;;  %v540_v34 = vsel %vm537_vm2, %v536_v26, 0.0  ;;  %v585_v50 = vrot.slane %v580_v49, %v521_v13  ;;  %v589_v51 = vrot.slane %v580_v49, %v532_v14  ;;  %v669_v55 = vld [vmem:[%s495_s23] sm:$0xff]  ;;  %1842 = vset.pattern.permute.xlu0 %v1912_v21 }
  0x15   : > { %620 = vmatpush1.msra.mxu0 %v570_v19  ;;  %v524_v37 = vadd.f32 %v523_v32, %v513_v25  ;;  %v545_v38 = vmul.f32 %v544_v27, %v540_v34  ;;  %vm1125_vm11 = vcmask 261248   ;;  %vm1296_vm12 = vcmask 392448  }
  0x16   : > { %621 = vmatprep.subr.mxu0 %v569_v24  ;;  %vm1467_vm13 = vcmask 523648   ;;  %vm1587_vm14 = vcmask 261120  }
  0x17   : > { %622 = vmatpush1.msra.mxu0 %v568_v28  ;;  %v535_v40 = vadd.f32 %v534_v33, %v524_v37  ;;  %v1915_v33 = vmov 5  }
  0x18   : > { %623 = vmatprep.subr.mxu0 %v567_v31  ;;  %v1913_v31 = vmov 7  }
  0x19   : > { %624 = vmatpush1.msra.mxu0 %v566_v35  ;;  %v546_v42 = vadd.f32 %v545_v38, %v535_v40  ;;  %v848_v38 = vand.u32 127, %v505_v3  ;;  %v1132_v3 = vld [vmem:[%s491_s19] sm:$0xff] }
  0x1a   : > { %625 = vmatprep.subr.mxu0 %v565_v36  ;;  %v1920_v36 = vmov 6  }
  0x1b   : > { %626 = vmatpush1.msra.mxu0 %v564_v39  ;;  %v554_v43 = vadd.f32 %v1701_v41, %v546_v42  ;;  %vm851_vm9 = vcmp.ge.s32.totalorder %v2017_v7, %v848_v38 }
  0x1c   : > { %1776 = vmatprep.subr.bf16.mxu0 %v1907_v5 }
  0x1d   : > { %v1702_v44 = vmul.f32 -1.442695, %v554_v43 }
  0x1f   : > { %1847 = vpow2.f32 %v1702_v44 }
  0x2c   : > { %v1848_v45 = vpop.eup %1847 }
  0x2d   : > { %v558_v46 = vadd.f32 1.0, %v1848_v45 }
  0x2f   : > { %1849 = vrcp.f32 %v558_v46 }
  0x3c   : > { %v1850_v47 = vpop.eup %1849 }
  0x3d   : > { %v561_v48 = vmul.f32 %v1850_v47, %v554_v43 }
  0x3f   : > { %563 = vst.msk [vmem:[#allocation2] sm:$0xff] %vm562_vm3, %v561_v48  ;;  %1703 = vmatmul.mubr.msk.f32.vlgmr.msra.gmra.mxu0 %vm562_vm3, %v561_v48 }
  0x40   : > { %1778 = vmatprep.mubr.msk.bf16.mxu0 %vm1910_vm5, %v1907_v5 }
  0xff   : > { %v661_v52 = vpop.f32.mrf.mxu0 }
 0x100   : > { %v662_v53 = vadd.f32 %v661_v52, %v585_v50  ;;  %v1133_v50 = vpack.c.bf16 %v1132_v3, %v1132_v3 }
 0x101   : > { %v663_v54 = vpop.f32.mrf.mxu0 }
 0x102   : > { %v664_v56 = vadd.f32 %v663_v54, %v589_v51  ;;  %v2100_v14 = vpack.c.bf16 %v662_v53, %v662_v53  ;;  %v786_v19 = vmul.f32 0.25, %v662_v53  ;;  %v889_v51 = vsel %vm887_vm10, %v1133_v50, 0 }
 0x104   : > { %v670_v57 = vadd.f32 %v669_v55, %v664_v56  ;;  %v787_v20 = vpack.c.bf16 %v786_v19, %v786_v19 }
 0x106   : > { %v672_v58 = vand.u32 2147483647, %v670_v57  ;;  %v671_v0 = vmin.f32 %v670_v57, 0.0 }
 0x108   : > { %v673_v59 = vsub.f32 0.0, %v672_v58 }
 0x10a   : > { %v674_v60 = vmul.f32 1.442695, %v673_v59 }
 0x10c   : > { %1851 = vpow2.f32 %v674_v60 }
 0x119   : > { %v1852_v61 = vpop.eup %1851 }
 0x11a   : > { %v676_v62 = vadd.f32 1.0, %v1852_v61 }
 0x11c   : > { %1853 = vlog2.f32 %v676_v62 }
 0x129   : > { %v1854_v63 = vpop.eup %1853 }
 0x12a   : > { %v678_v1 = vmul.f32 0.6931472, %v1854_v63 }
 0x12c   : > { %v679_v2 = vsub.f32 %v671_v0, %v678_v1 }
 0x12e   : > { %681 = vrot.lane.b32.xlu0 %v679_v2, %s1908_s27 }
 0x1a0   : > { %v682_v4 = vpop.permute.xlu0 %681 }
 0x1a1   : > { %v684_v6 = vrot.slane %v682_v4, 7 }
 0x1a3   : > { %v685_v8 = vsel %vm537_vm2, %v684_v6, 0.0 }
 0x1a4   : > { %687 = vrot.lane.b32.xlu0 %v685_v8, %s1909_s28 }
 0x216   : > { %v688_v9 = vpop.permute.xlu0 %687 }
 0x217   : > { %v690_v10 = vadd.f32 %v688_v9, %v679_v2 }
 0x219   : > { %692 = vrot.lane.b32.xlu1 %v690_v10, %s1908_s27 }
 0x28b   : > { %v693_v11 = vpop.permute.xlu1 %692 }
 0x28c   : > { %v695_v12 = vrot.slane %v693_v11, 6 }
 0x28e   : > { %v696_v13 = vsel %vm526_vm1, %v695_v12, 0.0 }
 0x28f   : > { %698 = vrot.lane.b32.xlu1 %v696_v13, %s1909_s28 }
 0x293   : > { %798 = vrot.lane.b32.xlu1 %v2100_v14, %s1911_s29 }
 0x301   : > { %v699_v15 = vpop.permute.xlu1 %698 }
 0x302   : > { %v701_v16 = vadd.f32 %v699_v15, %v690_v10 }
 0x304   : > { %704 = vrot.lane.b32.xlu0 %v701_v16, %s1908_s27 }
 0x305   : > { %v799_v17 = vpop.permute.xlu1 %798 }
 0x306   : > { %v805_v18 = vsel %vm800_vm6, %v799_v17, 0 }
 0x307   : > { %1753 = vmatpush3.bf16.xpose.msra.mxu1 %v805_v18 }
 0x308   : > { %1758 = vmatprep.subr.bf16.mxu1 %v1907_v5 }
 0x30e   : > { %1755 = vmatmul.mubr.msk.bf16.vlgmr.msra.gmra.mxu1 %vm800_vm6, %v787_v20 }
 0x30f   : > { %1760 = vmatprep.mubr.msk.bf16.mxu1 %vm1910_vm5, %v1907_v5  ;;  %1759 = vmatpush3.bf16.msra.mxu1 %v889_v51 }
 0x310   : > { %1764 = vmatprep.subr.bf16.mxu1 %v1907_v5 }
 0x376   : > { %v705_v22 = vpop.permute.xlu0 %704 }
 0x377   : > { %v707_v23 = vrot.slane %v705_v22, 4 }
 0x379   : > { %v708_v24 = vsel %vm702_vm7, %v707_v23, 0.0 }
 0x37a   : > { %710 = vrot.lane.b32.xlu0 %v708_v24, %s1909_s28  ;;  %s487_s28 = scalar_lea.vmem %s2289_s1, %s2026_s24 }
 0x3ce   : > { %v2111_v25 = vpop.f32.mrf.mxu1 }
 0x3d0   : > { %v1756_v26 = vpop.f32.mrf.mxu1 }
 0x3d2   : > { %v844_v27 = vpop.f32.mrf.mxu1 }
 0x3d4   : > { %v1757_v28 = vpop.f32.mrf.mxu1 }
 0x3ec   : > { %v711_v29 = vpop.permute.xlu0 %710 }
 0x3ed   : > { %v713_v30 = vadd.f32 %v711_v29, %v701_v16 }
 0x3ef   : > { %853 = vperm.xlu0 %1842, %v713_v30   ;;  %715 = vrot.lane.b32.xlu1 %v713_v30, %s1908_s27 }
 0x40d   : > { %750 = vxpose.xlu0.b32.start.end [1/1] (short) (narrow) %v670_v57, 8 }
 0x436   : > { %1846 = vset.pattern.permute.xlu0 %v1913_v31 }
 0x461   : > { %v716_v32 = vpop.permute.xlu1 %715 }
 0x462   : > { %718 = vxpose.xlu1.b32.start.end [1/1] (short) (narrow) %v716_v32, 8 }
 0x46a   : > { %v854_v34 = vpop.permute.xlu0 %853 }
 0x480   : > { %969 = vrot.lane.b32.xlu1 %v2100_v14, %s1914_s30 }
 0x481   : > { %1843 = vset.pattern.permute.xlu1 %v1915_v33 }
 0x484   : > { %966 = vrot.lane.b32.xlu1 %v787_v20, %s1916_s14 }
 0x488   : > { %1140 = vrot.lane.b32.xlu1 %v2100_v14, %s1917_s15 }
 0x489   : > { %v766_v35 = vpop.trf.xlu0 }
 0x48a   : > { %784 = vst.msk [vmem:[#allocation4 + $0x4] sm:$0xf] %vm782_vm8, %v766_v35 }
 0x48c   : > { %1137 = vrot.lane.b32.xlu1 %v787_v20, %s1918_s16 }
 0x490   : > { %1308 = vrot.lane.b32.xlu1 %v787_v20, %s1919_s26 }
 0x491   : > { %v1706_v40 = vld [vmem:[#allocation4 + $0x4] ss:$0 sm:$0xff]  ;;  %v1710_v56 = vld [vmem:[#allocation4 + $0x5] ss:$0 sm:$0xff]  ;;  %v1714_v63 = vld [vmem:[#allocation4 + $0x6] ss:$0 sm:$0xff] }
 0x492   : > { %v1718_v9 = vld [vmem:[#allocation4 + $0x7] ss:$0 sm:$0xff] }
 0x494   : > { %1018 = vperm.xlu1 %1843, %v713_v30  }
 0x498   : > { %1844 = vset.pattern.permute.xlu1 %v1920_v36 }
 0x499   : > { %1189 = vperm.xlu1 %1844, %v713_v30  }
 0x49d   : > { %1845 = vset.pattern.permute.xlu1 %v1913_v31 }
 0x49e   : > { %1360 = vperm.xlu1 %1845, %v713_v30  }
 0x4de   : > { %v734_v37 = vpop.trf.xlu1 }
 0x4df   : > { %783 = vst.msk [vmem:[#allocation4] sm:$0xf] %vm782_vm8, %v734_v37 }
 0x4e6   : > { %v1705_v39 = vld [vmem:[#allocation4] ss:$0 sm:$0xff]  ;;  %v1709_v53 = vld [vmem:[#allocation4 + $0x1] ss:$0 sm:$0xff]  ;;  %v1713_v60 = vld [vmem:[#allocation4 + $0x2] ss:$0 sm:$0xff] }
 0x4e7   : > { %v860_v41 = vsub.f32 %v854_v34, %v1705_v39  ;;  %v1717_v6 = vld [vmem:[#allocation4 + $0x3] ss:$0 sm:$0xff] }
 0x4e9   : > { %v865_v42 = vadd.f32 %v1706_v40, %v860_v41 }
 0x4eb   : > { %v866_v43 = vsel %vm851_vm9, %v865_v42, -1e+30 }
 0x4ec   : > { %v867_v44 = vsel %vm667_vm4, %v866_v43, -inf }
 0x4ed   : > { %868 = vmax.xlane.f32.xlu0 %v867_v44 }
 0x4f2   : > { %v970_v45 = vpop.permute.xlu1 %969 }
 0x4f3   : > { %v975_v21 = vsel %vm800_vm6, %v970_v45, 0 }
 0x4f6   : > { %v2126_v46 = vpop.permute.xlu1 %966 }
 0x4fa   : > { %v1141_v47 = vpop.permute.xlu1 %1140 }
 0x4fb   : > { %v1146_v48 = vsel %vm800_vm6, %v1141_v47, 0 }
 0x4fc   : > { %1777 = vmatpush3.bf16.xpose.msra.mxu0 %v1146_v48 }
 0x4fd   : > { %1788 = vmatprep.subr.bf16.mxu0 %v1907_v5 }
 0x4fe   : > { %v1138_v49 = vpop.permute.xlu1 %1137 }
 0x502   : > { %v1309_v52 = vpop.permute.xlu1 %1308 }
 0x503   : > { %1311 = vrot.lane.b32.xlu0 %v2100_v14, %s1921_s20  ;;  %1779 = vmatmul.mubr.msk.bf16.vlgmr.msra.gmra.mxu0 %vm800_vm6, %v1138_v49 }
 0x504   : > { %1790 = vmatprep.mubr.msk.bf16.mxu0 %vm1910_vm5, %v1907_v5 }
 0x50f   : > { %v1019_v54 = vpop.permute.xlu1 %1018 }
 0x510   : > { %v1025_v55 = vsub.f32 %v1019_v54, %v1709_v53 }
 0x512   : > { %v1030_v57 = vadd.f32 %v1710_v56, %v1025_v55 }
 0x514   : > { %v1190_v58 = vpop.permute.xlu1 %1189  ;;  %v2143_v59 = vsel %vm851_vm9, %v1030_v57, -1e+30 }
 0x515   : > { %v1032_v61 = vsel %vm667_vm4, %v2143_v59, -inf  ;;  %v1196_v62 = vsub.f32 %v1190_v58, %v1713_v60 }
 0x516   : > { %1033 = vmax.xlane.f32.xlu1 %v1032_v61 }
 0x517   : > { %v1201_v0 = vadd.f32 %v1714_v63, %v1196_v62 }
 0x519   : > { %v1202_v1 = vsel %vm851_vm9, %v1201_v0, -1e+30  ;;  %v1361_v4 = vpop.permute.xlu1 %1360 }
 0x51a   : > { %v1203_v2 = vsel %vm667_vm4, %v1202_v1, -inf  ;;  %v1367_v8 = vsub.f32 %v1361_v4, %v1717_v6 }
 0x51c   : > { %v1372_v10 = vadd.f32 %v1718_v9, %v1367_v8 }
 0x51e   : > { %v1373_v11 = vsel %vm851_vm9, %v1372_v10, -1e+30 }
 0x51f   : > { %v1374_v12 = vsel %vm667_vm4, %v1373_v11, -inf }
 0x522   : > { %1204 = vmax.xlane.f32.xlu0 %v1203_v2 }
 0x527   : > { %1221 = vrot.lane.b32.xlu1 %v1133_v50, %s1918_s16 }
 0x538   : > { %1050 = vrot.lane.b32.xlu0 %v1133_v50, %s1916_s14 }
 0x54b   : > { %1375 = vmax.xlane.f32.xlu1 %v1374_v12 }
 0x55c   : > { %1392 = vrot.lane.b32.xlu1 %v1133_v50, %s1919_s26 }
 0x576   : > { %v869_v13 = vpop.xlane.xlu0 %868 }
 0x577   : > { %v2156_v14 = vmax.f32 %v869_v13, -1e+30 }
 0x579   : > { %v874_v15 = vsub.f32 %v866_v43, %v2156_v14  ;;  %v871_v36 = vsub.f32 -1e+30, %v2156_v14  ;;  %v933_v12 = vsub.f32 0.0, %v2156_v14 }
 0x57a   : > { %v1312_v16 = vpop.permute.xlu0 %1311 }
 0x57b   : > { %v875_v17 = vmul.f32 1.442695, %v874_v15  ;;  %v1317_v18 = vsel %vm800_vm6, %v1312_v16, 0  ;;  %v872_v38 = vmul.f32 1.442695, %v871_v36 }
 0x57c   : > { %1789 = vmatpush3.bf16.xpose.msra.mxu0 %v1317_v18  ;;  %v934_v13 = vmul.f32 1.442695, %v933_v12 }
 0x57d   : > { %1855 = vpow2.f32 %v875_v17  ;;  %1800 = vmatprep.subr.mxu0 %v1907_v5 }
 0x583   : > { %1791 = vmatmul.mubr.msk.bf16.vlgmr.msra.gmra.mxu0 %vm800_vm6, %v1309_v52 }
 0x584   : > { %1816 = vmatprep.mubr.msk.f32.mxu0 %vm1910_vm5, %v1907_v5 }
 0x58a   : > { %v1856_v7 = vpop.eup %1855 }
 0x58b   : > { %v2165_v19 = vmul.f32 %v1856_v7, %v2111_v25 }
 0x58d   : > { %v883_v20 = vpack.c.bf16 %v2165_v19, %v2165_v19  ;;  %v879_v10 = vsel %vm667_vm4, %v2165_v19, 0.0 }
 0x58f   : > { %1761 = vmatmul.mubr.msk.bf16.vlgmr.msra.gmra.mxu1 %vm667_vm4, %v883_v20 }
 0x590   : > { %1765 = vmatpush3.bf16.xpose.msra.mxu1 %v975_v21  ;;  %1766 = vmatprep.mubr.msk.bf16.mxu1 %vm1910_vm5, %v1907_v5 }
 0x591   : > { %1770 = vmatprep.subr.bf16.mxu1 %v1907_v5 }
 0x597   : > { %1767 = vmatmul.mubr.msk.bf16.vlgmr.msra.gmra.mxu1 %vm800_vm6, %v2126_v46 }
 0x598   : > { %1772 = vmatprep.mubr.msk.bf16.mxu1 %vm1910_vm5, %v1907_v5 }
 0x59f   : > { %v1034_v35 = vpop.xlane.xlu1 %1033 }
 0x5a0   : > { %v2185_v40 = vmax.f32 %v1034_v35, -1e+30 }
 0x5a2   : > { %v1039_v42 = vsub.f32 %v2143_v59, %v2185_v40  ;;  %v1036_v16 = vsub.f32 -1e+30, %v2185_v40 }
 0x5a3   : > { %v1222_v37 = vpop.permute.xlu1 %1221 }
 0x5a4   : > { %v1040_v45 = vmul.f32 1.442695, %v1039_v42  ;;  %v1037_v18 = vmul.f32 1.442695, %v1036_v16 }
 0x5ab   : > { %v1205_v22 = vpop.xlane.xlu0 %1204 }
 0x5ac   : > { %v2178_v23 = vmax.f32 %v1205_v22, -1e+30 }
 0x5ae   : > { %v1210_v24 = vsub.f32 %v1202_v1, %v2178_v23  ;;  %v1227_v1 = vsel %vm887_vm10, %v1222_v37, 0  ;;  %v1207_v20 = vsub.f32 -1e+30, %v2178_v23 }
 0x5af   : > { %v1051_v33 = vpop.permute.xlu0 %1050 }
 0x5b0   : > { %v1211_v25 = vmul.f32 1.442695, %v1210_v24  ;;  %v1056_v34 = vsel %vm887_vm10, %v1051_v33, 0 }
 0x5b1   : > { %1771 = vmatpush3.bf16.msra.mxu1 %v1056_v34 }
 0x5b2   : > { %1857 = vpow2.f32 %v1211_v25  ;;  %1782 = vmatprep.subr.bf16.mxu1 %v1907_v5  ;;  %v1100_v25 = vsub.f32 0.0, %v2185_v40 }
 0x5b3   : > { %1859 = vpow2.f32 %v872_v38 }
 0x5b4   : > { %1861 = vpow2.f32 %v1040_v45  ;;  %v1101_v14 = vmul.f32 1.442695, %v1100_v25 }
 0x5bf   : > { %v1858_v26 = vpop.eup %1857 }
 0x5c0   : > { %v1860_v49 = vpop.eup %1859 }
 0x5c1   : > { %v878_v50 = vmul.f32 0.0, %v1860_v49  ;;  %v1862_v56 = vpop.eup %1861 }
 0x5c3   : > { %v1182_v27 = vpop.f32.mrf.mxu0 }
 0x5c4   : > { %v1213_v28 = vmul.f32 %v1858_v26, %v1182_v27  ;;  %v1208_v26 = vmul.f32 1.442695, %v1207_v20 }
 0x5c5   : > { %v1780_v29 = vpop.f32.mrf.mxu0 }
 0x5c6   : > { %v1215_v30 = vsel %vm667_vm4, %v1213_v28, 0.0  ;;  %v1219_v8 = vpack.c.bf16 %v1213_v28, %v1213_v28  ;;  %v1271_v29 = vsub.f32 0.0, %v2178_v23 }
 0x5c7   : > { %v1185_v31 = vpop.f32.mrf.mxu0  ;;  %1216 = vadd.xlane.f32.xlu1 %v1215_v30 }
 0x5c9   : > { %v1781_v32 = vpop.f32.mrf.mxu0 }
 0x5ca   : > { %v1272_v32 = vmul.f32 1.442695, %v1271_v29 }
 0x5d4   : > { %v1376_v39 = vpop.xlane.xlu1 %1375 }
 0x5d5   : > { %v2187_v41 = vmax.f32 %v1376_v39, -1e+30 }
 0x5d7   : > { %v1381_v43 = vsub.f32 %v1373_v11, %v2187_v41  ;;  %v1378_v28 = vsub.f32 -1e+30, %v2187_v41  ;;  %v1442_v36 = vsub.f32 0.0, %v2187_v41 }
 0x5d8   : > { %v1393_v6 = vpop.permute.xlu1 %1392 }
 0x5d9   : > { %v1382_v47 = vmul.f32 1.442695, %v1381_v43  ;;  %v1398_v9 = vsel %vm887_vm10, %v1393_v6, 0  ;;  %v1379_v30 = vmul.f32 1.442695, %v1378_v28 }
 0x5da   : > { %v1443_v42 = vmul.f32 1.442695, %v1442_v36 }
 0x5db   : > { %1863 = vpow2.f32 %v1382_v47 }
 0x5dc   : > { %1865 = vpow2.f32 %v934_v13 }
 0x5dd   : > { %1867 = vpow2.f32 %v1037_v18 }
 0x5e8   : > { %v1864_v59 = vpop.eup %1863 }
 0x5e9   : > { %v1866_v22 = vpop.eup %1865 }
 0x5ea   : > { %v1868_v31 = vpop.eup %1867 }
 0x5eb   : > { %v1043_v33 = vmul.f32 0.0, %v1868_v31 }
 0x643   : > { %v1353_v44 = vpop.f32.mrf.mxu0 }
 0x644   : > { %v1384_v61 = vmul.f32 %v1864_v59, %v1353_v44 }
 0x645   : > { %v1792_v46 = vpop.f32.mrf.mxu0 }
 0x646   : > { %v1386_v4 = vsel %vm667_vm4, %v1384_v61, 0.0  ;;  %v1390_v11 = vpack.c.bf16 %v1384_v61, %v1384_v61 }
 0x647   : > { %v1356_v48 = vpop.f32.mrf.mxu0 }
 0x649   : > { %v1793_v3 = vpop.f32.mrf.mxu0 }
 0x64f   : > { %v925_v51 = vpop.f32.mrf.mxu1 }
 0x650   : > { %v2192_v52 = vadd.f32 %v925_v51, %v878_v50  ;;  %v1217_v40 = vpop.xlane.xlu1 %1216 }
 0x651   : > { %v1762_v53 = vpop.f32.mrf.mxu1 }
 0x653   : > { %v928_v54 = vpop.f32.mrf.mxu1 }
 0x655   : > { %v1763_v55 = vpop.f32.mrf.mxu1 }
 0x657   : > { %v1011_v57 = vpop.f32.mrf.mxu1 }
 0x658   : > { %v1042_v58 = vmul.f32 %v1862_v56, %v1011_v57 }
 0x659   : > { %v1768_v60 = vpop.f32.mrf.mxu1 }
 0x65a   : > { %v1048_v62 = vpack.c.bf16 %v1042_v58, %v1042_v58  ;;  %v1044_v63 = vsel %vm667_vm4, %v1042_v58, 0.0 }
 0x65b   : > { %1045 = vadd.xlane.f32.xlu0 %v1044_v63  ;;  %v1014_v0 = vpop.f32.mrf.mxu1 }
 0x65c   : > { %1773 = vmatmul.mubr.msk.bf16.vlgmr.msra.gmra.mxu1 %vm667_vm4, %v1048_v62 }
 0x65d   : > { %1783 = vmatpush3.bf16.msra.mxu1 %v1227_v1  ;;  %v1769_v2 = vpop.f32.mrf.mxu1  ;;  %1784 = vmatprep.mubr.msk.bf16.mxu1 %vm1910_vm5, %v1907_v5 }
 0x65e   : > { %1794 = vmatprep.subr.bf16.mxu1 %v1907_v5 }
 0x65f   : > { %1387 = vadd.xlane.f32.xlu0 %v1386_v4 }
 0x663   : > { %880 = vadd.xlane.f32.xlu0 %v879_v10 }
 0x664   : > { %1785 = vmatmul.mubr.msk.bf16.vlgmr.msra.gmra.mxu1 %vm667_vm4, %v1219_v8 }
 0x665   : > { %1795 = vmatpush3.bf16.msra.mxu1 %v1398_v9  ;;  %1796 = vmatprep.mubr.msk.bf16.mxu1 %vm1910_vm5, %v1907_v5 }
 0x66c   : > { %1797 = vmatmul.mubr.msk.bf16.vlgmr.msra.gmra.mxu1 %vm667_vm4, %v1390_v11 }
 0x6e4   : > { %v1046_v15 = vpop.xlane.xlu0 %1045 }
 0x6e5   : > { %v1047_v34 = vadd.f32 %v1046_v15, %v1043_v33 }
 0x6e7   : > { %v1099_v39 = vand.u32 2147483647, %v1047_v34 }
 0x6e8   : > { %v1388_v17 = vpop.xlane.xlu0 %1387 }
 0x6ec   : > { %v881_v7 = vpop.xlane.xlu0 %880 }
 0x6ed   : > { %v882_v19 = vadd.f32 %v881_v7, %v878_v50 }
 0x6ef   : > { %v932_v21 = vand.u32 2147483647, %v882_v19 }
 0x6f1   : > { %v936_v24 = vmax.f32 %v932_v21, %v1866_v22 }
 0x6f3   : > { %v937_v27 = vadd.f32 1e-06, %v936_v24 }
 0x6f5   : > { %1869 = vrcp.f32 %v937_v27 }
 0x6f6   : > { %1871 = vpow2.f32 %v1208_v26 }
 0x6f7   : > { %1873 = vpow2.f32 %v1101_v14 }
 0x6f8   : > { %1875 = vpow2.f32 %v1379_v30 }
 0x6f9   : > { %1877 = vpow2.f32 %v1272_v32 }
 0x6fa   : > { %1879 = vpow2.f32 %v1443_v42 }
 0x702   : > { %v1870_v35 = vpop.eup %1869 }
 0x703   : > { %v2216_v37 = vmul.f32 %v1870_v35, %v2192_v52  ;;  %v1872_v38 = vpop.eup %1871 }
 0x704   : > { %v1214_v43 = vmul.f32 0.0, %v1872_v38  ;;  %v1874_v44 = vpop.eup %1873 }
 0x705   : > { %v1103_v45 = vmax.f32 %v1099_v39, %v1874_v44  ;;  %v1876_v46 = vpop.eup %1875  ;;  %v941_v13 = vsel %vm800_vm6, %v2216_v37, 0.0 }
 0x706   : > { %v1218_v23 = vadd.f32 %v1217_v40, %v1214_v43  ;;  %v1385_v3 = vmul.f32 0.0, %v1876_v46  ;;  %v1878_v49 = vpop.eup %1877 }
 0x707   : > { %v1104_v48 = vadd.f32 1e-06, %v1103_v45  ;;  %v1880_v53 = vpop.eup %1879 }
 0x708   : > { %v1270_v47 = vand.u32 2147483647, %v1218_v23  ;;  %v1389_v41 = vadd.f32 %v1388_v17, %v1385_v3 }
 0x709   : > { %1881 = vrcp.f32 %v1104_v48 }
 0x70a   : > { %v1274_v50 = vmax.f32 %v1270_v47, %v1878_v49  ;;  %v1441_v52 = vand.u32 2147483647, %v1389_v41  ;;  %v1504_v49 = vld [vmem:[%s2299_s11 + $0x38] sm:$0xff] }
 0x70b   : > { %1801 = vmatpush3.msra.mxu0 %v1504_v49 }
 0x70c   : > { %v1275_v51 = vadd.f32 1e-06, %v1274_v50  ;;  %v1445_v54 = vmax.f32 %v1441_v52, %v1880_v53  ;;  %1802 = vmatprep.subr.mxu0 %v1907_v5  ;;  %v1503_v53 = vld [vmem:[%s2299_s11 + $0x30] sm:$0xff] }
 0x70d   : > { %1803 = vmatpush3.msra.mxu0 %v1503_v53 }
 0x70e   : > { %1883 = vrcp.f32 %v1275_v51  ;;  %v1446_v56 = vadd.f32 1e-06, %v1445_v54  ;;  %v1502_v54 = vld [vmem:[%s2299_s11 + $0x28] sm:$0xff]  ;;  %1804 = vmatprep.subr.mxu0 %v1907_v5 }
 0x70f   : > { %1805 = vmatpush3.msra.mxu0 %v1502_v54 }
 0x710   : > { %1885 = vrcp.f32 %v1446_v56  ;;  %v1501_v56 = vld [vmem:[%s2299_s11 + $0x20] sm:$0xff]  ;;  %1806 = vmatprep.subr.mxu0 %v1907_v5 }
 0x711   : > { %1807 = vmatpush3.msra.mxu0 %v1501_v56 }
 0x712   : > { %1808 = vmatprep.subr.mxu0 %v1907_v5 }
 0x716   : > { %v1882_v58 = vpop.eup %1881 }
 0x71b   : > { %v1884_v2 = vpop.eup %1883 }
 0x71c   : > { %v1092_v55 = vpop.f32.mrf.mxu1 }
 0x71d   : > { %v1098_v57 = vadd.f32 %v1092_v55, %v1043_v33  ;;  %v1886_v15 = vpop.eup %1885 }
 0x71e   : > { %v1774_v59 = vpop.f32.mrf.mxu1 }
 0x71f   : > { %v1107_v60 = vmul.f32 %v1882_v58, %v1098_v57  ;;  %v1500_v58 = vld [vmem:[%s2299_s11 + $0x18] sm:$0xff] }
 0x720   : > { %v1095_v61 = vpop.f32.mrf.mxu1  ;;  %1809 = vmatpush3.msra.mxu0 %v1500_v58 }
 0x721   : > { %v1108_v62 = vsel %vm800_vm6, %v1107_v60, 0.0  ;;  %1810 = vmatprep.subr.mxu0 %v1907_v5 }
 0x722   : > { %1109 = vadd.xlane.f32.xlu1 %v1108_v62  ;;  %v1775_v63 = vpop.f32.mrf.mxu1  ;;  %v1498_v62 = vld [vmem:[%s2299_s11 + $0x8] sm:$0xff] }
 0x724   : > { %v1263_v0 = vpop.f32.mrf.mxu1 }
 0x725   : > { %v1269_v1 = vadd.f32 %v1263_v0, %v1214_v43  ;;  %v1497_v0 = vld [vmem:[%s2299_s11] sm:$0xff] }
 0x726   : > { %v1786_v4 = vpop.f32.mrf.mxu1 }
 0x727   : > { %v1278_v6 = vmul.f32 %v1884_v2, %v1269_v1  ;;  %v1469_v2 = vld [vmem:[%s487_s28] sm:$0xff] }
 0x728   : > { %v1266_v8 = vpop.f32.mrf.mxu1  ;;  %v1722_v4 = vmul.f32 -1.442695, %v1469_v2 }
 0x729   : > { %v1279_v9 = vsel %vm800_vm6, %v1278_v6, 0.0 }
 0x72a   : > { %1280 = vadd.xlane.f32.xlu0 %v1279_v9  ;;  %v1787_v10 = vpop.f32.mrf.mxu1 }
 0x72c   : > { %v1434_v11 = vpop.f32.mrf.mxu1 }
 0x72d   : > { %v1440_v12 = vadd.f32 %v1434_v11, %v1385_v3  ;;  %v1721_v11 = vld [vmem:[%s2298_s10] ss:$0 sm:$0xff] }
 0x72e   : > { %942 = vadd.xlane.f32.xlu0 %v941_v13  ;;  %v1798_v16 = vpop.f32.mrf.mxu1 }
 0x72f   : > { %v1449_v17 = vmul.f32 %v1886_v15, %v1440_v12  ;;  %v1480_v12 = vld [vmem:[#allocation2] sm:$0xff] }
 0x730   : > { %v1437_v18 = vpop.f32.mrf.mxu1  ;;  %v1720_v15 = vld [vmem:[%s2297_s9] ss:$0 sm:$0xff]  ;;  %v1487_v16 = vmul.f32 %v1721_v11, %v1480_v12 }
 0x731   : > { %v1450_v7 = vsel %vm800_vm6, %v1449_v17, 0.0 }
 0x732   : > { %1451 = vadd.xlane.f32.xlu1 %v1450_v7  ;;  %v1799_v19 = vpop.f32.mrf.mxu1 }
 0x7ab   : > { %v1110_v20 = vpop.xlane.xlu1 %1109 }
 0x7ac   : > { %v1111_v21 = vmul.f32 0.0625, %v1110_v20 }
 0x7ae   : > { %v1112_v22 = vsub.f32 %v1107_v60, %v1111_v21  ;;  %v1499_v60 = vld [vmem:[%s2299_s11 + $0x10] sm:$0xff]  ;;  %v1723_v21 = vld [vmem:[%s2300_s12] ss:$0 sm:$0xff] }
 0x7af   : > { %1811 = vmatpush3.msra.mxu0 %v1499_v60 }
 0x7b0   : > { %v1113_v24 = vmul.f32 %v1112_v22, %v1112_v22  ;;  %1812 = vmatprep.subr.mxu0 %v1907_v5 }
 0x7b1   : > { %1813 = vmatpush3.msra.mxu0 %v1498_v62 }
 0x7b2   : > { %v1114_v25 = vsel %vm800_vm6, %v1113_v24, 0.0  ;;  %1814 = vmatprep.subr.mxu0 %v1907_v5  ;;  %v1585_v24 = vld [vmem:[%s499_s18] sm:$0xff] }
 0x7b3   : > { %v1281_v26 = vpop.xlane.xlu0 %1280  ;;  %1115 = vadd.xlane.f32.xlu1 %v1114_v25  ;;  %1815 = vmatpush3.msra.mxu0 %v1497_v0 }
 0x7b4   : > { %v1282_v27 = vmul.f32 0.0625, %v1281_v26 }
 0x7b6   : > { %v1283_v14 = vsub.f32 %v1278_v6, %v1282_v27 }
 0x7b7   : > { %v943_v28 = vpop.xlane.xlu0 %942 }
 0x7b8   : > { %v945_v29 = vmul.f32 0.0625, %v943_v28  ;;  %v1284_v30 = vmul.f32 %v1283_v14, %v1283_v14 }
 0x7ba   : > { %v946_v31 = vsub.f32 %v2216_v37, %v945_v29  ;;  %v1285_v32 = vsel %vm800_vm6, %v1284_v30, 0.0 }
 0x7bb   : > { %1286 = vadd.xlane.f32.xlu0 %v1285_v32  ;;  %v1452_v33 = vpop.xlane.xlu1 %1451 }
 0x7bc   : > { %v1453_v34 = vmul.f32 0.0625, %v1452_v33  ;;  %v947_v35 = vmul.f32 %v946_v31, %v946_v31 }
 0x7be   : > { %v1454_v36 = vsub.f32 %v1449_v17, %v1453_v34  ;;  %v948_v38 = vsel %vm800_vm6, %v947_v35, 0.0 }
 0x7bf   : > { %949 = vadd.xlane.f32.xlu0 %v948_v38 }
 0x7c0   : > { %v1455_v39 = vmul.f32 %v1454_v36, %v1454_v36 }
 0x7c2   : > { %v1456_v40 = vsel %vm800_vm6, %v1455_v39, 0.0 }
 0x7c3   : > { %1457 = vadd.xlane.f32.xlu1 %v1456_v40 }
 0x83c   : > { %v1116_v42 = vpop.xlane.xlu1 %1115 }
 0x83d   : > { %v1117_v43 = vmul.f32 0.0625, %v1116_v42 }
 0x83f   : > { %v1118_v44 = vadd.f32 1e-05, %v1117_v43 }
 0x841   : > { %1887 = vrsqrt.f32 %v1118_v44 }
 0x844   : > { %v1287_v23 = vpop.xlane.xlu0 %1286 }
 0x845   : > { %v1288_v37 = vmul.f32 0.0625, %v1287_v23 }
 0x847   : > { %v1289_v45 = vadd.f32 1e-05, %v1288_v37 }
 0x848   : > { %v950_v46 = vpop.xlane.xlu0 %949 }
 0x849   : > { %1889 = vrsqrt.f32 %v1289_v45  ;;  %v951_v47 = vmul.f32 0.0625, %v950_v46 }
 0x84b   : > { %v952_v48 = vadd.f32 1e-05, %v951_v47 }
 0x84c   : > { %v1458_v3 = vpop.xlane.xlu1 %1457 }
 0x84d   : > { %1891 = vrsqrt.f32 %v952_v48  ;;  %v1459_v50 = vmul.f32 0.0625, %v1458_v3 }
 0x84e   : > { %v1888_v41 = vpop.eup %1887 }
 0x84f   : > { %v1460_v51 = vadd.f32 1e-05, %v1459_v50  ;;  %v1120_v52 = vmul.f32 %v1888_v41, %v1112_v22 }
 0x851   : > { %1893 = vrsqrt.f32 %v1460_v51  ;;  %1122 = vrot.lane.b32.xlu1 %v1120_v52, %s1921_s20 }
 0x852   : > { %1895 = vpow2.f32 %v1722_v4 }
 0x856   : > { %v1890_v55 = vpop.eup %1889 }
 0x857   : > { %v1291_v57 = vmul.f32 %v1890_v55, %v1283_v14 }
 0x859   : > { %1293 = vrot.lane.b32.xlu0 %v1291_v57, %s1917_s15 }
 0x85a   : > { %v1892_v59 = vpop.eup %1891 }
 0x85b   : > { %v954_v61 = vmul.f32 %v1892_v59, %v946_v31 }
 0x85d   : > { %955 = vst.msk [vmem:[#allocation5] sm:$0xff] %vm800_vm6, %v954_v61 }
 0x85e   : > { %v1894_v63 = vpop.eup %1893 }
 0x85f   : > { %v1462_v1 = vmul.f32 %v1894_v63, %v1454_v36  ;;  %v1896_v8 = vpop.eup %1895 }
 0x860   : > { %v1492_v9 = vadd.f32 1.0, %v1896_v8 }
 0x861   : > { %1464 = vrot.lane.b32.xlu1 %v1462_v1, %s1914_s30 }
 0x862   : > { %1897 = vrcp.f32 %v1492_v9 }
 0x86f   : > { %v1898_v13 = vpop.eup %1897 }
 0x870   : > { %v1495_v7 = vmul.f32 %v1898_v13, %v1469_v2 }
 0x8c3   : > { %v1123_v6 = vpop.permute.xlu1 %1122 }
 0x8c4   : > { %1126 = vst.msk [vmem:[#allocation5] sm:$0xff] %vm1125_vm11, %v1123_v6 }
 0x8cb   : > { %v1294_v10 = vpop.permute.xlu0 %1293 }
 0x8cc   : > { %1297 = vst.msk [vmem:[#allocation5] sm:$0xff] %vm1296_vm12, %v1294_v10 }
 0x8d3   : > { %v1465_v5 = vpop.permute.xlu1 %1464 }
 0x8d4   : > { %1468 = vst.msk [vmem:[#allocation5] sm:$0xff] %vm1467_vm13, %v1465_v5 }
 0x8db   : > { %v1470_v17 = vld [vmem:[#allocation5] sm:$0xff] }
 0x8dc   : > { %v1478_v18 = vmul.f32 %v1720_v15, %v1470_v17 }
 0x8de   : > { %v1488_v19 = vadd.f32 %v1487_v16, %v1478_v18 }
 0x8e0   : > { %v1496_v20 = vmul.f32 %v1495_v7, %v1488_v19 }
 0x8e2   : > { %1817 = vmatmul.mubr.msk.f32.vlgmr.msra.gmra.mxu0 %vm562_vm3, %v1496_v20 }
 0x9a2   : > { %v1581_v22 = vpop.f32.mrf.mxu0 }
 0x9a3   : > { %v1582_v25 = vadd.f32 %v1723_v21, %v1581_v22 }
 0x9a4   : > { %v1818_v26 = vpop.f32.mrf.mxu0 }
 0x9a5   : > { %v1586_v27 = vadd.f32 %v1585_v24, %v1582_v25 }
 0x9a7   : > { %1588 = vst.msk [vmem:[%s503_s22] sm:$0xff] %vm1587_vm14, %v1586_v27 }
 0x9a8 PF: > { %s23_s25 = sadd.s32 1, %s1905_s25  }
 0x9a9   : > { %p20_p4 = scmp.ge.s32.totalorder %s23_s25, 4  }
 0x9ab   :  { %22 = sbr.rel (!%p20_p4) target bundleno = 1 (0x1), region = 115 }

// kernel: _lambda_.11
= control target key start
LH: loop header
LB: loop body
LE: loop exit
PB: predicated region body
PF: predicated region fallthrough
CT: control target
= control target key end

     0   :  { %vm17_vm0 = vcmask 261120   ;;  %s156_s0 = inlined_call_operand.vmem [shape: f32[16,32], index: 0, kind: input, shape index: {}]   ;;  %s157_s1 = inlined_call_operand.vmem [shape: f32[1,32], index: 1, kind: input, shape index: {}]   ;;  %s158_s2 = inlined_call_operand.vmem [shape: f32[1,32], index: 2, kind: input, shape index: {}]   ;;  %s159_s3 = inlined_call_operand.hbm [shape: f32[16,32], index: 3, kind: output, shape index: {}]  }
   0x1   :  { %v15_v0 = vld [vmem:[%s156_s0] sm:$0xff]  ;;  %v16_v1 = vld [vmem:[%s156_s0 + $0x8] sm:$0xff] }
   0x2   :  { %8 = vsyncpa [#allocation3], 0  ;;  %v18_v2 = vsel %vm17_vm0, %v15_v0, 0.0  ;;  %v21_v3 = vsel %vm17_vm0, %v16_v1, 0.0  ;;  %v81_v21 = vld [vmem:[%s157_s1] ss:$0 sm:$0xff] }
   0x3   :  { %19 = vadd.xlane.f32.xlu0 %v18_v2  ;;  %v82_v23 = vld [vmem:[%s158_s2] ss:$0 sm:$0xff]  ;;  %s112_s19 = smov [#allocation2]  }
   0x4   :  { %s70_s20 = sshll.u32 %s112_s19, 4  ;;  %s71_s20 = int_to_ptr.vmem [resolvable:$true] %s70_s20 }
   0x5   :  { %s90_s21 = scalar_lea.vmem %s71_s20, 256  ;;  %p95_p1 = scmp.lt.s32.totalorder %s71_s20, %s71_s20 }
   0x6   :  { %p91_p0 = scmp.ne.s32.totalorder %s71_s20, %s90_s21  ;;  %p96_p2 = scmp.lt.s32.totalorder %s90_s21, %s90_s21 }
   0x7   :  { %22 = vadd.xlane.f32.xlu0 %v21_v3 }
   0x8   :  { %p97_p3 = por %p96_p2, %p95_p1 }
   0xa   :  { %p98_p4 = pnand %p97_p3, %p91_p0 }
  0x8c   :  { %v20_v4 = vpop.xlane.xlu0 %19 }
  0x8d   :  { %v25_v5 = vmul.f32 0.03125, %v20_v4 }
  0x8f   :  { %v27_v6 = vsub.f32 %v15_v0, %v25_v5 }
  0x90   :  { %v23_v7 = vpop.xlane.xlu0 %22 }
  0x91   :  { %v26_v8 = vmul.f32 0.03125, %v23_v7  ;;  %v29_v9 = vmul.f32 %v27_v6, %v27_v6 }
  0x93   :  { %v28_v10 = vsub.f32 %v16_v1, %v26_v8  ;;  %v31_v11 = vsel %vm17_vm0, %v29_v9, 0.0 }
  0x94   :  { %32 = vadd.xlane.f32.xlu1 %v31_v11 }
  0x95   :  { %v30_v12 = vmul.f32 %v28_v10, %v28_v10 }
  0x97   :  { %v34_v13 = vsel %vm17_vm0, %v30_v12, 0.0 }
  0x98   :  { %35 = vadd.xlane.f32.xlu1 %v34_v13 }
 0x11d   :  { %v33_v14 = vpop.xlane.xlu1 %32 }
 0x11e   :  { %v37_v15 = vmul.f32 0.03125, %v33_v14 }
 0x120   :  { %v39_v16 = vadd.f32 1e-05, %v37_v15 }
 0x121   :  { %v36_v17 = vpop.xlane.xlu1 %35 }
 0x122   :  { %86 = vrsqrt.f32 %v39_v16  ;;  %v38_v18 = vmul.f32 0.03125, %v36_v17 }
 0x124   :  { %v40_v19 = vadd.f32 1e-05, %v38_v18 }
 0x126   :  { %88 = vrsqrt.f32 %v40_v19 }
 0x12f   :  { %v87_v20 = vpop.eup %86 }
 0x130   :  { %v43_v22 = vmul.f32 %v87_v20, %v27_v6 }
 0x132   :  { %v52_v24 = vmul.f32 %v81_v21, %v43_v22 }
 0x133   :  { %v89_v25 = vpop.eup %88 }
 0x134   :  { %v44_v26 = vmul.f32 %v89_v25, %v28_v10  ;;  %v61_v27 = vadd.f32 %v82_v23, %v52_v24 }
 0x136   :  { %v53_v28 = vmul.f32 %v81_v21, %v44_v26  ;;  %63 = vst.msk [vmem:[#allocation2] sm:$0xff] %vm17_vm0, %v61_v27 }
 0x138   :  { %v62_v29 = vadd.f32 %v82_v23, %v53_v28 }
 0x13a   :  { %64 = vst.msk [vmem:[#allocation2 + $0x8] sm:$0xff] %vm17_vm0, %v62_v29 }
 0x13b   :  { %101 = shalt.err (!%p98_p4)
}
 0x13c   :  { %s113_s1 = smov 128   ;;  %s114_s2 = smov 8  }
 0x13d   :  { %76 = dma.vmem_to_hbm [thread:$0]  %s71_s20, 256, %s159_s3, [#allocation3], %s113_s1, %s113_s1, %s114_s2  }
 0x13e   :  { %110 = dma.done.wait [#allocation3], 256  }
 0x13f   :  { %111 = vsyncadd [#allocation3], 4294967040 }
 0x140   :  { %80 = vsyncpa [#allocation3], 1 }

// kernel: _lambda_.8
= control target key start
LH: loop header
LB: loop body
LE: loop exit
PB: predicated region body
PF: predicated region fallthrough
CT: control target
= control target key end

     0   :  { %18 = vsyncpa [#allocation7], 0  ;;  %s2067_s25 = smov 0   ;;  %s2369_s0 = inlined_call_operand.vmem [shape: f32[2,8,64], index: 0, kind: input, shape index: {}]   ;;  %s2370_s1 = inlined_call_operand.vmem [shape: f32[2,8,64], index: 1, kind: input, shape index: {}]   ;;  %s2371_s2 = inlined_call_operand.vmem [shape: f32[2,8,64], index: 2, kind: input, shape index: {}]   ;;  %s2372_s3 = inlined_call_operand.vmem [shape: f32[2,8,8], index: 3, kind: input, shape index: {}]   ;;  %s2373_s4 = inlined_call_operand.vmem [shape: f32[2,8,32], index: 4, kind: input, shape index: {}]   ;;  %s2374_s5 = inlined_call_operand.vmem [shape: f32[4,64], index: 5, kind: input, shape index: {}]   ;;  %s2375_s6 = inlined_call_operand.vmem [shape: f32[1,64], index: 6, kind: input, shape index: {}]   ;;  %s2376_s7 = inlined_call_operand.vmem [shape: f32[64,136], index: 7, kind: input, shape index: {}]   ;;  %s2377_s8 = inlined_call_operand.vmem [shape: f32[1,136], index: 8, kind: input, shape index: {}]   ;;  %s2378_s9 = inlined_call_operand.vmem [shape: f32[1,64], index: 9, kind: input, shape index: {}, may-alias: {9,10}]   ;;  %s2379_s10 = inlined_call_operand.vmem [shape: f32[1,64], index: 10, kind: input, shape index: {}, may-alias: {9,10}]   ;;  %s2380_s11 = inlined_call_operand.hbm [shape: f32[64,32], index: 11, kind: input, shape index: {}]   ;;  %s2381_s12 = inlined_call_operand.vmem [shape: f32[1,32], index: 12, kind: input, shape index: {}]   ;;  %s2382_s13 = inlined_call_operand.vmem [shape: f32[2,8,32], index: 13, kind: output, shape index: {}]  }
   0x1 LB: > { %s2073_s26 = sadd.s32 4294967295, %s1977_s25   ;;  %p1719_p0 = scmp.ge.s32.totalorder %s1977_s25, 1  ;;  %s1977_s25 = sphi %s2067_s25, %s24_s25  }
   0x2   : > { %p353_p1 = scmp.lt.s32.totalorder %s1977_s25, 3  ;;  %s1979_s27 = smov [#allocation6]  }
   0x3   : > { %s383_s28 = sshll.u32 %s1979_s27, 4  ;;  %p1856_p3 = scmp.eq.s32.totalorder %s2073_s26, 0  ;;  %s384_s28 = int_to_ptr.vmem [resolvable:$true] %s383_s28 }
   0x4   : > { %p2077_p2 = pnand %p1719_p0, %p353_p1  ;;  %s1952_s30 = scalar_lea.vmem %s384_s28, 1024 }
   0x5   : > { %p1953_p7 = scmp.ne.s32.totalorder %s384_s28, %s1952_s30  ;;  %p1960_p10 = scmp.lt.s32.totalorder %s384_s28, %s384_s28 }
   0x6   : > { %p1852_p4 = pneg %p2077_p2  ;;  %p1961_p11 = scmp.lt.s32.totalorder %s1952_s30, %s1952_s30 }
   0x8   : > { %p1853_p5 = pnand %p1856_p3, %p1852_p4  ;;  %p1962_p12 = por %p1961_p11, %p1960_p10 }
   0xa   : > { %p1943_p6 = pneg %p1853_p5 }
   0xc   : > { %p1955_p8 = pnand %p1953_p7, %p1943_p6 }
   0xe   : > { %p1956_p9 = pneg %p1955_p8 }
  0x10   : > { %p1963_p13 = pnand %p1962_p12, %p1956_p9 }
  0x12   : > { %1966 = shalt.err (!%p1963_p13)
}
  0x13   : > { %s1980_s14 = smov 128   ;;  %s1981_s15 = smov 8  }
  0x14   : > { %1855 = dma.hbm_to_vmem [thread:$0]  (!%p1853_p5), %s2380_s11, 1024, %s384_s28, [#allocation7], %s1980_s14, %s1980_s14, %s1981_s15  }
  0x15   : > { %437 = sbr.rel (%p2077_p2) target bundleno = 2489 (0x9b9), region = 72 }
  0x1a   : > { %1972 = dma.done.wait (%p1856_p3), [#allocation7], 1024  }
  0x1b   : > { %1974 = vsyncadd (%p1856_p3), [#allocation7], 4294966272  ;;  %p495_p0 = scmp.lt.s32.totalorder %s2073_s26, 1  ;;  %v1982_v0 = vmov 0.0   ;;  %v520_v1 = vlaneseq  ;;  %v594_v3 = vld [vmem:[%s2376_s7 + $0x78] sm:$0xff]  ;;  %v593_v4 = vld [vmem:[%s2376_s7 + $0x70] sm:$0xff] }
  0x1c   : > { %674 = vmatprep.mubr.f32.mxu0 %v1982_v0  ;;  %1781 = vmatprep.subr.bf16.mxu1 %v1982_v0  ;;  %v592_v5 = vld [vmem:[%s2376_s7 + $0x68] sm:$0xff]  ;;  %v591_v6 = vld [vmem:[%s2376_s7 + $0x60] sm:$0xff]  ;;  %v590_v7 = vld [vmem:[%s2376_s7 + $0x58] sm:$0xff]  ;;  %vm577_vm3 = vcmask 523264   ;;  %vm682_vm4 = vcmask 64512   ;;  %s1983_s17 = smov 124  }
  0x1d   : > { %s2385_s26 = smov (!%p495_p0, %s2073_s26), 1  ;;  %v2100_v2 = vshrl.u32 %v520_v1, 7  ;;  %626 = vmatprep.subr.mxu0 %v594_v3  ;;  %v589_v10 = vld [vmem:[%s2376_s7 + $0x50] sm:$0xff]  ;;  %v588_v13 = vld [vmem:[%s2376_s7 + $0x48] sm:$0xff]  ;;  %v587_v14 = vld [vmem:[%s2376_s7 + $0x40] sm:$0xff]  ;;  %s1984_s19 = smov 4  }
  0x1e   : > { %s2102_s18 = sshll.u32 %s2385_s26, 3  ;;  %627 = vmatpush1.msra.mxu0 %v593_v4  ;;  %v523_v16 = vld [vmem:[%s2374_s5] sm:$0xf]  ;;  %v586_v17 = vld [vmem:[%s2376_s7 + $0x38] sm:$0xff]  ;;  %v585_v22 = vld [vmem:[%s2376_s7 + $0x30] sm:$0xff]  ;;  %vm1985_vm5 = vmmov 0  }
  0x1f   : > { %s498_s15 = scalar_lea.vmem %s2369_s0, %s2102_s18  ;;  %v526_v8 = vsub.s32 3, %v2100_v2  ;;  %v536_v9 = vsub.s32 0, %v2100_v2  ;;  %628 = vmatprep.subr.mxu0 %v592_v5  ;;  %v547_v11 = vsub.s32 1, %v2100_v2  ;;  %v558_v12 = vsub.s32 2, %v2100_v2  ;;  %v584_v26 = vld [vmem:[%s2376_s7 + $0x28] sm:$0xff]  ;;  %v583_v30 = vld [vmem:[%s2376_s7 + $0x20] sm:$0xff]  ;;  %s510_s16 = scalar_lea.vmem %s2372_s3, %s2102_s18  ;;  %1783 = vmatprep.mubr.msk.bf16.mxu1 %vm1985_vm5, %v1982_v0 }
  0x20   : > { %629 = vmatpush1.msra.mxu0 %v591_v6  ;;  %vm530_vm0 = vcmp.ge.s32.totalorder %v2100_v2, 3  ;;  %v522_v15 = vld [vmem:[%s498_s15] sm:$0xff]  ;;  %vm541_vm1 = vcmp.ge.s32.totalorder %v2100_v2, 2  ;;  %vm552_vm2 = vcmp.ge.s32.totalorder %v2100_v2, 1  ;;  %v582_v34 = vld [vmem:[%s2376_s7 + $0x18] sm:$0xff]  ;;  %v581_v35 = vld [vmem:[%s2376_s7 + $0x10] sm:$0xff]  ;;  %s506_s29 = scalar_lea.vmem %s2371_s2, %s2102_s18 }
  0x21   : > { %630 = vmatprep.subr.mxu0 %v590_v7  ;;  %v527_v18 = vrot.slane %v523_v16, %v526_v8  ;;  %v529_v19 = vrot.slane %v522_v15, 5  ;;  %v537_v20 = vrot.slane %v523_v16, %v536_v9  ;;  %v540_v21 = vrot.slane %v522_v15, 6  ;;  %v580_v38 = vld [vmem:[%s2376_s7 + $0x8] sm:$0xff]  ;;  %v579_v39 = vld [vmem:[%s2376_s7] sm:$0xff]  ;;  %s1986_s20 = smov 64   ;;  %s1989_s21 = smov 48  }
  0x22   : > { %631 = vmatpush1.msra.mxu0 %v589_v10  ;;  %v548_v23 = vrot.slane %v523_v16, %v547_v11  ;;  %v551_v24 = vrot.slane %v522_v15, 7  ;;  %v559_v25 = vrot.slane %v523_v16, %v558_v12  ;;  %v1730_v41 = vld [vmem:[%s2375_s6] ss:$0 sm:$0xff]  ;;  %vm815_vm6 = vcmask 130048   ;;  %s1991_s22 = smov 112   ;;  %s1992_s23 = smov 32  }
  0x23   : > { %632 = vmatprep.subr.mxu0 %v588_v13  ;;  %v528_v27 = vmul.f32 %v527_v18, %v522_v15  ;;  %v533_v28 = vsel %vm530_vm0, %v529_v19, 0.0  ;;  %v544_v29 = vsel %vm541_vm1, %v540_v21, 0.0  ;;  %v595_v49 = vld [vmem:[%s2377_s8] sm:$0x3]  ;;  %v1987_v21 = vmov 4   ;;  %s1993_s24 = smov 96  }
  0x24   : > { %633 = vmatpush1.msra.mxu0 %v587_v14  ;;  %v538_v31 = vmul.f32 %v537_v20, %v533_v28  ;;  %v549_v32 = vmul.f32 %v548_v23, %v544_v29  ;;  %v555_v33 = vsel %vm552_vm2, %v551_v24, 0.0  ;;  %v600_v50 = vrot.slane %v595_v49, %v536_v9  ;;  %v684_v55 = vld [vmem:[%s510_s16] sm:$0xff]  ;;  %1884 = vset.pattern.permute.xlu0 %v1987_v21  ;;  %s1994_s27 = smov 80   ;;  %s1996_s30 = smov 16  }
  0x25   : > { %634 = vmatprep.subr.mxu0 %v586_v17  ;;  %v560_v37 = vmul.f32 %v559_v25, %v555_v33  ;;  %v604_v51 = vrot.slane %v595_v49, %v547_v11  ;;  %vm717_vm7 = vcmp.ge.s32.totalorder %v2100_v2, 4  ;;  %v1990_v33 = vmov 5   ;;  %s502_s16 = scalar_lea.vmem %s2370_s1, %s2102_s18 }
  0x26   : > { %635 = vmatpush1.msra.mxu0 %v585_v22  ;;  %v539_v36 = vadd.f32 %v538_v31, %v528_v27  ;;  %v1988_v31 = vmov 7   ;;  %vm797_vm8 = vcmask 60416   ;;  %vm902_vm10 = vcmask 1043456  }
  0x27   : > { %636 = vmatprep.subr.mxu0 %v584_v26  ;;  %vm1140_vm11 = vcmask 261248   ;;  %vm1311_vm12 = vcmask 392448   ;;  %vm1482_vm13 = vcmask 523648   ;;  %vm1602_vm14 = vcmask 261120  }
  0x28   : > { %637 = vmatpush1.msra.mxu0 %v583_v30  ;;  %v550_v40 = vadd.f32 %v549_v32, %v539_v36  ;;  %v1995_v36 = vmov 6  }
  0x29   : > { %638 = vmatprep.subr.mxu0 %v582_v34 }
  0x2a   : > { %639 = vmatpush1.msra.mxu0 %v581_v35  ;;  %v561_v42 = vadd.f32 %v560_v37, %v550_v40 }
  0x2b   : > { %640 = vmatprep.subr.mxu0 %v580_v38  ;;  %v863_v38 = vand.u32 127, %v520_v1  ;;  %v1147_v1 = vld [vmem:[%s506_s29] sm:$0xff] }
  0x2c   : > { %641 = vmatpush1.msra.mxu0 %v579_v39  ;;  %v569_v43 = vadd.f32 %v1730_v41, %v561_v42 }
  0x2d   : > { %1805 = vmatprep.subr.bf16.mxu0 %v1982_v0  ;;  %vm866_vm9 = vcmp.ge.s32.totalorder %v2100_v2, %v863_v38 }
  0x2e   : > { %v1731_v44 = vmul.f32 -1.442695, %v569_v43 }
  0x30   : > { %1889 = vpow2.f32 %v1731_v44 }
  0x3d   : > { %v1890_v45 = vpop.eup %1889 }
  0x3e   : > { %v573_v46 = vadd.f32 1.0, %v1890_v45 }
  0x40   : > { %1891 = vrcp.f32 %v573_v46 }
  0x4d   : > { %v1892_v47 = vpop.eup %1891 }
  0x4e   : > { %v576_v48 = vmul.f32 %v1892_v47, %v569_v43 }
  0x50   : > { %578 = vst.msk [vmem:[#allocation2] sm:$0xff] %vm577_vm3, %v576_v48  ;;  %1732 = vmatmul.mubr.msk.f32.vlgmr.msra.gmra.mxu0 %vm577_vm3, %v576_v48 }
  0x51   : > { %1807 = vmatprep.mubr.msk.bf16.mxu0 %vm1985_vm5, %v1982_v0 }
 0x110   : > { %v676_v52 = vpop.f32.mrf.mxu0 }
 0x111   : > { %v677_v53 = vadd.f32 %v676_v52, %v600_v50  ;;  %v1148_v50 = vpack.c.bf16 %v1147_v1, %v1147_v1 }
 0x112   : > { %v678_v54 = vpop.f32.mrf.mxu0 }
 0x113   : > { %v679_v56 = vadd.f32 %v678_v54, %v604_v51  ;;  %v2205_v14 = vpack.c.bf16 %v677_v53, %v677_v53  ;;  %v801_v19 = vmul.f32 0.25, %v677_v53  ;;  %v904_v51 = vsel %vm902_vm10, %v1148_v50, 0 }
 0x115   : > { %v685_v57 = vadd.f32 %v684_v55, %v679_v56  ;;  %v802_v20 = vpack.c.bf16 %v801_v19, %v801_v19 }
 0x117   : > { %v687_v58 = vand.u32 2147483647, %v685_v57  ;;  %v686_v3 = vmin.f32 %v685_v57, 0.0 }
 0x119   : > { %v688_v59 = vsub.f32 0.0, %v687_v58 }
 0x11b   : > { %v689_v60 = vmul.f32 1.442695, %v688_v59 }
 0x11d   : > { %1893 = vpow2.f32 %v689_v60 }
 0x12a   : > { %v1894_v61 = vpop.eup %1893 }
 0x12b   : > { %v691_v62 = vadd.f32 1.0, %v1894_v61 }
 0x12d   : > { %1895 = vlog2.f32 %v691_v62 }
 0x13a   : > { %v1896_v63 = vpop.eup %1895 }
 0x13b   : > { %v693_v4 = vmul.f32 0.6931472, %v1896_v63 }
 0x13d   : > { %v694_v5 = vsub.f32 %v686_v3, %v693_v4 }
 0x13f   : > { %696 = vrot.lane.b32.xlu0 %v694_v5, %s1983_s17 }
 0x1b1   : > { %v697_v6 = vpop.permute.xlu0 %696 }
 0x1b2   : > { %v699_v7 = vrot.slane %v697_v6, 7 }
 0x1b4   : > { %v700_v8 = vsel %vm552_vm2, %v699_v7, 0.0 }
 0x1b5   : > { %702 = vrot.lane.b32.xlu0 %v700_v8, %s1984_s19 }
 0x227   : > { %v703_v9 = vpop.permute.xlu0 %702 }
 0x228   : > { %v705_v10 = vadd.f32 %v703_v9, %v694_v5 }
 0x22a   : > { %707 = vrot.lane.b32.xlu1 %v705_v10, %s1983_s17 }
 0x29c   : > { %v708_v11 = vpop.permute.xlu1 %707 }
 0x29d   : > { %v710_v12 = vrot.slane %v708_v11, 6 }
 0x29f   : > { %v711_v13 = vsel %vm541_vm1, %v710_v12, 0.0 }
 0x2a0   : > { %713 = vrot.lane.b32.xlu1 %v711_v13, %s1984_s19 }
 0x2a4   : > { %813 = vrot.lane.b32.xlu1 %v2205_v14, %s1986_s20 }
 0x312   : > { %v714_v15 = vpop.permute.xlu1 %713 }
 0x313   : > { %v716_v16 = vadd.f32 %v714_v15, %v705_v10 }
 0x315   : > { %719 = vrot.lane.b32.xlu0 %v716_v16, %s1983_s17 }
 0x316   : > { %v814_v17 = vpop.permute.xlu1 %813 }
 0x317   : > { %v820_v18 = vsel %vm815_vm6, %v814_v17, 0 }
 0x318   : > { %1782 = vmatpush3.bf16.xpose.msra.mxu1 %v820_v18 }
 0x319   : > { %1787 = vmatprep.subr.bf16.mxu1 %v1982_v0 }
 0x31f   : > { %1784 = vmatmul.mubr.msk.bf16.vlgmr.msra.gmra.mxu1 %vm815_vm6, %v802_v20 }
 0x320   : > { %1789 = vmatprep.mubr.msk.bf16.mxu1 %vm1985_vm5, %v1982_v0  ;;  %1788 = vmatpush3.bf16.msra.mxu1 %v904_v51 }
 0x321   : > { %1793 = vmatprep.subr.bf16.mxu1 %v1982_v0 }
 0x387   : > { %v720_v22 = vpop.permute.xlu0 %719 }
 0x388   : > { %v722_v23 = vrot.slane %v720_v22, 4 }
 0x38a   : > { %v723_v24 = vsel %vm717_vm7, %v722_v23, 0.0 }
 0x38b   : > { %725 = vrot.lane.b32.xlu0 %v723_v24, %s1984_s19 }
 0x3df   : > { %v2216_v25 = vpop.f32.mrf.mxu1 }
 0x3e1   : > { %v1785_v26 = vpop.f32.mrf.mxu1 }
 0x3e3   : > { %v859_v27 = vpop.f32.mrf.mxu1 }
 0x3e5   : > { %v1786_v28 = vpop.f32.mrf.mxu1 }
 0x3fd   : > { %v726_v29 = vpop.permute.xlu0 %725 }
 0x3fe   : > { %v728_v30 = vadd.f32 %v726_v29, %v716_v16 }
 0x400   : > { %868 = vperm.xlu0 %1884, %v728_v30   ;;  %730 = vrot.lane.b32.xlu1 %v728_v30, %s1983_s17 }
 0x41e   : > { %765 = vxpose.xlu0.b32.start.end [1/1] (short) (narrow) %v685_v57, 8 }
 0x447   : > { %1888 = vset.pattern.permute.xlu0 %v1988_v31 }
 0x472   : > { %v731_v32 = vpop.permute.xlu1 %730 }
 0x473   : > { %733 = vxpose.xlu1.b32.start.end [1/1] (short) (narrow) %v731_v32, 8 }
 0x47b   : > { %v869_v34 = vpop.permute.xlu0 %868 }
 0x491   : > { %984 = vrot.lane.b32.xlu1 %v2205_v14, %s1989_s21 }
 0x492   : > { %1885 = vset.pattern.permute.xlu1 %v1990_v33 }
 0x495   : > { %981 = vrot.lane.b32.xlu1 %v802_v20, %s1991_s22 }
 0x499   : > { %1155 = vrot.lane.b32.xlu1 %v2205_v14, %s1992_s23 }
 0x49a   : > { %v781_v35 = vpop.trf.xlu0 }
 0x49b   : > { %799 = vst.msk [vmem:[#allocation4 + $0x4] sm:$0xf] %vm797_vm8, %v781_v35 }
 0x49d   : > { %1152 = vrot.lane.b32.xlu1 %v802_v20, %s1993_s24 }
 0x4a1   : > { %1323 = vrot.lane.b32.xlu1 %v802_v20, %s1994_s27 }
 0x4a2   : > { %v1735_v40 = vld [vmem:[#allocation4 + $0x4] ss:$0 sm:$0xff]  ;;  %v1739_v56 = vld [vmem:[#allocation4 + $0x5] ss:$0 sm:$0xff]  ;;  %v1743_v63 = vld [vmem:[#allocation4 + $0x6] ss:$0 sm:$0xff] }
 0x4a3   : > { %v1747_v9 = vld [vmem:[#allocation4 + $0x7] ss:$0 sm:$0xff] }
 0x4a5   : > { %1033 = vperm.xlu1 %1885, %v728_v30  }
 0x4a9   : > { %1886 = vset.pattern.permute.xlu1 %v1995_v36 }
 0x4aa   : > { %1204 = vperm.xlu1 %1886, %v728_v30  }
 0x4ae   : > { %1887 = vset.pattern.permute.xlu1 %v1988_v31 }
 0x4af   : > { %1375 = vperm.xlu1 %1887, %v728_v30  }
 0x4ef   : > { %v749_v37 = vpop.trf.xlu1 }
 0x4f0   : > { %798 = vst.msk [vmem:[#allocation4] sm:$0xf] %vm797_vm8, %v749_v37 }
 0x4f7   : > { %v1734_v39 = vld [vmem:[#allocation4] ss:$0 sm:$0xff]  ;;  %v1738_v53 = vld [vmem:[#allocation4 + $0x1] ss:$0 sm:$0xff]  ;;  %v1742_v60 = vld [vmem:[#allocation4 + $0x2] ss:$0 sm:$0xff] }
 0x4f8   : > { %v875_v41 = vsub.f32 %v869_v34, %v1734_v39  ;;  %v1746_v7 = vld [vmem:[#allocation4 + $0x3] ss:$0 sm:$0xff] }
 0x4fa   : > { %v880_v42 = vadd.f32 %v1735_v40, %v875_v41 }
 0x4fc   : > { %v881_v43 = vsel %vm866_vm9, %v880_v42, -1e+30 }
 0x4fd   : > { %v882_v44 = vsel %vm682_vm4, %v881_v43, -inf }
 0x4fe   : > { %883 = vmax.xlane.f32.xlu0 %v882_v44 }
 0x503   : > { %v985_v45 = vpop.permute.xlu1 %984 }
 0x504   : > { %v990_v21 = vsel %vm815_vm6, %v985_v45, 0 }
 0x507   : > { %v2231_v46 = vpop.permute.xlu1 %981 }
 0x50b   : > { %v1156_v47 = vpop.permute.xlu1 %1155 }
 0x50c   : > { %v1161_v48 = vsel %vm815_vm6, %v1156_v47, 0 }
 0x50d   : > { %1806 = vmatpush3.bf16.xpose.msra.mxu0 %v1161_v48 }
 0x50e   : > { %1817 = vmatprep.subr.bf16.mxu0 %v1982_v0 }
 0x50f   : > { %v1153_v49 = vpop.permute.xlu1 %1152 }
 0x513   : > { %v1324_v52 = vpop.permute.xlu1 %1323 }
 0x514   : > { %1326 = vrot.lane.b32.xlu0 %v2205_v14, %s1996_s30  ;;  %1808 = vmatmul.mubr.msk.bf16.vlgmr.msra.gmra.mxu0 %vm815_vm6, %v1153_v49 }
 0x515   : > { %1819 = vmatprep.mubr.msk.bf16.mxu0 %vm1985_vm5, %v1982_v0 }
 0x520   : > { %v1034_v54 = vpop.permute.xlu1 %1033 }
 0x521   : > { %v1040_v55 = vsub.f32 %v1034_v54, %v1738_v53 }
 0x523   : > { %v1045_v57 = vadd.f32 %v1739_v56, %v1040_v55 }
 0x525   : > { %v1205_v58 = vpop.permute.xlu1 %1204  ;;  %v2248_v59 = vsel %vm866_vm9, %v1045_v57, -1e+30 }
 0x526   : > { %v1047_v61 = vsel %vm682_vm4, %v2248_v59, -inf  ;;  %v1211_v62 = vsub.f32 %v1205_v58, %v1742_v60 }
 0x527   : > { %1048 = vmax.xlane.f32.xlu1 %v1047_v61 }
 0x528   : > { %v1216_v3 = vadd.f32 %v1743_v63, %v1211_v62 }
 0x52a   : > { %v1217_v4 = vsel %vm866_vm9, %v1216_v3, -1e+30  ;;  %v1376_v6 = vpop.permute.xlu1 %1375 }
 0x52b   : > { %v1218_v5 = vsel %vm682_vm4, %v1217_v4, -inf  ;;  %v1382_v8 = vsub.f32 %v1376_v6, %v1746_v7 }
 0x52d   : > { %v1387_v10 = vadd.f32 %v1747_v9, %v1382_v8 }
 0x52f   : > { %v1388_v11 = vsel %vm866_vm9, %v1387_v10, -1e+30 }
 0x530   : > { %v1389_v12 = vsel %vm682_vm4, %v1388_v11, -inf }
 0x533   : > { %1219 = vmax.xlane.f32.xlu0 %v1218_v5 }
 0x538   : > { %1236 = vrot.lane.b32.xlu1 %v1148_v50, %s1993_s24  ;;  %s514_s24 = scalar_lea.vmem %s2373_s4, %s2102_s18 }
 0x549   : > { %1065 = vrot.lane.b32.xlu0 %v1148_v50, %s1991_s22 }
 0x55c   : > { %1390 = vmax.xlane.f32.xlu1 %v1389_v12 }
 0x56d   : > { %1407 = vrot.lane.b32.xlu1 %v1148_v50, %s1994_s27 }
 0x587   : > { %v884_v13 = vpop.xlane.xlu0 %883 }
 0x588   : > { %v2261_v14 = vmax.f32 %v884_v13, -1e+30 }
 0x58a   : > { %v889_v15 = vsub.f32 %v881_v43, %v2261_v14  ;;  %v886_v36 = vsub.f32 -1e+30, %v2261_v14  ;;  %v948_v12 = vsub.f32 0.0, %v2261_v14 }
 0x58b   : > { %v1327_v16 = vpop.permute.xlu0 %1326 }
 0x58c   : > { %v890_v17 = vmul.f32 1.442695, %v889_v15  ;;  %v1332_v18 = vsel %vm815_vm6, %v1327_v16, 0  ;;  %v887_v38 = vmul.f32 1.442695, %v886_v36 }
 0x58d   : > { %1818 = vmatpush3.bf16.xpose.msra.mxu0 %v1332_v18  ;;  %v949_v13 = vmul.f32 1.442695, %v948_v12 }
 0x58e   : > { %1897 = vpow2.f32 %v890_v17  ;;  %1829 = vmatprep.subr.mxu0 %v1982_v0 }
 0x594   : > { %1820 = vmatmul.mubr.msk.bf16.vlgmr.msra.gmra.mxu0 %vm815_vm6, %v1324_v52 }
 0x595   : > { %1845 = vmatprep.mubr.msk.f32.mxu0 %vm1985_vm5, %v1982_v0 }
 0x59b   : > { %v1898_v2 = vpop.eup %1897 }
 0x59c   : > { %v2270_v19 = vmul.f32 %v1898_v2, %v2216_v25 }
 0x59e   : > { %v898_v20 = vpack.c.bf16 %v2270_v19, %v2270_v19  ;;  %v894_v10 = vsel %vm682_vm4, %v2270_v19, 0.0 }
 0x5a0   : > { %1790 = vmatmul.mubr.msk.bf16.vlgmr.msra.gmra.mxu1 %vm682_vm4, %v898_v20 }
 0x5a1   : > { %1794 = vmatpush3.bf16.xpose.msra.mxu1 %v990_v21  ;;  %1795 = vmatprep.mubr.msk.bf16.mxu1 %vm1985_vm5, %v1982_v0 }
 0x5a2   : > { %1799 = vmatprep.subr.bf16.mxu1 %v1982_v0 }
 0x5a8   : > { %1796 = vmatmul.mubr.msk.bf16.vlgmr.msra.gmra.mxu1 %vm815_vm6, %v2231_v46 }
 0x5a9   : > { %1801 = vmatprep.mubr.msk.bf16.mxu1 %vm1985_vm5, %v1982_v0 }
 0x5b0   : > { %v1049_v35 = vpop.xlane.xlu1 %1048 }
 0x5b1   : > { %v2290_v40 = vmax.f32 %v1049_v35, -1e+30 }
 0x5b3   : > { %v1054_v42 = vsub.f32 %v2248_v59, %v2290_v40  ;;  %v1051_v16 = vsub.f32 -1e+30, %v2290_v40 }
 0x5b4   : > { %v1237_v37 = vpop.permute.xlu1 %1236 }
 0x5b5   : > { %v1055_v45 = vmul.f32 1.442695, %v1054_v42  ;;  %v1052_v18 = vmul.f32 1.442695, %v1051_v16 }
 0x5bc   : > { %v1220_v22 = vpop.xlane.xlu0 %1219 }
 0x5bd   : > { %v2283_v23 = vmax.f32 %v1220_v22, -1e+30 }
 0x5bf   : > { %v1225_v24 = vsub.f32 %v1217_v4, %v2283_v23  ;;  %v1242_v4 = vsel %vm902_vm10, %v1237_v37, 0  ;;  %v1222_v20 = vsub.f32 -1e+30, %v2283_v23 }
 0x5c0   : > { %v1066_v33 = vpop.permute.xlu0 %1065 }
 0x5c1   : > { %v1226_v25 = vmul.f32 1.442695, %v1225_v24  ;;  %v1071_v34 = vsel %vm902_vm10, %v1066_v33, 0 }
 0x5c2   : > { %1800 = vmatpush3.bf16.msra.mxu1 %v1071_v34 }
 0x5c3   : > { %1899 = vpow2.f32 %v1226_v25  ;;  %1811 = vmatprep.subr.bf16.mxu1 %v1982_v0  ;;  %v1115_v25 = vsub.f32 0.0, %v2290_v40 }
 0x5c4   : > { %1901 = vpow2.f32 %v887_v38 }
 0x5c5   : > { %1903 = vpow2.f32 %v1055_v45  ;;  %v1116_v14 = vmul.f32 1.442695, %v1115_v25 }
 0x5d0   : > { %v1900_v26 = vpop.eup %1899 }
 0x5d1   : > { %v1902_v49 = vpop.eup %1901 }
 0x5d2   : > { %v893_v50 = vmul.f32 0.0, %v1902_v49  ;;  %v1904_v56 = vpop.eup %1903 }
 0x5d4   : > { %v1197_v27 = vpop.f32.mrf.mxu0 }
 0x5d5   : > { %v1228_v28 = vmul.f32 %v1900_v26, %v1197_v27  ;;  %v1223_v26 = vmul.f32 1.442695, %v1222_v20 }
 0x5d6   : > { %v1809_v29 = vpop.f32.mrf.mxu0 }
 0x5d7   : > { %v1230_v30 = vsel %vm682_vm4, %v1228_v28, 0.0  ;;  %v1234_v8 = vpack.c.bf16 %v1228_v28, %v1228_v28  ;;  %v1286_v29 = vsub.f32 0.0, %v2283_v23 }
 0x5d8   : > { %v1200_v31 = vpop.f32.mrf.mxu0  ;;  %1231 = vadd.xlane.f32.xlu1 %v1230_v30 }
 0x5da   : > { %v1810_v32 = vpop.f32.mrf.mxu0 }
 0x5db   : > { %v1287_v32 = vmul.f32 1.442695, %v1286_v29 }
 0x5e5   : > { %v1391_v39 = vpop.xlane.xlu1 %1390 }
 0x5e6   : > { %v2292_v41 = vmax.f32 %v1391_v39, -1e+30 }
 0x5e8   : > { %v1396_v43 = vsub.f32 %v1388_v11, %v2292_v41  ;;  %v1393_v28 = vsub.f32 -1e+30, %v2292_v41  ;;  %v1457_v36 = vsub.f32 0.0, %v2292_v41 }
 0x5e9   : > { %v1408_v7 = vpop.permute.xlu1 %1407 }
 0x5ea   : > { %v1397_v47 = vmul.f32 1.442695, %v1396_v43  ;;  %v1413_v9 = vsel %vm902_vm10, %v1408_v7, 0  ;;  %v1394_v30 = vmul.f32 1.442695, %v1393_v28 }
 0x5eb   : > { %v1458_v42 = vmul.f32 1.442695, %v1457_v36 }
 0x5ec   : > { %1905 = vpow2.f32 %v1397_v47 }
 0x5ed   : > { %1907 = vpow2.f32 %v949_v13 }
 0x5ee   : > { %1909 = vpow2.f32 %v1052_v18 }
 0x5f9   : > { %v1906_v59 = vpop.eup %1905 }
 0x5fa   : > { %v1908_v22 = vpop.eup %1907 }
 0x5fb   : > { %v1910_v31 = vpop.eup %1909 }
 0x5fc   : > { %v1058_v33 = vmul.f32 0.0, %v1910_v31 }
 0x654   : > { %v1368_v44 = vpop.f32.mrf.mxu0 }
 0x655   : > { %v1399_v61 = vmul.f32 %v1906_v59, %v1368_v44 }
 0x656   : > { %v1821_v46 = vpop.f32.mrf.mxu0 }
 0x657   : > { %v1401_v6 = vsel %vm682_vm4, %v1399_v61, 0.0  ;;  %v1405_v11 = vpack.c.bf16 %v1399_v61, %v1399_v61 }
 0x658   : > { %v1371_v48 = vpop.f32.mrf.mxu0 }
 0x65a   : > { %v1822_v1 = vpop.f32.mrf.mxu0 }
 0x660   : > { %v940_v51 = vpop.f32.mrf.mxu1 }
 0x661   : > { %v2297_v52 = vadd.f32 %v940_v51, %v893_v50  ;;  %v1232_v40 = vpop.xlane.xlu1 %1231 }
 0x662   : > { %v1791_v53 = vpop.f32.mrf.mxu1 }
 0x664   : > { %v943_v54 = vpop.f32.mrf.mxu1 }
 0x666   : > { %v1792_v55 = vpop.f32.mrf.mxu1 }
 0x668   : > { %v1026_v57 = vpop.f32.mrf.mxu1 }
 0x669   : > { %v1057_v58 = vmul.f32 %v1904_v56, %v1026_v57 }
 0x66a   : > { %v1797_v60 = vpop.f32.mrf.mxu1 }
 0x66b   : > { %v1063_v62 = vpack.c.bf16 %v1057_v58, %v1057_v58  ;;  %v1059_v63 = vsel %vm682_vm4, %v1057_v58, 0.0 }
 0x66c   : > { %1060 = vadd.xlane.f32.xlu0 %v1059_v63  ;;  %v1029_v3 = vpop.f32.mrf.mxu1 }
 0x66d   : > { %1802 = vmatmul.mubr.msk.bf16.vlgmr.msra.gmra.mxu1 %vm682_vm4, %v1063_v62 }
 0x66e   : > { %1812 = vmatpush3.bf16.msra.mxu1 %v1242_v4  ;;  %v1798_v5 = vpop.f32.mrf.mxu1  ;;  %1813 = vmatprep.mubr.msk.bf16.mxu1 %vm1985_vm5, %v1982_v0 }
 0x66f   : > { %1823 = vmatprep.subr.bf16.mxu1 %v1982_v0 }
 0x670   : > { %1402 = vadd.xlane.f32.xlu0 %v1401_v6 }
 0x674   : > { %895 = vadd.xlane.f32.xlu0 %v894_v10 }
 0x675   : > { %1814 = vmatmul.mubr.msk.bf16.vlgmr.msra.gmra.mxu1 %vm682_vm4, %v1234_v8 }
 0x676   : > { %1824 = vmatpush3.bf16.msra.mxu1 %v1413_v9  ;;  %1825 = vmatprep.mubr.msk.bf16.mxu1 %vm1985_vm5, %v1982_v0 }
 0x67d   : > { %1826 = vmatmul.mubr.msk.bf16.vlgmr.msra.gmra.mxu1 %vm682_vm4, %v1405_v11 }
 0x6f5   : > { %v1061_v15 = vpop.xlane.xlu0 %1060 }
 0x6f6   : > { %v1062_v34 = vadd.f32 %v1061_v15, %v1058_v33 }
 0x6f8   : > { %v1114_v39 = vand.u32 2147483647, %v1062_v34 }
 0x6f9   : > { %v1403_v17 = vpop.xlane.xlu0 %1402 }
 0x6fd   : > { %v896_v2 = vpop.xlane.xlu0 %895 }
 0x6fe   : > { %v897_v19 = vadd.f32 %v896_v2, %v893_v50 }
 0x700   : > { %v947_v21 = vand.u32 2147483647, %v897_v19 }
 0x702   : > { %v951_v24 = vmax.f32 %v947_v21, %v1908_v22 }
 0x704   : > { %v952_v27 = vadd.f32 1e-06, %v951_v24 }
 0x706   : > { %1911 = vrcp.f32 %v952_v27 }
 0x707   : > { %1913 = vpow2.f32 %v1223_v26 }
 0x708   : > { %1915 = vpow2.f32 %v1116_v14 }
 0x709   : > { %1917 = vpow2.f32 %v1394_v30 }
 0x70a   : > { %1919 = vpow2.f32 %v1287_v32 }
 0x70b   : > { %1921 = vpow2.f32 %v1458_v42 }
 0x713   : > { %v1912_v35 = vpop.eup %1911 }
 0x714   : > { %v2321_v37 = vmul.f32 %v1912_v35, %v2297_v52  ;;  %v1914_v38 = vpop.eup %1913 }
 0x715   : > { %v1229_v43 = vmul.f32 0.0, %v1914_v38  ;;  %v1916_v44 = vpop.eup %1915 }
 0x716   : > { %v1118_v45 = vmax.f32 %v1114_v39, %v1916_v44  ;;  %v1918_v46 = vpop.eup %1917  ;;  %v956_v13 = vsel %vm815_vm6, %v2321_v37, 0.0 }
 0x717   : > { %v1233_v23 = vadd.f32 %v1232_v40, %v1229_v43  ;;  %v1400_v1 = vmul.f32 0.0, %v1918_v46  ;;  %v1920_v49 = vpop.eup %1919 }
 0x718   : > { %v1119_v48 = vadd.f32 1e-06, %v1118_v45  ;;  %v1922_v53 = vpop.eup %1921 }
 0x719   : > { %v1285_v47 = vand.u32 2147483647, %v1233_v23  ;;  %v1404_v41 = vadd.f32 %v1403_v17, %v1400_v1 }
 0x71a   : > { %1923 = vrcp.f32 %v1119_v48 }
 0x71b   : > { %v1289_v50 = vmax.f32 %v1285_v47, %v1920_v49  ;;  %v1456_v52 = vand.u32 2147483647, %v1404_v41  ;;  %v1519_v49 = vld [vmem:[#allocation6 + $0x38] sm:$0xff] }
 0x71c   : > { %1830 = vmatpush3.msra.mxu0 %v1519_v49 }
 0x71d   : > { %v1290_v51 = vadd.f32 1e-06, %v1289_v50  ;;  %v1460_v54 = vmax.f32 %v1456_v52, %v1922_v53  ;;  %1831 = vmatprep.subr.mxu0 %v1982_v0  ;;  %v1518_v53 = vld [vmem:[#allocation6 + $0x30] sm:$0xff] }
 0x71e   : > { %1832 = vmatpush3.msra.mxu0 %v1518_v53 }
 0x71f   : > { %1925 = vrcp.f32 %v1290_v51  ;;  %v1461_v56 = vadd.f32 1e-06, %v1460_v54  ;;  %v1517_v54 = vld [vmem:[#allocation6 + $0x28] sm:$0xff]  ;;  %1833 = vmatprep.subr.mxu0 %v1982_v0 }
 0x720   : > { %1834 = vmatpush3.msra.mxu0 %v1517_v54 }
 0x721   : > { %1927 = vrcp.f32 %v1461_v56  ;;  %v1516_v56 = vld [vmem:[#allocation6 + $0x20] sm:$0xff]  ;;  %1835 = vmatprep.subr.mxu0 %v1982_v0 }
 0x722   : > { %1836 = vmatpush3.msra.mxu0 %v1516_v56 }
 0x723   : > { %1837 = vmatprep.subr.mxu0 %v1982_v0 }
 0x727   : > { %v1924_v58 = vpop.eup %1923 }
 0x72c   : > { %v1926_v5 = vpop.eup %1925 }
 0x72d   : > { %v1107_v55 = vpop.f32.mrf.mxu1 }
 0x72e   : > { %v1113_v57 = vadd.f32 %v1107_v55, %v1058_v33  ;;  %v1928_v15 = vpop.eup %1927 }
 0x72f   : > { %v1803_v59 = vpop.f32.mrf.mxu1 }
 0x730   : > { %v1122_v60 = vmul.f32 %v1924_v58, %v1113_v57  ;;  %v1515_v58 = vld [vmem:[#allocation6 + $0x18] sm:$0xff] }
 0x731   : > { %v1110_v61 = vpop.f32.mrf.mxu1  ;;  %1838 = vmatpush3.msra.mxu0 %v1515_v58 }
 0x732   : > { %v1123_v62 = vsel %vm815_vm6, %v1122_v60, 0.0  ;;  %1839 = vmatprep.subr.mxu0 %v1982_v0 }
 0x733   : > { %1124 = vadd.xlane.f32.xlu1 %v1123_v62  ;;  %v1804_v63 = vpop.f32.mrf.mxu1  ;;  %v1513_v62 = vld [vmem:[#allocation6 + $0x8] sm:$0xff] }
 0x735   : > { %v1278_v3 = vpop.f32.mrf.mxu1 }
 0x736   : > { %v1284_v4 = vadd.f32 %v1278_v3, %v1229_v43  ;;  %v1512_v3 = vld [vmem:[#allocation6] sm:$0xff] }
 0x737   : > { %v1815_v6 = vpop.f32.mrf.mxu1 }
 0x738   : > { %v1293_v7 = vmul.f32 %v1926_v5, %v1284_v4  ;;  %v1484_v5 = vld [vmem:[%s502_s16] sm:$0xff] }
 0x739   : > { %v1281_v8 = vpop.f32.mrf.mxu1  ;;  %v1751_v6 = vmul.f32 -1.442695, %v1484_v5 }
 0x73a   : > { %v1294_v9 = vsel %vm815_vm6, %v1293_v7, 0.0 }
 0x73b   : > { %1295 = vadd.xlane.f32.xlu0 %v1294_v9  ;;  %v1816_v10 = vpop.f32.mrf.mxu1 }
 0x73d   : > { %v1449_v11 = vpop.f32.mrf.mxu1 }
 0x73e   : > { %v1455_v12 = vadd.f32 %v1449_v11, %v1400_v1  ;;  %v1750_v11 = vld [vmem:[%s2379_s10] ss:$0 sm:$0xff] }
 0x73f   : > { %957 = vadd.xlane.f32.xlu0 %v956_v13  ;;  %v1827_v16 = vpop.f32.mrf.mxu1 }
 0x740   : > { %v1464_v17 = vmul.f32 %v1928_v15, %v1455_v12  ;;  %v1495_v12 = vld [vmem:[#allocation2] sm:$0xff] }
 0x741   : > { %v1452_v18 = vpop.f32.mrf.mxu1  ;;  %v1749_v15 = vld [vmem:[%s2378_s9] ss:$0 sm:$0xff]  ;;  %v1502_v16 = vmul.f32 %v1750_v11, %v1495_v12 }
 0x742   : > { %v1465_v2 = vsel %vm815_vm6, %v1464_v17, 0.0 }
 0x743   : > { %1466 = vadd.xlane.f32.xlu1 %v1465_v2  ;;  %v1828_v19 = vpop.f32.mrf.mxu1 }
 0x7bc   : > { %v1125_v20 = vpop.xlane.xlu1 %1124 }
 0x7bd   : > { %v1126_v21 = vmul.f32 0.0625, %v1125_v20 }
 0x7bf   : > { %v1127_v22 = vsub.f32 %v1122_v60, %v1126_v21  ;;  %v1514_v60 = vld [vmem:[#allocation6 + $0x10] sm:$0xff]  ;;  %v1752_v21 = vld [vmem:[%s2381_s12] ss:$0 sm:$0xff] }
 0x7c0   : > { %1840 = vmatpush3.msra.mxu0 %v1514_v60 }
 0x7c1   : > { %v1128_v24 = vmul.f32 %v1127_v22, %v1127_v22  ;;  %1841 = vmatprep.subr.mxu0 %v1982_v0 }
 0x7c2   : > { %1842 = vmatpush3.msra.mxu0 %v1513_v62 }
 0x7c3   : > { %v1129_v25 = vsel %vm815_vm6, %v1128_v24, 0.0  ;;  %1843 = vmatprep.subr.mxu0 %v1982_v0  ;;  %v1600_v24 = vld [vmem:[%s514_s24] sm:$0xff] }
 0x7c4   : > { %v1296_v26 = vpop.xlane.xlu0 %1295  ;;  %1130 = vadd.xlane.f32.xlu1 %v1129_v25  ;;  %1844 = vmatpush3.msra.mxu0 %v1512_v3 }
 0x7c5   : > { %v1297_v27 = vmul.f32 0.0625, %v1296_v26 }
 0x7c7   : > { %v1298_v14 = vsub.f32 %v1293_v7, %v1297_v27 }
 0x7c8   : > { %v958_v28 = vpop.xlane.xlu0 %957 }
 0x7c9   : > { %v960_v29 = vmul.f32 0.0625, %v958_v28  ;;  %v1299_v30 = vmul.f32 %v1298_v14, %v1298_v14 }
 0x7cb   : > { %v961_v31 = vsub.f32 %v2321_v37, %v960_v29  ;;  %v1300_v32 = vsel %vm815_vm6, %v1299_v30, 0.0 }
 0x7cc   : > { %1301 = vadd.xlane.f32.xlu0 %v1300_v32  ;;  %v1467_v33 = vpop.xlane.xlu1 %1466 }
 0x7cd   : > { %v1468_v34 = vmul.f32 0.0625, %v1467_v33  ;;  %v962_v35 = vmul.f32 %v961_v31, %v961_v31 }
 0x7cf   : > { %v1469_v36 = vsub.f32 %v1464_v17, %v1468_v34  ;;  %v963_v38 = vsel %vm815_vm6, %v962_v35, 0.0 }
 0x7d0   : > { %964 = vadd.xlane.f32.xlu0 %v963_v38 }
 0x7d1   : > { %v1470_v39 = vmul.f32 %v1469_v36, %v1469_v36 }
 0x7d3   : > { %v1471_v40 = vsel %vm815_vm6, %v1470_v39, 0.0 }
 0x7d4   : > { %1472 = vadd.xlane.f32.xlu1 %v1471_v40 }
 0x84d   : > { %v1131_v42 = vpop.xlane.xlu1 %1130 }
 0x84e   : > { %v1132_v43 = vmul.f32 0.0625, %v1131_v42 }
 0x850   : > { %v1133_v44 = vadd.f32 1e-05, %v1132_v43 }
 0x852   : > { %1929 = vrsqrt.f32 %v1133_v44 }
 0x855   : > { %v1302_v23 = vpop.xlane.xlu0 %1301 }
 0x856   : > { %v1303_v37 = vmul.f32 0.0625, %v1302_v23 }
 0x858   : > { %v1304_v45 = vadd.f32 1e-05, %v1303_v37 }
 0x859   : > { %v965_v46 = vpop.xlane.xlu0 %964 }
 0x85a   : > { %1931 = vrsqrt.f32 %v1304_v45  ;;  %v966_v47 = vmul.f32 0.0625, %v965_v46 }
 0x85c   : > { %v967_v48 = vadd.f32 1e-05, %v966_v47 }
 0x85d   : > { %v1473_v1 = vpop.xlane.xlu1 %1472 }
 0x85e   : > { %1933 = vrsqrt.f32 %v967_v48  ;;  %v1474_v50 = vmul.f32 0.0625, %v1473_v1 }
 0x85f   : > { %v1930_v41 = vpop.eup %1929 }
 0x860   : > { %v1475_v51 = vadd.f32 1e-05, %v1474_v50  ;;  %v1135_v52 = vmul.f32 %v1930_v41, %v1127_v22 }
 0x862   : > { %1935 = vrsqrt.f32 %v1475_v51  ;;  %1137 = vrot.lane.b32.xlu1 %v1135_v52, %s1996_s30  ;;  %s518_s30 = scalar_lea.vmem %s2382_s13, %s2102_s18 }
 0x863   : > { %1937 = vpow2.f32 %v1751_v6 }
 0x867   : > { %v1932_v55 = vpop.eup %1931 }
 0x868   : > { %v1306_v57 = vmul.f32 %v1932_v55, %v1298_v14 }
 0x86a   : > { %1308 = vrot.lane.b32.xlu0 %v1306_v57, %s1992_s23 }
 0x86b   : > { %v1934_v59 = vpop.eup %1933 }
 0x86c   : > { %v969_v61 = vmul.f32 %v1934_v59, %v961_v31 }
 0x86e   : > { %970 = vst.msk [vmem:[#allocation5] sm:$0xff] %vm815_vm6, %v969_v61 }
 0x86f   : > { %v1936_v63 = vpop.eup %1935 }
 0x870   : > { %v1477_v4 = vmul.f32 %v1936_v63, %v1469_v36  ;;  %v1938_v8 = vpop.eup %1937 }
 0x871   : > { %v1507_v9 = vadd.f32 1.0, %v1938_v8 }
 0x872   : > { %1479 = vrot.lane.b32.xlu1 %v1477_v4, %s1989_s21 }
 0x873   : > { %1939 = vrcp.f32 %v1507_v9 }
 0x880   : > { %v1940_v13 = vpop.eup %1939 }
 0x881   : > { %v1510_v2 = vmul.f32 %v1940_v13, %v1484_v5 }
 0x8d4   : > { %v1138_v7 = vpop.permute.xlu1 %1137 }
 0x8d5   : > { %1141 = vst.msk [vmem:[#allocation5] sm:$0xff] %vm1140_vm11, %v1138_v7 }
 0x8dc   : > { %v1309_v10 = vpop.permute.xlu0 %1308 }
 0x8dd   : > { %1312 = vst.msk [vmem:[#allocation5] sm:$0xff] %vm1311_vm12, %v1309_v10 }
 0x8e4   : > { %v1480_v0 = vpop.permute.xlu1 %1479 }
 0x8e5   : > { %1483 = vst.msk [vmem:[#allocation5] sm:$0xff] %vm1482_vm13, %v1480_v0 }
 0x8ec   : > { %v1485_v17 = vld [vmem:[#allocation5] sm:$0xff] }
 0x8ed   : > { %v1493_v18 = vmul.f32 %v1749_v15, %v1485_v17 }
 0x8ef   : > { %v1503_v19 = vadd.f32 %v1502_v16, %v1493_v18 }
 0x8f1   : > { %v1511_v20 = vmul.f32 %v1510_v2, %v1503_v19 }
 0x8f3   : > { %1846 = vmatmul.mubr.msk.f32.vlgmr.msra.gmra.mxu0 %vm577_vm3, %v1511_v20 }
 0x9b3   : > { %v1596_v22 = vpop.f32.mrf.mxu0 }
 0x9b4   : > { %v1597_v25 = vadd.f32 %v1752_v21, %v1596_v22 }
 0x9b5   : > { %v1847_v26 = vpop.f32.mrf.mxu0 }
 0x9b6   : > { %v1601_v27 = vadd.f32 %v1600_v24, %v1597_v25 }
 0x9b8   : > { %1603 = vst.msk [vmem:[%s518_s30] sm:$0xff] %vm1602_vm14, %v1601_v27 }
 0x9b9 PF: > { %s24_s25 = sadd.s32 1, %s1977_s25  }
 0x9ba   : > { %p21_p1 = scmp.ge.s32.totalorder %s24_s25, 4  }
 0x9bc   :  { %23 = sbr.rel (!%p21_p1) target bundleno = 1 (0x1), region = 120 }
 0x9c1   :  { %1623 = vsyncpa [#allocation7], 1 }
 0x9c2   :  { %1625 = vsyncpa [#allocation7 + $0x1], 1 }

</bundles_post_ra>
